<compile_context>
chip_gen: v6e
topology: v6e:2x2x1
jax: 0.10.0
libtpu: 0.0.40
codegen_flags: <defaults>
</compile_context>

<pallas_src>
import functools
import math

import jax
import jax.numpy as jnp
from jax import lax
from jax.experimental import pallas as pl
from jax.experimental.pallas import tpu as pltpu


_MATMUL_DTYPE = jnp.bfloat16   # MXU-native operand dtype on v5e/v6e/v7x


# ------------------------------ small helpers --------------------------------

def _round_up(x, m):
    return ((x + m - 1) // m) * m


def _vmem_limit_bytes(estimate):
    """Explicit scoped-VMEM budget sized to the actual tiles (+margin)."""
    return int(min(max(int(estimate * 1.5) + (8 << 20), 32 << 20), 96 << 20))


def _const_spec(shape):
    """BlockSpec for a weight whose block index never changes: single-buffered."""
    return pl.BlockSpec(shape, lambda i: (0,) * len(shape),
                        pipeline_mode=pl.Buffered(1))


# ----------------------------- fused Pallas kernels --------------------------

def _lmhra_kernel(x_ref, w1_ref, b1_ref, wd_ref, bd_ref, w2_ref, b2_ref, o_ref,
                  *, T, HW):
    """Local_MHRA (BN folded into the first 1x1x1 conv) + residual for one clip.

    Block is the full (1, T, S, C) residual slab: the CLS token (row 0 of S) is
    passed through unchanged, the LMHRA branch runs on the HW spatial tokens.
    """
    x = x_ref[0].astype(jnp.float32)                       # (T, S, C)
    C = x_ref.shape[-1]
    reC = w1_ref.shape[1]

    sp = x[:, 1:, :]                                       # (T, HW, C) spatial slab
    sp2 = sp.reshape(T * HW, C)

    # 1x1x1 conv (BN folded), bf16 operands, f32 accumulation.
    h = jnp.dot(sp2.astype(_MATMUL_DTYPE), w1_ref[...],
                preferred_element_type=jnp.float32) + b1_ref[...].astype(jnp.float32)
    h3 = h.reshape(T, HW, reC)

    # Depthwise temporal conv, kernel (3,1,1), zero-padded in T.  3-tap sum via
    # two shifted slice-adds straight from h3 (no halo scratch, no zero stores).
    wd = wd_ref[...].astype(jnp.float32)                   # (3, reC)
    y = h3 * wd[1]
    if T > 1:
        zrow = jnp.zeros((1, HW, reC), jnp.float32)
        y = y + jnp.concatenate([zrow, h3[:T - 1] * wd[0]], axis=0)   # prev frame
        y = y + jnp.concatenate([h3[1:] * wd[2], zrow], axis=0)       # next frame
    y = y + bd_ref[...].astype(jnp.float32)

    # 1x1x1 conv back to C, then residual on the spatial tokens only.
    out = jnp.dot(y.reshape(T * HW, reC).astype(_MATMUL_DTYPE), w2_ref[...],
                  preferred_element_type=jnp.float32) + b2_ref[...].astype(jnp.float32)
    out_sp = (sp2 + out).reshape(T, HW, C)

    o_ref[0, :, :1, :] = x[:, :1, :].astype(o_ref.dtype)   # CLS pass-through
    o_ref[0, :, 1:, :] = out_sp.astype(o_ref.dtype)


def _attn_kernel(x_ref, g_ref, bg_ref, win_ref, bin_ref, wout_ref, bout_ref,
                 o_ref, *, heads, scale):
    """LayerNorm -> QKV -> per-head softmax attention -> out proj -> residual.

    One batch row per grid step (batch lives in the grid); everything in the
    body is a plain 2-D matmul; head merge is folded into the output projection.
    """
    S, C = x_ref.shape[1], x_ref.shape[2]
    dh = C // heads

    x = x_ref[0].astype(jnp.float32)                       # (S, C)
    mu = jnp.mean(x, axis=-1, keepdims=True)
    var = jnp.mean(jnp.square(x - mu), axis=-1, keepdims=True)
    xn = (x - mu) * lax.rsqrt(var + 1e-5) * g_ref[...].astype(jnp.float32) \
         + bg_ref[...].astype(jnp.float32)

    qkv = jnp.dot(xn.astype(_MATMUL_DTYPE), win_ref[...],
                  preferred_element_type=jnp.float32) \
          + bin_ref[...].astype(jnp.float32)               # (S, 3C) f32

    w_out = wout_ref[...]                                  # (C, C) bf16
    y = jnp.zeros((S, C), jnp.float32)
    for h in range(heads):
        q = qkv[:, h * dh:(h + 1) * dh] * scale
        k = qkv[:, C + h * dh:C + (h + 1) * dh]
        v = qkv[:, 2 * C + h * dh:2 * C + (h + 1) * dh]
        s = lax.dot_general(q.astype(_MATMUL_DTYPE), k.astype(_MATMUL_DTYPE),
                            (((1,), (1,)), ((), ())),
                            preferred_element_type=jnp.float32)      # (S, S)
        s = s - jnp.max(s, axis=-1, keepdims=True)
        p = jnp.exp(s)
        l = jnp.sum(p, axis=-1, keepdims=True)
        o_h = jnp.dot(p.astype(_MATMUL_DTYPE), v.astype(_MATMUL_DTYPE),
                      preferred_element_type=jnp.float32) / l        # exact softmax
        # fold the head-merge into the output projection (no concatenate)
        y = y + jnp.dot(o_h.astype(_MATMUL_DTYPE), w_out[h * dh:(h + 1) * dh, :],
                        preferred_element_type=jnp.float32)
    y = y + bout_ref[...].astype(jnp.float32)
    o_ref[0] = (x + y).astype(o_ref.dtype)


def _mlp_kernel(x_ref, g_ref, bg_ref, wfc_ref, bfc_ref, wpj_ref, bpj_ref, o_ref):
    """LayerNorm -> c_fc -> QuickGELU -> c_proj -> residual, one row tile."""
    x = x_ref[...].astype(jnp.float32)                     # (TM, C)
    mu = jnp.mean(x, axis=-1, keepdims=True)
    var = jnp.mean(jnp.square(x - mu), axis=-1, keepdims=True)
    xn = (x - mu) * lax.rsqrt(var + 1e-5) * g_ref[...].astype(jnp.float32) \
         + bg_ref[...].astype(jnp.float32)
    h = jnp.dot(xn.astype(_MATMUL_DTYPE), wfc_ref[...],
                preferred_element_type=jnp.float32) + bfc_ref[...].astype(jnp.float32)
    h = h * jax.nn.sigmoid(1.702 * h)                      # QuickGELU (f32)
    y = jnp.dot(h.astype(_MATMUL_DTYPE), wpj_ref[...],
                preferred_element_type=jnp.float32) + bpj_ref[...].astype(jnp.float32)
    o_ref[...] = (x + y).astype(o_ref.dtype)


# ------------------------------- kernel wrappers -----------------------------

def local_mhra_block(x4, p):
    """x4: (N, T, S, C).  Returns x4 with the LMHRA residual added on x4[:,:,1:,:]."""
    N, T, S, C = x4.shape
    HW = S - 1
    reC = p["w1"].shape[1]

    # fold eval-mode BatchNorm3d into the first 1x1x1 conv (exact, in f32)
    s = p["bn_gamma"] * lax.rsqrt(p["bn_var"] + 1e-5)
    t = p["bn_beta"] - p["bn_mean"] * s
    w1 = (p["w1"] * s[:, None]).astype(_MATMUL_DTYPE)
    b1 = (p["b1"] + t @ p["w1"]).reshape(1, reC)

    act = T * S * C * x4.dtype.itemsize
    tmp = 3 * T * HW * reC * 4
    wts = (C * reC + reC * C) * 2 + (5 * reC + 2 * C) * 4
    # TODO(synk): also tile the HW axis (grid=(N, HW//hw_tile)) once the spatial
    # slab is block-aligned (needs a CLS-last internal layout or BoundedSlice).
    return pl.pallas_call(
        functools.partial(_lmhra_kernel, T=T, HW=HW),
        out_shape=jax.ShapeDtypeStruct((N, T, S, C), x4.dtype),
        grid=(N,),
        in_specs=[
            pl.BlockSpec((1, T, S, C), lambda n: (n, 0, 0, 0)),
            _const_spec((C, reC)),
            _const_spec((1, reC)),
            _const_spec((3, reC)),
            _const_spec((1, reC)),
            _const_spec((reC, C)),
            _const_spec((1, C)),
        ],
        out_specs=pl.BlockSpec((1, T, S, C), lambda n: (n, 0, 0, 0)),
        compiler_params=pltpu.CompilerParams(
            dimension_semantics=("parallel",),
            vmem_limit_bytes=_vmem_limit_bytes(4 * act + tmp + wts),
        ),
    )(x4, w1, b1, p["w_dw"], p["b_dw"].reshape(1, reC),
      p["w2"], p["b2"].reshape(1, C))


def attn_block(x, p, heads):
    """x: (NT, S, C).  Returns x + MHA(LN1(x)); batch row lives in the grid."""
    NT, S, C = x.shape
    scale = 1.0 / math.sqrt(C // heads)
    act = S * C * x.dtype.itemsize
    tmp = S * 3 * C * 4 + 2 * S * S * 4 + S * C * 4
    wts = (C * 3 * C + C * C) * 2 + (6 * C) * 4
    return pl.pallas_call(
        functools.partial(_attn_kernel, heads=heads, scale=scale),
        out_shape=jax.ShapeDtypeStruct((NT, S, C), x.dtype),
        grid=(NT,),
        in_specs=[
            pl.BlockSpec((1, S, C), lambda i: (i, 0, 0)),
            _const_spec((1, C)),
            _const_spec((1, C)),
            _const_spec((C, 3 * C)),
            _const_spec((1, 3 * C)),
            _const_spec((C, C)),
            _const_spec((1, C)),
        ],
        out_specs=pl.BlockSpec((1, S, C), lambda i: (i, 0, 0)),
        compiler_params=pltpu.CompilerParams(
            dimension_semantics=("parallel",),
            vmem_limit_bytes=_vmem_limit_bytes(4 * act + tmp + wts),
        ),
    )(x, p["ln1_g"].reshape(1, C), p["ln1_b"].reshape(1, C),
      p["w_in"], p["b_in"].reshape(1, 3 * C), p["w_out"], p["b_out"].reshape(1, C))


def mlp_block(x, p, row_target=512):
    """x: (NT, S, C).  Returns x + MLP(LN2(x)), row-tiled (padded, never full-M)."""
    NT, S, C = x.shape
    M = NT * S
    tm = min(row_target, _round_up(M, 8))
    Mp = _round_up(M, tm)
    x2 = x.reshape(M, C)
    if Mp != M:
        x2 = jnp.pad(x2, ((0, Mp - M), (0, 0)))            # padded rows are sliced off

    act = tm * C * x.dtype.itemsize
    tmp = 2 * tm * 4 * C * 4
    wts = 2 * (4 * C * C) * 2 + (4 * C + 4 * C) * 4
    # TODO(synk): on v7x at widths beyond CLIP scale, add a 4C ("arbitrary") grid
    # axis streaming (C, tile_4C)/(tile_4C, C) weight slabs into an f32 accumulator.
    out = pl.pallas_call(
        _mlp_kernel,
        out_shape=jax.ShapeDtypeStruct((Mp, C), x.dtype),
        grid=(Mp // tm,),
        in_specs=[
            pl.BlockSpec((tm, C), lambda i: (i, 0)),
            _const_spec((1, C)),
            _const_spec((1, C)),
            _const_spec((C, 4 * C)),
            _const_spec((1, 4 * C)),
            _const_spec((4 * C, C)),
            _const_spec((1, C)),
        ],
        out_specs=pl.BlockSpec((tm, C), lambda i: (i, 0)),
        compiler_params=pltpu.CompilerParams(
            dimension_semantics=("parallel",),
            vmem_limit_bytes=_vmem_limit_bytes(4 * act + tmp + wts),
        ),
    )(x2, p["ln2_g"].reshape(1, C), p["ln2_b"].reshape(1, C),
      p["w_fc"], p["b_fc"].reshape(1, 4 * C), p["w_proj"], p["b_proj"].reshape(1, C))
    if Mp != M:
        out = out[:M]
    return out.reshape(NT, S, C)


# --------------------------------- model glue --------------------------------

def residual_block(x, p, *, T, heads):
    """ResidualAttentionBlock.forward on the batch-major stream x: (NT, S, C)."""
    NT, S, C = x.shape
    N = NT // T
    x = local_mhra_block(x.reshape(N, T, S, C), p["lmhra1"]).reshape(NT, S, C)
    x = attn_block(x, p, heads)                            # LN1 + MHA + residual fused
    x = local_mhra_block(x.reshape(N, T, S, C), p["lmhra2"]).reshape(NT, S, C)
    x = mlp_block(x, p)                                    # LN2 + MLP + residual fused
    return x


def transformer_forward(x, params_list, *, T, heads):
    """Transformer.forward: x (S, NT, C) sequence-first; returns (x, all_feat[-3:])."""
    S, NT, C = x.shape
    xi = jnp.transpose(x, (1, 0, 2))                       # internal batch-major layout
    feats = []
    for p in params_list:
        xi = residual_block(xi, p, T=T, heads=heads)
        feats.append(xi)
        feats = feats[-3:]                                 # keep only the last 3 layers
    out = jnp.transpose(xi, (1, 0, 2))
    all_feat = jnp.stack([jnp.transpose(f, (1, 0, 2)) for f in feats], axis=0)
    return out, all_feat


# ------------------------------ parameter init --------------------------------

def init_params(key, width, layers, heads):
    C = width
    reC = int(C // 1.5)

    def nrm(k, shape, dtype=_MATMUL_DTYPE, scale=0.02):
        return (scale * jax.random.normal(k, shape, dtype=jnp.float32)).astype(dtype)

    def lmhra_params(k):
        kk = jax.random.split(k, 2)
        return dict(
            bn_gamma=jnp.ones((C,), jnp.float32),
            bn_beta=jnp.zeros((C,), jnp.float32),
            bn_mean=jnp.zeros((C,), jnp.float32),
            bn_var=jnp.ones((C,), jnp.float32),
            # w1 stays f32 so the BatchNorm fold is exact; cast to bf16 post-fold.
            w1=nrm(kk[0], (C, reC), jnp.float32), b1=jnp.zeros((reC,), jnp.float32),
            w_dw=nrm(kk[1], (3, reC), jnp.float32), b_dw=jnp.zeros((reC,), jnp.float32),
            # pos_embed[3] (final 1x1x1 conv) is zero-initialized in PyTorch __init__
            w2=jnp.zeros((reC, C), _MATMUL_DTYPE), b2=jnp.zeros((C,), jnp.float32),
        )

    params = []
    for layer in range(layers):
        ks = jax.random.split(jax.random.fold_in(key, layer), 8)
        params.append(dict(
            lmhra1=lmhra_params(ks[0]),
            lmhra2=lmhra_params(ks[1]),
            ln1_g=jnp.ones((C,), jnp.float32), ln1_b=jnp.zeros((C,), jnp.float32),
            ln2_g=jnp.ones((C,), jnp.float32), ln2_b=jnp.zeros((C,), jnp.float32),
            w_in=nrm(ks[2], (C, 3 * C)), b_in=jnp.zeros((3 * C,), jnp.float32),
            w_out=nrm(ks[3], (C, C)), b_out=jnp.zeros((C,), jnp.float32),
            w_fc=nrm(ks[4], (C, 4 * C)), b_fc=jnp.zeros((4 * C,), jnp.float32),
            w_proj=nrm(ks[5], (4 * C, C)), b_proj=jnp.zeros((C,), jnp.float32),
        ))
    return params


# ----------------------------------- main -------------------------------------

if __name__ == "__main__":
    width, layers, heads = 128, 3, 4   # width multiple of 128 -> lane-dense blocks
    T = 8          # temporal frames
    N = 2          # video batch
    Hs = Ws = 4    # spatial token grid
    L = Hs * Ws
    S = L + 1      # +1 CLS token
    NT = N * T

    key = jax.random.PRNGKey(0)
    kx, kp = jax.random.split(key)
    x = jax.random.normal(kx, (S, NT, width), dtype=jnp.float32)
    params = init_params(kp, width, layers, heads)

    fwd = jax.jit(functools.partial(transformer_forward, T=T, heads=heads))
    out, feats = fwd(x, params)
    jax.block_until_ready((out, feats))

    assert out.shape == (S, NT, width)
    assert feats.shape == (min(3, layers), S, NT, width)
    assert jnp.all(jnp.isfinite(out)) and jnp.all(jnp.isfinite(feats))
    print("KERNEL_OK")
</pallas_src>

<mosaic_0001>
module attributes {stable_mosaic.version = 11 : i64} {
  func.func @_lmhra_kernel(%arg0: i32, %arg1: memref<1x8x17x128xf32, #tpu.memory_space<vmem>>, %arg2: memref<128x85xbf16, #tpu.memory_space<vmem>>, %arg3: memref<1x85xf32, #tpu.memory_space<vmem>>, %arg4: memref<3x85xf32, #tpu.memory_space<vmem>>, %arg5: memref<1x85xf32, #tpu.memory_space<vmem>>, %arg6: memref<85x128xbf16, #tpu.memory_space<vmem>>, %arg7: memref<1x128xf32, #tpu.memory_space<vmem>>, %arg8: memref<1x8x17x128xf32, #tpu.memory_space<vmem>>) attributes {dimension_semantics = [#tpu.dimension_semantics<parallel>], iteration_bounds = array<i64: 2>, scalar_prefetch = 0 : i64, scratch_operands = 0 : i64, tpu.core_type = #tpu.core_type<tc>, window_params = [{transform_indices = @transform_0, window_bounds = array<i64: 1, 8, 17, 128>}, {pipeline_mode = #tpu.pipeline_mode<synchronous>, transform_indices = @transform_1, window_bounds = array<i64: 128, 85>}, {pipeline_mode = #tpu.pipeline_mode<synchronous>, transform_indices = @transform_2, window_bounds = array<i64: 1, 85>}, {pipeline_mode = #tpu.pipeline_mode<synchronous>, transform_indices = @transform_3, window_bounds = array<i64: 3, 85>}, {pipeline_mode = #tpu.pipeline_mode<synchronous>, transform_indices = @transform_4, window_bounds = array<i64: 1, 85>}, {pipeline_mode = #tpu.pipeline_mode<synchronous>, transform_indices = @transform_5, window_bounds = array<i64: 85, 128>}, {pipeline_mode = #tpu.pipeline_mode<synchronous>, transform_indices = @transform_6, window_bounds = array<i64: 1, 128>}, {transform_indices = @transform_7, window_bounds = array<i64: 1, 8, 17, 128>}]} {
    %c0 = arith.constant 0 : index
    %c0_0 = arith.constant 0 : index
    %c0_1 = arith.constant 0 : index
    %c0_2 = arith.constant 0 : index
    %0 = vector.load %arg1[%c0, %c0_0, %c0_1, %c0_2] : memref<1x8x17x128xf32, #tpu.memory_space<vmem>>, vector<1x8x17x128xf32>
    %1 = vector.shape_cast %0 : vector<1x8x17x128xf32> to vector<8x17x128xf32>
    %2 = vector.extract_strided_slice %1 {offsets = [0, 1, 0], sizes = [8, 16, 128], strides = [1, 1, 1]} : vector<8x17x128xf32> to vector<8x16x128xf32>
    %3 = vector.shape_cast %2 : vector<8x16x128xf32> to vector<128x128xf32>
    %4 = arith.truncf %3 : vector<128x128xf32> to vector<128x128xbf16>
    %c0_3 = arith.constant 0 : index
    %c0_4 = arith.constant 0 : index
    %5 = vector.load %arg2[%c0_3, %c0_4] : memref<128x85xbf16, #tpu.memory_space<vmem>>, vector<128x85xbf16>
    %cst = arith.constant dense<0.000000e+00> : vector<128x85xf32>
    %6 = tpu.matmul %4, %5, %cst {dimension_numbers = #tpu.dot_dimension_numbers<[1], [0], [0], [1], [0, 0, 1, 1], [], []>} : vector<128x128xbf16>, vector<128x85xbf16>, vector<128x85xf32> -> vector<128x85xf32>
    %c0_5 = arith.constant 0 : index
    %c0_6 = arith.constant 0 : index
    %7 = vector.load %arg3[%c0_5, %c0_6] : memref<1x85xf32, #tpu.memory_space<vmem>>, vector<1x85xf32>
    %8 = vector.broadcast %7 : vector<1x85xf32> to vector<128x85xf32>
    %9 = arith.addf %6, %8 : vector<128x85xf32>
    %10 = vector.shape_cast %9 : vector<128x85xf32> to vector<8x16x85xf32>
    %c0_7 = arith.constant 0 : index
    %c0_8 = arith.constant 0 : index
    %11 = vector.load %arg4[%c0_7, %c0_8] : memref<3x85xf32, #tpu.memory_space<vmem>>, vector<3x85xf32>
    %12 = vector.extract_strided_slice %11 {offsets = [1, 0], sizes = [1, 85], strides = [1, 1]} : vector<3x85xf32> to vector<1x85xf32>
    %13 = vector.shape_cast %12 : vector<1x85xf32> to vector<85xf32>
    %14 = vector.shape_cast %13 : vector<85xf32> to vector<1x1x85xf32>
    %15 = vector.broadcast %14 : vector<1x1x85xf32> to vector<8x16x85xf32>
    %16 = arith.mulf %10, %15 : vector<8x16x85xf32>
    %cst_9 = arith.constant 0.000000e+00 : f32
    %17 = vector.broadcast %cst_9 : f32 to vector<1x16x85xf32>
    %18 = vector.extract_strided_slice %10 {offsets = [0, 0, 0], sizes = [7, 16, 85], strides = [1, 1, 1]} : vector<8x16x85xf32> to vector<7x16x85xf32>
    %19 = vector.extract_strided_slice %11 {offsets = [0, 0], sizes = [1, 85], strides = [1, 1]} : vector<3x85xf32> to vector<1x85xf32>
    %20 = vector.shape_cast %19 : vector<1x85xf32> to vector<85xf32>
    %21 = vector.shape_cast %20 : vector<85xf32> to vector<1x1x85xf32>
    %22 = vector.broadcast %21 : vector<1x1x85xf32> to vector<7x16x85xf32>
    %23 = arith.mulf %18, %22 : vector<7x16x85xf32>
    %24 = tpu.concatenate %17, %23 in 0 : vector<1x16x85xf32>, vector<7x16x85xf32> -> vector<8x16x85xf32>
    %25 = arith.addf %16, %24 : vector<8x16x85xf32>
    %26 = vector.extract_strided_slice %10 {offsets = [1, 0, 0], sizes = [7, 16, 85], strides = [1, 1, 1]} : vector<8x16x85xf32> to vector<7x16x85xf32>
    %27 = vector.extract_strided_slice %11 {offsets = [2, 0], sizes = [1, 85], strides = [1, 1]} : vector<3x85xf32> to vector<1x85xf32>
    %28 = vector.shape_cast %27 : vector<1x85xf32> to vector<85xf32>
    %29 = vector.shape_cast %28 : vector<85xf32> to vector<1x1x85xf32>
    %30 = vector.broadcast %29 : vector<1x1x85xf32> to vector<7x16x85xf32>
    %31 = arith.mulf %26, %30 : vector<7x16x85xf32>
    %32 = tpu.concatenate %31, %17 in 0 : vector<7x16x85xf32>, vector<1x16x85xf32> -> vector<8x16x85xf32>
    %33 = arith.addf %25, %32 : vector<8x16x85xf32>
    %c0_10 = arith.constant 0 : index
    %c0_11 = arith.constant 0 : index
    %34 = vector.load %arg5[%c0_10, %c0_11] : memref<1x85xf32, #tpu.memory_space<vmem>>, vector<1x85xf32>
    %35 = vector.shape_cast %34 : vector<1x85xf32> to vector<1x1x85xf32>
    %36 = vector.broadcast %35 : vector<1x1x85xf32> to vector<8x16x85xf32>
    %37 = arith.addf %33, %36 : vector<8x16x85xf32>
    %38 = vector.shape_cast %37 : vector<8x16x85xf32> to vector<128x85xf32>
    %39 = arith.truncf %38 : vector<128x85xf32> to vector<128x85xbf16>
    %c0_12 = arith.constant 0 : index
    %c0_13 = arith.constant 0 : index
    %40 = vector.load %arg6[%c0_12, %c0_13] : memref<85x128xbf16, #tpu.memory_space<vmem>>, vector<85x128xbf16>
    %cst_14 = arith.constant dense<0.000000e+00> : vector<128x128xf32>
    %41 = tpu.matmul %39, %40, %cst_14 {dimension_numbers = #tpu.dot_dimension_numbers<[1], [0], [0], [1], [0, 0, 1, 1], [], []>} : vector<128x85xbf16>, vector<85x128xbf16>, vector<128x128xf32> -> vector<128x128xf32>
    %c0_15 = arith.constant 0 : index
    %c0_16 = arith.constant 0 : index
    %42 = vector.load %arg7[%c0_15, %c0_16] : memref<1x128xf32, #tpu.memory_space<vmem>>, vector<1x128xf32>
    %43 = vector.broadcast %42 : vector<1x128xf32> to vector<128x128xf32>
    %44 = arith.addf %41, %43 : vector<128x128xf32>
    %45 = arith.addf %3, %44 : vector<128x128xf32>
    %46 = vector.shape_cast %45 : vector<128x128xf32> to vector<8x16x128xf32>
    %47 = vector.extract_strided_slice %1 {offsets = [0, 0, 0], sizes = [8, 1, 128], strides = [1, 1, 1]} : vector<8x17x128xf32> to vector<8x1x128xf32>
    %c0_17 = arith.constant 0 : index
    %c0_18 = arith.constant 0 : index
    %c0_19 = arith.constant 0 : index
    %c0_20 = arith.constant 0 : index
    %48 = vector.load %arg8[%c0_17, %c0_18, %c0_19, %c0_20] : memref<1x8x17x128xf32, #tpu.memory_space<vmem>>, vector<1x8x1x128xf32>
    %49 = vector.shape_cast %48 : vector<1x8x1x128xf32> to vector<8x1x128xf32>
    %50 = vector.shape_cast %47 : vector<8x1x128xf32> to vector<1x8x1x128xf32>
    tpu.vector_store %arg8[%c0_17, %c0_18, %c0_19, %c0_20], %50 {strides = array<i32>} : memref<1x8x17x128xf32, #tpu.memory_space<vmem>>, vector<1x8x1x128xf32>,
    %c0_21 = arith.constant 0 : index
    %c0_22 = arith.constant 0 : index
    %c1 = arith.constant 1 : index
    %c0_23 = arith.constant 0 : index
    %51 = vector.load %arg8[%c0_21, %c0_22, %c1, %c0_23] : memref<1x8x17x128xf32, #tpu.memory_space<vmem>>, vector<1x8x16x128xf32>
    %52 = vector.shape_cast %51 : vector<1x8x16x128xf32> to vector<8x16x128xf32>
    %53 = vector.shape_cast %46 : vector<8x16x128xf32> to vector<1x8x16x128xf32>
    tpu.vector_store %arg8[%c0_21, %c0_22, %c1, %c0_23], %53 {strides = array<i32>} : memref<1x8x17x128xf32, #tpu.memory_space<vmem>>, vector<1x8x16x128xf32>,
    return
  }
  func.func @transform_0(%arg0: i32) -> (i32, i32, i32, i32) {
    %c0_i32 = arith.constant 0 : i32
    %c0_i32_0 = arith.constant 0 : i32
    %c0_i32_1 = arith.constant 0 : i32
    %c0_i32_2 = arith.constant 0 : i32
    return %arg0, %c0_i32, %c0_i32_0, %c0_i32_1 : i32, i32, i32, i32
  }
  func.func @transform_1(%arg0: i32) -> (i32, i32) {
    %c0_i32 = arith.constant 0 : i32
    %c0_i32_0 = arith.constant 0 : i32
    %c0_i32_1 = arith.constant 0 : i32
    return %c0_i32, %c0_i32_0 : i32, i32
  }
  func.func @transform_2(%arg0: i32) -> (i32, i32) {
    %c0_i32 = arith.constant 0 : i32
    %c0_i32_0 = arith.constant 0 : i32
    %c0_i32_1 = arith.constant 0 : i32
    return %c0_i32, %c0_i32_0 : i32, i32
  }
  func.func @transform_3(%arg0: i32) -> (i32, i32) {
    %c0_i32 = arith.constant 0 : i32
    %c0_i32_0 = arith.constant 0 : i32
    %c0_i32_1 = arith.constant 0 : i32
    return %c0_i32, %c0_i32_0 : i32, i32
  }
  func.func @transform_4(%arg0: i32) -> (i32, i32) {
    %c0_i32 = arith.constant 0 : i32
    %c0_i32_0 = arith.constant 0 : i32
    %c0_i32_1 = arith.constant 0 : i32
    return %c0_i32, %c0_i32_0 : i32, i32
  }
  func.func @transform_5(%arg0: i32) -> (i32, i32) {
    %c0_i32 = arith.constant 0 : i32
    %c0_i32_0 = arith.constant 0 : i32
    %c0_i32_1 = arith.constant 0 : i32
    return %c0_i32, %c0_i32_0 : i32, i32
  }
  func.func @transform_6(%arg0: i32) -> (i32, i32) {
    %c0_i32 = arith.constant 0 : i32
    %c0_i32_0 = arith.constant 0 : i32
    %c0_i32_1 = arith.constant 0 : i32
    return %c0_i32, %c0_i32_0 : i32, i32
  }
  func.func @transform_7(%arg0: i32) -> (i32, i32, i32, i32) {
    %c0_i32 = arith.constant 0 : i32
    %c0_i32_0 = arith.constant 0 : i32
    %c0_i32_1 = arith.constant 0 : i32
    %c0_i32_2 = arith.constant 0 : i32
    return %arg0, %c0_i32, %c0_i32_0, %c0_i32_1 : i32, i32, i32, i32
  }
}

module attributes {stable_mosaic.version = 11 : i64} {
  func.func @_attn_kernel(%arg0: i32, %arg1: memref<1x17x128xf32, #tpu.memory_space<vmem>>, %arg2: memref<1x128xf32, #tpu.memory_space<vmem>>, %arg3: memref<1x128xf32, #tpu.memory_space<vmem>>, %arg4: memref<128x384xbf16, #tpu.memory_space<vmem>>, %arg5: memref<1x384xf32, #tpu.memory_space<vmem>>, %arg6: memref<128x128xbf16, #tpu.memory_space<vmem>>, %arg7: memref<1x128xf32, #tpu.memory_space<vmem>>, %arg8: memref<1x17x128xf32, #tpu.memory_space<vmem>>) attributes {dimension_semantics = [#tpu.dimension_semantics<parallel>], iteration_bounds = array<i64: 16>, scalar_prefetch = 0 : i64, scratch_operands = 0 : i64, tpu.core_type = #tpu.core_type<tc>, window_params = [{transform_indices = @transform_0, window_bounds = array<i64: 1, 17, 128>}, {pipeline_mode = #tpu.pipeline_mode<synchronous>, transform_indices = @transform_1, window_bounds = array<i64: 1, 128>}, {pipeline_mode = #tpu.pipeline_mode<synchronous>, transform_indices = @transform_2, window_bounds = array<i64: 1, 128>}, {pipeline_mode = #tpu.pipeline_mode<synchronous>, transform_indices = @transform_3, window_bounds = array<i64: 128, 384>}, {pipeline_mode = #tpu.pipeline_mode<synchronous>, transform_indices = @transform_4, window_bounds = array<i64: 1, 384>}, {pipeline_mode = #tpu.pipeline_mode<synchronous>, transform_indices = @transform_5, window_bounds = array<i64: 128, 128>}, {pipeline_mode = #tpu.pipeline_mode<synchronous>, transform_indices = @transform_6, window_bounds = array<i64: 1, 128>}, {transform_indices = @transform_7, window_bounds = array<i64: 1, 17, 128>}]} {
    %c0 = arith.constant 0 : index
    %c0_0 = arith.constant 0 : index
    %c0_1 = arith.constant 0 : index
    %0 = vector.load %arg1[%c0, %c0_0, %c0_1] : memref<1x17x128xf32, #tpu.memory_space<vmem>>, vector<1x17x128xf32>
    %1 = vector.shape_cast %0 : vector<1x17x128xf32> to vector<17x128xf32>
    %cst = arith.constant dense<0.000000e+00> : vector<17xf32>
    %2 = vector.multi_reduction <add>, %1, %cst [1] : vector<17x128xf32> to vector<17xf32>
    %3 = vector.shape_cast %2 : vector<17xf32> to vector<17x1xf32>
    %cst_2 = arith.constant 1.280000e+02 : f32
    %4 = vector.broadcast %cst_2 : f32 to vector<17x1xf32>
    %5 = arith.divf %3, %4 : vector<17x1xf32>
    %6 = vector.broadcast %5 : vector<17x1xf32> to vector<17x128xf32>
    %7 = arith.subf %1, %6 : vector<17x128xf32>
    %8 = arith.mulf %7, %7 : vector<17x128xf32>
    %cst_3 = arith.constant dense<0.000000e+00> : vector<17xf32>
    %9 = vector.multi_reduction <add>, %8, %cst_3 [1] : vector<17x128xf32> to vector<17xf32>
    %10 = vector.shape_cast %9 : vector<17xf32> to vector<17x1xf32>
    %cst_4 = arith.constant 1.280000e+02 : f32
    %11 = vector.broadcast %cst_4 : f32 to vector<17x1xf32>
    %12 = arith.divf %10, %11 : vector<17x1xf32>
    %13 = vector.broadcast %5 : vector<17x1xf32> to vector<17x128xf32>
    %14 = arith.subf %1, %13 : vector<17x128xf32>
    %cst_5 = arith.constant 9.99999974E-6 : f32
    %15 = vector.broadcast %cst_5 : f32 to vector<17x1xf32>
    %16 = arith.addf %12, %15 : vector<17x1xf32>
    %17 = math.rsqrt %16 : vector<17x1xf32>
    %18 = vector.broadcast %17 : vector<17x1xf32> to vector<17x128xf32>
    %19 = arith.mulf %14, %18 : vector<17x128xf32>
    %c0_6 = arith.constant 0 : index
    %c0_7 = arith.constant 0 : index
    %20 = vector.load %arg2[%c0_6, %c0_7] : memref<1x128xf32, #tpu.memory_space<vmem>>, vector<1x128xf32>
    %21 = vector.broadcast %20 : vector<1x128xf32> to vector<17x128xf32>
    %22 = arith.mulf %19, %21 : vector<17x128xf32>
    %c0_8 = arith.constant 0 : index
    %c0_9 = arith.constant 0 : index
    %23 = vector.load %arg3[%c0_8, %c0_9] : memref<1x128xf32, #tpu.memory_space<vmem>>, vector<1x128xf32>
    %24 = vector.broadcast %23 : vector<1x128xf32> to vector<17x128xf32>
    %25 = arith.addf %22, %24 : vector<17x128xf32>
    %26 = arith.truncf %25 : vector<17x128xf32> to vector<17x128xbf16>
    %c0_10 = arith.constant 0 : index
    %c0_11 = arith.constant 0 : index
    %27 = vector.load %arg4[%c0_10, %c0_11] : memref<128x384xbf16, #tpu.memory_space<vmem>>, vector<128x384xbf16>
    %cst_12 = arith.constant dense<0.000000e+00> : vector<17x384xf32>
    %28 = tpu.matmul %26, %27, %cst_12 {dimension_numbers = #tpu.dot_dimension_numbers<[1], [0], [0], [1], [0, 0, 1, 1], [], []>} : vector<17x128xbf16>, vector<128x384xbf16>, vector<17x384xf32> -> vector<17x384xf32>
    %c0_13 = arith.constant 0 : index
    %c0_14 = arith.constant 0 : index
    %29 = vector.load %arg5[%c0_13, %c0_14] : memref<1x384xf32, #tpu.memory_space<vmem>>, vector<1x384xf32>
    %30 = vector.broadcast %29 : vector<1x384xf32> to vector<17x384xf32>
    %31 = arith.addf %28, %30 : vector<17x384xf32>
    %c0_15 = arith.constant 0 : index
    %c0_16 = arith.constant 0 : index
    %32 = vector.load %arg6[%c0_15, %c0_16] : memref<128x128xbf16, #tpu.memory_space<vmem>>, vector<128x128xbf16>
    %cst_17 = arith.constant 0.000000e+00 : f32
    %33 = vector.broadcast %cst_17 : f32 to vector<17x128xf32>
    %34 = vector.extract_strided_slice %31 {offsets = [0, 0], sizes = [17, 32], strides = [1, 1]} : vector<17x384xf32> to vector<17x32xf32>
    %cst_18 = arith.constant 0.176776692 : f32
    %35 = vector.broadcast %cst_18 : f32 to vector<17x32xf32>
    %36 = arith.mulf %34, %35 : vector<17x32xf32>
    %37 = vector.extract_strided_slice %31 {offsets = [0, 128], sizes = [17, 32], strides = [1, 1]} : vector<17x384xf32> to vector<17x32xf32>
    %38 = vector.extract_strided_slice %31 {offsets = [0, 256], sizes = [17, 32], strides = [1, 1]} : vector<17x384xf32> to vector<17x32xf32>
    %39 = arith.truncf %36 : vector<17x32xf32> to vector<17x32xbf16>
    %40 = arith.truncf %37 : vector<17x32xf32> to vector<17x32xbf16>
    %cst_19 = arith.constant dense<0.000000e+00> : vector<17x17xf32>
    %41 = tpu.matmul %39, %40, %cst_19 {dimension_numbers = #tpu.dot_dimension_numbers<[1], [1], [0], [0], [0, 0, 1, 0], [], []>} : vector<17x32xbf16>, vector<17x32xbf16>, vector<17x17xf32> -> vector<17x17xf32>
    %cst_20 = arith.constant dense<0xFF800000> : vector<17xf32>
    %42 = vector.multi_reduction <maximumf>, %41, %cst_20 [1] : vector<17x17xf32> to vector<17xf32>
    %43 = vector.shape_cast %42 : vector<17xf32> to vector<17x1xf32>
    %44 = vector.broadcast %43 : vector<17x1xf32> to vector<17x17xf32>
    %45 = arith.subf %41, %44 : vector<17x17xf32>
    %46 = math.exp %45 : vector<17x17xf32>
    %cst_21 = arith.constant dense<0.000000e+00> : vector<17xf32>
    %47 = vector.multi_reduction <add>, %46, %cst_21 [1] : vector<17x17xf32> to vector<17xf32>
    %48 = vector.shape_cast %47 : vector<17xf32> to vector<17x1xf32>
    %49 = arith.truncf %46 : vector<17x17xf32> to vector<17x17xbf16>
    %50 = arith.truncf %38 : vector<17x32xf32> to vector<17x32xbf16>
    %cst_22 = arith.constant dense<0.000000e+00> : vector<17x32xf32>
    %51 = tpu.matmul %49, %50, %cst_22 {dimension_numbers = #tpu.dot_dimension_numbers<[1], [0], [0], [1], [0, 0, 1, 1], [], []>} : vector<17x17xbf16>, vector<17x32xbf16>, vector<17x32xf32> -> vector<17x32xf32>
    %52 = vector.broadcast %48 : vector<17x1xf32> to vector<17x32xf32>
    %53 = arith.divf %51, %52 : vector<17x32xf32>
    %54 = arith.truncf %53 : vector<17x32xf32> to vector<17x32xbf16>
    %55 = vector.extract_strided_slice %32 {offsets = [0, 0], sizes = [32, 128], strides = [1, 1]} : vector<128x128xbf16> to vector<32x128xbf16>
    %cst_23 = arith.constant dense<0.000000e+00> : vector<17x128xf32>
    %56 = tpu.matmul %54, %55, %cst_23 {dimension_numbers = #tpu.dot_dimension_numbers<[1], [0], [0], [1], [0, 0, 1, 1], [], []>} : vector<17x32xbf16>, vector<32x128xbf16>, vector<17x128xf32> -> vector<17x128xf32>
    %57 = arith.addf %33, %56 : vector<17x128xf32>
    %58 = vector.extract_strided_slice %31 {offsets = [0, 32], sizes = [17, 32], strides = [1, 1]} : vector<17x384xf32> to vector<17x32xf32>
    %cst_24 = arith.constant 0.176776692 : f32
    %59 = vector.broadcast %cst_24 : f32 to vector<17x32xf32>
    %60 = arith.mulf %58, %59 : vector<17x32xf32>
    %61 = vector.extract_strided_slice %31 {offsets = [0, 160], sizes = [17, 32], strides = [1, 1]} : vector<17x384xf32> to vector<17x32xf32>
    %62 = vector.extract_strided_slice %31 {offsets = [0, 288], sizes = [17, 32], strides = [1, 1]} : vector<17x384xf32> to vector<17x32xf32>
    %63 = arith.truncf %60 : vector<17x32xf32> to vector<17x32xbf16>
    %64 = arith.truncf %61 : vector<17x32xf32> to vector<17x32xbf16>
    %cst_25 = arith.constant dense<0.000000e+00> : vector<17x17xf32>
    %65 = tpu.matmul %63, %64, %cst_25 {dimension_numbers = #tpu.dot_dimension_numbers<[1], [1], [0], [0], [0, 0, 1, 0], [], []>} : vector<17x32xbf16>, vector<17x32xbf16>, vector<17x17xf32> -> vector<17x17xf32>
    %cst_26 = arith.constant dense<0xFF800000> : vector<17xf32>
    %66 = vector.multi_reduction <maximumf>, %65, %cst_26 [1] : vector<17x17xf32> to vector<17xf32>
    %67 = vector.shape_cast %66 : vector<17xf32> to vector<17x1xf32>
    %68 = vector.broadcast %67 : vector<17x1xf32> to vector<17x17xf32>
    %69 = arith.subf %65, %68 : vector<17x17xf32>
    %70 = math.exp %69 : vector<17x17xf32>
    %cst_27 = arith.constant dense<0.000000e+00> : vector<17xf32>
    %71 = vector.multi_reduction <add>, %70, %cst_27 [1] : vector<17x17xf32> to vector<17xf32>
    %72 = vector.shape_cast %71 : vector<17xf32> to vector<17x1xf32>
    %73 = arith.truncf %70 : vector<17x17xf32> to vector<17x17xbf16>
    %74 = arith.truncf %62 : vector<17x32xf32> to vector<17x32xbf16>
    %cst_28 = arith.constant dense<0.000000e+00> : vector<17x32xf32>
    %75 = tpu.matmul %73, %74, %cst_28 {dimension_numbers = #tpu.dot_dimension_numbers<[1], [0], [0], [1], [0, 0, 1, 1], [], []>} : vector<17x17xbf16>, vector<17x32xbf16>, vector<17x32xf32> -> vector<17x32xf32>
    %76 = vector.broadcast %72 : vector<17x1xf32> to vector<17x32xf32>
    %77 = arith.divf %75, %76 : vector<17x32xf32>
    %78 = arith.truncf %77 : vector<17x32xf32> to vector<17x32xbf16>
    %79 = vector.extract_strided_slice %32 {offsets = [32, 0], sizes = [32, 128], strides = [1, 1]} : vector<128x128xbf16> to vector<32x128xbf16>
    %cst_29 = arith.constant dense<0.000000e+00> : vector<17x128xf32>
    %80 = tpu.matmul %78, %79, %cst_29 {dimension_numbers = #tpu.dot_dimension_numbers<[1], [0], [0], [1], [0, 0, 1, 1], [], []>} : vector<17x32xbf16>, vector<32x128xbf16>, vector<17x128xf32> -> vector<17x128xf32>
    %81 = arith.addf %57, %80 : vector<17x128xf32>
    %82 = vector.extract_strided_slice %31 {offsets = [0, 64], sizes = [17, 32], strides = [1, 1]} : vector<17x384xf32> to vector<17x32xf32>
    %cst_30 = arith.constant 0.176776692 : f32
    %83 = vector.broadcast %cst_30 : f32 to vector<17x32xf32>
    %84 = arith.mulf %82, %83 : vector<17x32xf32>
    %85 = vector.extract_strided_slice %31 {offsets = [0, 192], sizes = [17, 32], strides = [1, 1]} : vector<17x384xf32> to vector<17x32xf32>
    %86 = vector.extract_strided_slice %31 {offsets = [0, 320], sizes = [17, 32], strides = [1, 1]} : vector<17x384xf32> to vector<17x32xf32>
    %87 = arith.truncf %84 : vector<17x32xf32> to vector<17x32xbf16>
    %88 = arith.truncf %85 : vector<17x32xf32> to vector<17x32xbf16>
    %cst_31 = arith.constant dense<0.000000e+00> : vector<17x17xf32>
    %89 = tpu.matmul %87, %88, %cst_31 {dimension_numbers = #tpu.dot_dimension_numbers<[1], [1], [0], [0], [0, 0, 1, 0], [], []>} : vector<17x32xbf16>, vector<17x32xbf16>, vector<17x17xf32> -> vector<17x17xf32>
    %cst_32 = arith.constant dense<0xFF800000> : vector<17xf32>
    %90 = vector.multi_reduction <maximumf>, %89, %cst_32 [1] : vector<17x17xf32> to vector<17xf32>
    %91 = vector.shape_cast %90 : vector<17xf32> to vector<17x1xf32>
    %92 = vector.broadcast %91 : vector<17x1xf32> to vector<17x17xf32>
    %93 = arith.subf %89, %92 : vector<17x17xf32>
    %94 = math.exp %93 : vector<17x17xf32>
    %cst_33 = arith.constant dense<0.000000e+00> : vector<17xf32>
    %95 = vector.multi_reduction <add>, %94, %cst_33 [1] : vector<17x17xf32> to vector<17xf32>
    %96 = vector.shape_cast %95 : vector<17xf32> to vector<17x1xf32>
    %97 = arith.truncf %94 : vector<17x17xf32> to vector<17x17xbf16>
    %98 = arith.truncf %86 : vector<17x32xf32> to vector<17x32xbf16>
    %cst_34 = arith.constant dense<0.000000e+00> : vector<17x32xf32>
    %99 = tpu.matmul %97, %98, %cst_34 {dimension_numbers = #tpu.dot_dimension_numbers<[1], [0], [0], [1], [0, 0, 1, 1], [], []>} : vector<17x17xbf16>, vector<17x32xbf16>, vector<17x32xf32> -> vector<17x32xf32>
    %100 = vector.broadcast %96 : vector<17x1xf32> to vector<17x32xf32>
    %101 = arith.divf %99, %100 : vector<17x32xf32>
    %102 = arith.truncf %101 : vector<17x32xf32> to vector<17x32xbf16>
    %103 = vector.extract_strided_slice %32 {offsets = [64, 0], sizes = [32, 128], strides = [1, 1]} : vector<128x128xbf16> to vector<32x128xbf16>
    %cst_35 = arith.constant dense<0.000000e+00> : vector<17x128xf32>
    %104 = tpu.matmul %102, %103, %cst_35 {dimension_numbers = #tpu.dot_dimension_numbers<[1], [0], [0], [1], [0, 0, 1, 1], [], []>} : vector<17x32xbf16>, vector<32x128xbf16>, vector<17x128xf32> -> vector<17x128xf32>
    %105 = arith.addf %81, %104 : vector<17x128xf32>
    %106 = vector.extract_strided_slice %31 {offsets = [0, 96], sizes = [17, 32], strides = [1, 1]} : vector<17x384xf32> to vector<17x32xf32>
    %cst_36 = arith.constant 0.176776692 : f32
    %107 = vector.broadcast %cst_36 : f32 to vector<17x32xf32>
    %108 = arith.mulf %106, %107 : vector<17x32xf32>
    %109 = vector.extract_strided_slice %31 {offsets = [0, 224], sizes = [17, 32], strides = [1, 1]} : vector<17x384xf32> to vector<17x32xf32>
    %110 = vector.extract_strided_slice %31 {offsets = [0, 352], sizes = [17, 32], strides = [1, 1]} : vector<17x384xf32> to vector<17x32xf32>
    %111 = arith.truncf %108 : vector<17x32xf32> to vector<17x32xbf16>
    %112 = arith.truncf %109 : vector<17x32xf32> to vector<17x32xbf16>
    %cst_37 = arith.constant dense<0.000000e+00> : vector<17x17xf32>
    %113 = tpu.matmul %111, %112, %cst_37 {dimension_numbers = #tpu.dot_dimension_numbers<[1], [1], [0], [0], [0, 0, 1, 0], [], []>} : vector<17x32xbf16>, vector<17x32xbf16>, vector<17x17xf32> -> vector<17x17xf32>
    %cst_38 = arith.constant dense<0xFF800000> : vector<17xf32>
    %114 = vector.multi_reduction <maximumf>, %113, %cst_38 [1] : vector<17x17xf32> to vector<17xf32>
    %115 = vector.shape_cast %114 : vector<17xf32> to vector<17x1xf32>
    %116 = vector.broadcast %115 : vector<17x1xf32> to vector<17x17xf32>
    %117 = arith.subf %113, %116 : vector<17x17xf32>
    %118 = math.exp %117 : vector<17x17xf32>
    %cst_39 = arith.constant dense<0.000000e+00> : vector<17xf32>
    %119 = vector.multi_reduction <add>, %118, %cst_39 [1] : vector<17x17xf32> to vector<17xf32>
    %120 = vector.shape_cast %119 : vector<17xf32> to vector<17x1xf32>
    %121 = arith.truncf %118 : vector<17x17xf32> to vector<17x17xbf16>
    %122 = arith.truncf %110 : vector<17x32xf32> to vector<17x32xbf16>
    %cst_40 = arith.constant dense<0.000000e+00> : vector<17x32xf32>
    %123 = tpu.matmul %121, %122, %cst_40 {dimension_numbers = #tpu.dot_dimension_numbers<[1], [0], [0], [1], [0, 0, 1, 1], [], []>} : vector<17x17xbf16>, vector<17x32xbf16>, vector<17x32xf32> -> vector<17x32xf32>
    %124 = vector.broadcast %120 : vector<17x1xf32> to vector<17x32xf32>
    %125 = arith.divf %123, %124 : vector<17x32xf32>
    %126 = arith.truncf %125 : vector<17x32xf32> to vector<17x32xbf16>
    %127 = vector.extract_strided_slice %32 {offsets = [96, 0], sizes = [32, 128], strides = [1, 1]} : vector<128x128xbf16> to vector<32x128xbf16>
    %cst_41 = arith.constant dense<0.000000e+00> : vector<17x128xf32>
    %128 = tpu.matmul %126, %127, %cst_41 {dimension_numbers = #tpu.dot_dimension_numbers<[1], [0], [0], [1], [0, 0, 1, 1], [], []>} : vector<17x32xbf16>, vector<32x128xbf16>, vector<17x128xf32> -> vector<17x128xf32>
    %129 = arith.addf %105, %128 : vector<17x128xf32>
    %c0_42 = arith.constant 0 : index
    %c0_43 = arith.constant 0 : index
    %130 = vector.load %arg7[%c0_42, %c0_43] : memref<1x128xf32, #tpu.memory_space<vmem>>, vector<1x128xf32>
    %131 = vector.broadcast %130 : vector<1x128xf32> to vector<17x128xf32>
    %132 = arith.addf %129, %131 : vector<17x128xf32>
    %133 = arith.addf %1, %132 : vector<17x128xf32>
    %c0_44 = arith.constant 0 : index
    %c0_45 = arith.constant 0 : index
    %c0_46 = arith.constant 0 : index
    %134 = vector.load %arg8[%c0_44, %c0_45, %c0_46] : memref<1x17x128xf32, #tpu.memory_space<vmem>>, vector<1x17x128xf32>
    %135 = vector.shape_cast %134 : vector<1x17x128xf32> to vector<17x128xf32>
    %136 = vector.shape_cast %133 : vector<17x128xf32> to vector<1x17x128xf32>
    tpu.vector_store %arg8[%c0_44, %c0_45, %c0_46], %136 {strides = array<i32>} : memref<1x17x128xf32, #tpu.memory_space<vmem>>, vector<1x17x128xf32>,
    return
  }
  func.func @transform_0(%arg0: i32) -> (i32, i32, i32) {
    %c0_i32 = arith.constant 0 : i32
    %c0_i32_0 = arith.constant 0 : i32
    %c0_i32_1 = arith.constant 0 : i32
    return %arg0, %c0_i32, %c0_i32_0 : i32, i32, i32
  }
  func.func @transform_1(%arg0: i32) -> (i32, i32) {
    %c0_i32 = arith.constant 0 : i32
    %c0_i32_0 = arith.constant 0 : i32
    %c0_i32_1 = arith.constant 0 : i32
    return %c0_i32, %c0_i32_0 : i32, i32
  }
  func.func @transform_2(%arg0: i32) -> (i32, i32) {
    %c0_i32 = arith.constant 0 : i32
    %c0_i32_0 = arith.constant 0 : i32
    %c0_i32_1 = arith.constant 0 : i32
    return %c0_i32, %c0_i32_0 : i32, i32
  }
  func.func @transform_3(%arg0: i32) -> (i32, i32) {
    %c0_i32 = arith.constant 0 : i32
    %c0_i32_0 = arith.constant 0 : i32
    %c0_i32_1 = arith.constant 0 : i32
    return %c0_i32, %c0_i32_0 : i32, i32
  }
  func.func @transform_4(%arg0: i32) -> (i32, i32) {
    %c0_i32 = arith.constant 0 : i32
    %c0_i32_0 = arith.constant 0 : i32
    %c0_i32_1 = arith.constant 0 : i32
    return %c0_i32, %c0_i32_0 : i32, i32
  }
  func.func @transform_5(%arg0: i32) -> (i32, i32) {
    %c0_i32 = arith.constant 0 : i32
    %c0_i32_0 = arith.constant 0 : i32
    %c0_i32_1 = arith.constant 0 : i32
    return %c0_i32, %c0_i32_0 : i32, i32
  }
  func.func @transform_6(%arg0: i32) -> (i32, i32) {
    %c0_i32 = arith.constant 0 : i32
    %c0_i32_0 = arith.constant 0 : i32
    %c0_i32_1 = arith.constant 0 : i32
    return %c0_i32, %c0_i32_0 : i32, i32
  }
  func.func @transform_7(%arg0: i32) -> (i32, i32, i32) {
    %c0_i32 = arith.constant 0 : i32
    %c0_i32_0 = arith.constant 0 : i32
    %c0_i32_1 = arith.constant 0 : i32
    return %arg0, %c0_i32, %c0_i32_0 : i32, i32, i32
  }
}

module attributes {stable_mosaic.version = 11 : i64} {
  func.func @_mlp_kernel(%arg0: i32, %arg1: memref<272x128xf32, #tpu.memory_space<vmem>>, %arg2: memref<1x128xf32, #tpu.memory_space<vmem>>, %arg3: memref<1x128xf32, #tpu.memory_space<vmem>>, %arg4: memref<128x512xbf16, #tpu.memory_space<vmem>>, %arg5: memref<1x512xf32, #tpu.memory_space<vmem>>, %arg6: memref<512x128xbf16, #tpu.memory_space<vmem>>, %arg7: memref<1x128xf32, #tpu.memory_space<vmem>>, %arg8: memref<272x128xf32, #tpu.memory_space<vmem>>) attributes {dimension_semantics = [#tpu.dimension_semantics<parallel>], iteration_bounds = array<i64: 1>, scalar_prefetch = 0 : i64, scratch_operands = 0 : i64, tpu.core_type = #tpu.core_type<tc>, window_params = [{transform_indices = @transform_0, window_bounds = array<i64: 272, 128>}, {pipeline_mode = #tpu.pipeline_mode<synchronous>, transform_indices = @transform_1, window_bounds = array<i64: 1, 128>}, {pipeline_mode = #tpu.pipeline_mode<synchronous>, transform_indices = @transform_2, window_bounds = array<i64: 1, 128>}, {pipeline_mode = #tpu.pipeline_mode<synchronous>, transform_indices = @transform_3, window_bounds = array<i64: 128, 512>}, {pipeline_mode = #tpu.pipeline_mode<synchronous>, transform_indices = @transform_4, window_bounds = array<i64: 1, 512>}, {pipeline_mode = #tpu.pipeline_mode<synchronous>, transform_indices = @transform_5, window_bounds = array<i64: 512, 128>}, {pipeline_mode = #tpu.pipeline_mode<synchronous>, transform_indices = @transform_6, window_bounds = array<i64: 1, 128>}, {transform_indices = @transform_7, window_bounds = array<i64: 272, 128>}]} {
    %c0 = arith.constant 0 : index
    %c0_0 = arith.constant 0 : index
    %0 = vector.load %arg1[%c0, %c0_0] : memref<272x128xf32, #tpu.memory_space<vmem>>, vector<272x128xf32>
    %cst = arith.constant dense<0.000000e+00> : vector<272xf32>
    %1 = vector.multi_reduction <add>, %0, %cst [1] : vector<272x128xf32> to vector<272xf32>
    %2 = vector.shape_cast %1 : vector<272xf32> to vector<272x1xf32>
    %cst_1 = arith.constant 1.280000e+02 : f32
    %3 = vector.broadcast %cst_1 : f32 to vector<272x1xf32>
    %4 = arith.divf %2, %3 : vector<272x1xf32>
    %5 = vector.broadcast %4 : vector<272x1xf32> to vector<272x128xf32>
    %6 = arith.subf %0, %5 : vector<272x128xf32>
    %7 = arith.mulf %6, %6 : vector<272x128xf32>
    %cst_2 = arith.constant dense<0.000000e+00> : vector<272xf32>
    %8 = vector.multi_reduction <add>, %7, %cst_2 [1] : vector<272x128xf32> to vector<272xf32>
    %9 = vector.shape_cast %8 : vector<272xf32> to vector<272x1xf32>
    %cst_3 = arith.constant 1.280000e+02 : f32
    %10 = vector.broadcast %cst_3 : f32 to vector<272x1xf32>
    %11 = arith.divf %9, %10 : vector<272x1xf32>
    %12 = vector.broadcast %4 : vector<272x1xf32> to vector<272x128xf32>
    %13 = arith.subf %0, %12 : vector<272x128xf32>
    %cst_4 = arith.constant 9.99999974E-6 : f32
    %14 = vector.broadcast %cst_4 : f32 to vector<272x1xf32>
    %15 = arith.addf %11, %14 : vector<272x1xf32>
    %16 = math.rsqrt %15 : vector<272x1xf32>
    %17 = vector.broadcast %16 : vector<272x1xf32> to vector<272x128xf32>
    %18 = arith.mulf %13, %17 : vector<272x128xf32>
    %c0_5 = arith.constant 0 : index
    %c0_6 = arith.constant 0 : index
    %19 = vector.load %arg2[%c0_5, %c0_6] : memref<1x128xf32, #tpu.memory_space<vmem>>, vector<1x128xf32>
    %20 = vector.broadcast %19 : vector<1x128xf32> to vector<272x128xf32>
    %21 = arith.mulf %18, %20 : vector<272x128xf32>
    %c0_7 = arith.constant 0 : index
    %c0_8 = arith.constant 0 : index
    %22 = vector.load %arg3[%c0_7, %c0_8] : memref<1x128xf32, #tpu.memory_space<vmem>>, vector<1x128xf32>
    %23 = vector.broadcast %22 : vector<1x128xf32> to vector<272x128xf32>
    %24 = arith.addf %21, %23 : vector<272x128xf32>
    %25 = arith.truncf %24 : vector<272x128xf32> to vector<272x128xbf16>
    %c0_9 = arith.constant 0 : index
    %c0_10 = arith.constant 0 : index
    %26 = vector.load %arg4[%c0_9, %c0_10] : memref<128x512xbf16, #tpu.memory_space<vmem>>, vector<128x512xbf16>
    %cst_11 = arith.constant dense<0.000000e+00> : vector<272x512xf32>
    %27 = tpu.matmul %25, %26, %cst_11 {dimension_numbers = #tpu.dot_dimension_numbers<[1], [0], [0], [1], [0, 0, 1, 1], [], []>} : vector<272x128xbf16>, vector<128x512xbf16>, vector<272x512xf32> -> vector<272x512xf32>
    %c0_12 = arith.constant 0 : index
    %c0_13 = arith.constant 0 : index
    %28 = vector.load %arg5[%c0_12, %c0_13] : memref<1x512xf32, #tpu.memory_space<vmem>>, vector<1x512xf32>
    %29 = vector.broadcast %28 : vector<1x512xf32> to vector<272x512xf32>
    %30 = arith.addf %27, %29 : vector<272x512xf32>
    %cst_14 = arith.constant 1.702000e+00 : f32
    %31 = vector.broadcast %cst_14 : f32 to vector<272x512xf32>
    %32 = arith.mulf %31, %30 : vector<272x512xf32>
    %33 = arith.negf %32 : vector<272x512xf32>
    %34 = math.exp %33 : vector<272x512xf32>
    %cst_15 = arith.constant 1.000000e+00 : f32
    %35 = vector.broadcast %cst_15 : f32 to vector<272x512xf32>
    %36 = arith.addf %35, %34 : vector<272x512xf32>
    %37 = arith.divf %35, %36 : vector<272x512xf32>
    %38 = arith.mulf %30, %37 : vector<272x512xf32>
    %39 = arith.truncf %38 : vector<272x512xf32> to vector<272x512xbf16>
    %c0_16 = arith.constant 0 : index
    %c0_17 = arith.constant 0 : index
    %40 = vector.load %arg6[%c0_16, %c0_17] : memref<512x128xbf16, #tpu.memory_space<vmem>>, vector<512x128xbf16>
    %cst_18 = arith.constant dense<0.000000e+00> : vector<272x128xf32>
    %41 = tpu.matmul %39, %40, %cst_18 {dimension_numbers = #tpu.dot_dimension_numbers<[1], [0], [0], [1], [0, 0, 1, 1], [], []>} : vector<272x512xbf16>, vector<512x128xbf16>, vector<272x128xf32> -> vector<272x128xf32>
    %c0_19 = arith.constant 0 : index
    %c0_20 = arith.constant 0 : index
    %42 = vector.load %arg7[%c0_19, %c0_20] : memref<1x128xf32, #tpu.memory_space<vmem>>, vector<1x128xf32>
    %43 = vector.broadcast %42 : vector<1x128xf32> to vector<272x128xf32>
    %44 = arith.addf %41, %43 : vector<272x128xf32>
    %45 = arith.addf %0, %44 : vector<272x128xf32>
    %c0_21 = arith.constant 0 : index
    %c0_22 = arith.constant 0 : index
    %46 = vector.load %arg8[%c0_21, %c0_22] : memref<272x128xf32, #tpu.memory_space<vmem>>, vector<272x128xf32>
    tpu.vector_store %arg8[%c0_21, %c0_22], %45 {strides = array<i32>} : memref<272x128xf32, #tpu.memory_space<vmem>>, vector<272x128xf32>,
    return
  }
  func.func @transform_0(%arg0: i32) -> (i32, i32) {
    %c0_i32 = arith.constant 0 : i32
    %c0_i32_0 = arith.constant 0 : i32
    return %arg0, %c0_i32 : i32, i32
  }
  func.func @transform_1(%arg0: i32) -> (i32, i32) {
    %c0_i32 = arith.constant 0 : i32
    %c0_i32_0 = arith.constant 0 : i32
    %c0_i32_1 = arith.constant 0 : i32
    return %c0_i32, %c0_i32_0 : i32, i32
  }
  func.func @transform_2(%arg0: i32) -> (i32, i32) {
    %c0_i32 = arith.constant 0 : i32
    %c0_i32_0 = arith.constant 0 : i32
    %c0_i32_1 = arith.constant 0 : i32
    return %c0_i32, %c0_i32_0 : i32, i32
  }
  func.func @transform_3(%arg0: i32) -> (i32, i32) {
    %c0_i32 = arith.constant 0 : i32
    %c0_i32_0 = arith.constant 0 : i32
    %c0_i32_1 = arith.constant 0 : i32
    return %c0_i32, %c0_i32_0 : i32, i32
  }
  func.func @transform_4(%arg0: i32) -> (i32, i32) {
    %c0_i32 = arith.constant 0 : i32
    %c0_i32_0 = arith.constant 0 : i32
    %c0_i32_1 = arith.constant 0 : i32
    return %c0_i32, %c0_i32_0 : i32, i32
  }
  func.func @transform_5(%arg0: i32) -> (i32, i32) {
    %c0_i32 = arith.constant 0 : i32
    %c0_i32_0 = arith.constant 0 : i32
    %c0_i32_1 = arith.constant 0 : i32
    return %c0_i32, %c0_i32_0 : i32, i32
  }
  func.func @transform_6(%arg0: i32) -> (i32, i32) {
    %c0_i32 = arith.constant 0 : i32
    %c0_i32_0 = arith.constant 0 : i32
    %c0_i32_1 = arith.constant 0 : i32
    return %c0_i32, %c0_i32_0 : i32, i32
  }
  func.func @transform_7(%arg0: i32) -> (i32, i32) {
    %c0_i32 = arith.constant 0 : i32
    %c0_i32_0 = arith.constant 0 : i32
    return %arg0, %c0_i32 : i32, i32
  }
}

</mosaic_0001>

<bundles_post_ra>
// kernel: transformer_forward.12
= control target key start
LH: loop header
LB: loop body
LE: loop exit
PB: predicated region body
PF: predicated region fallthrough
CT: control target
= control target key end

     0   :  { %s1153_s24 = smov 0   ;;  %s1462_s0 = inlined_call_operand.vmem [shape: f32[2,8,17,128], index: 0, kind: input, shape index: {}]   ;;  %s1463_s1 = inlined_call_operand.vmem [shape: bf16[128,85], index: 1, kind: input, shape index: {}]   ;;  %s1464_s2 = inlined_call_operand.vmem [shape: f32[1,85], index: 2, kind: input, shape index: {}]   ;;  %s1465_s3 = inlined_call_operand.vmem [shape: f32[3,85], index: 3, kind: input, shape index: {}]   ;;  %s1466_s4 = inlined_call_operand.vmem [shape: f32[1,85], index: 4, kind: input, shape index: {}]   ;;  %s1467_s5 = inlined_call_operand.vmem [shape: bf16[85,128], index: 5, kind: input, shape index: {}]   ;;  %s1468_s6 = inlined_call_operand.vmem [shape: f32[1,128], index: 6, kind: input, shape index: {}]   ;;  %s1469_s7 = inlined_call_operand.vmem [shape: f32[2,8,17,128], index: 7, kind: output, shape index: {}]  }
   0x1 LB: > { %s956_s25 = sadd.s32 4294967295, %s1110_s24   ;;  %p960_p0 = scmp.ge.s32.totalorder %s1110_s24, 1  ;;  %s1110_s24 = sphi %s1153_s24, %s17_s24  }
   0x2   : > { %p237_p1 = scmp.lt.s32.totalorder %s1110_s24, 3 }
   0x4   : > { %p238_p2 = pnand %p960_p0, %p237_p1 }
   0x5   : > { %p269_p3 = scmp.lt.s32.totalorder (!%p238_p2), %s956_s25, 1 }
   0x6   : > { %241 = sbr.rel (%p238_p2) target bundleno = 489 (0x1e9), region = 48 }
   0xb   : > { %v1090_v0 = vld [vmem:[%s1463_s1 + $0x38] sm:$0xff]   ;;  %v1091_v1 = vld [vmem:[%s1463_s1 + $0x30] sm:$0xff]   ;;  %s1471_s25 = smov (!%p269_p3, %s956_s25), 1  ;;  %v1092_v2 = vld [vmem:[%s1463_s1 + $0x28] sm:$0xff]   ;;  %vm328_vm0 = vcmask 1046528   ;;  %vm757_vm1 = vcmask 1041408  }
   0xc   : > { %1020 = vmatprep.subr.bf16.mxu0 %v1090_v0  ;;  %s1080_s9 = smul.u32 192, %s1471_s25  ;;  %v1093_v3 = vld [vmem:[%s1463_s1 + $0x20] sm:$0xff]   ;;  %v1094_v15 = vld [vmem:[%s1463_s1 + $0x18] sm:$0xff]   ;;  %v1095_v21 = vld [vmem:[%s1463_s1 + $0x10] sm:$0xff]   ;;  %vm758_vm2 = vcmask 1042432   ;;  %vm732_vm3 = vcmask 695296  }
   0xd   : > { %1021 = vmatpush3.bf16.msra.mxu0 %v1090_v0  ;;  %v1096_v22 = vld [vmem:[%s1463_s1 + $0x8] sm:$0xff]   ;;  %v1097_v30 = vld [vmem:[%s1463_s1] sm:$0xff]  }
   0xe   : > { %1022 = vmatprep.subr.bf16.mxu0 %v1091_v1  ;;  %s1173_s12 = scalar_lea.vmem %s1462_s0, %s1080_s9  ;;  %s1181_s17 = scalar_lea.vmem %s1469_s7, %s1080_s9 }
   0xf   : > { %v280_v4 = vld [vmem:[%s1173_s12] sm:$0xff]  ;;  %v281_v5 = vld [vmem:[%s1173_s12 + $0x8] sm:$0xff]  ;;  %v282_v6 = vld [vmem:[%s1173_s12 + $0x10] sm:$0x1] }
  0x10   : > { %v329_v7 = vrot.slane %v280_v4, 1  ;;  %v330_v8 = vrot.slane %v281_v5, 1  ;;  %v332_v9 = vrot.slane %v282_v6, 1  ;;  %877 = vst [vmem:[%s1181_s17] sm:$0x1] %v280_v4  ;;  %v283_v10 = vld [vmem:[%s1173_s12 + $0x18] sm:$0xff]  ;;  %v286_v11 = vld [vmem:[%s1173_s12 + $0x30] sm:$0xff] }
  0x11   : > { %1023 = vmatpush3.bf16.msra.mxu0 %v1091_v1  ;;  %878 = vst [vmem:[%s1181_s17 + $0x18] sm:$0x1] %v283_v10  ;;  %879 = vst [vmem:[%s1181_s17 + $0x30] sm:$0x1] %v286_v11  ;;  %v289_v14 = vld [vmem:[%s1173_s12 + $0x48] sm:$0xff]  ;;  %v292_v17 = vld [vmem:[%s1173_s12 + $0x60] sm:$0xff] }
  0x12   : > { %1024 = vmatprep.subr.bf16.mxu0 %v1092_v2  ;;  %v1192_v12 = vsel %vm328_vm0, %v329_v7, %v330_v8  ;;  %v1195_v13 = vsel %vm328_vm0, %v330_v8, %v332_v9  ;;  %880 = vst [vmem:[%s1181_s17 + $0x48] sm:$0x1] %v289_v14  ;;  %881 = vst [vmem:[%s1181_s17 + $0x60] sm:$0x1] %v292_v17  ;;  %v1207_v18 = vld [vmem:[%s1173_s12 + $0x78] sm:$0xff]  ;;  %v1212_v19 = vld [vmem:[%s1173_s12 + $0x90] sm:$0xff] }
  0x13   : > { %v385_v16 = vpack.c.bf16 %v1195_v13, %v1192_v12  ;;  %882 = vst [vmem:[%s1181_s17 + $0x78] sm:$0x1] %v1207_v18  ;;  %883 = vst [vmem:[%s1181_s17 + $0x90] sm:$0x1] %v1212_v19  ;;  %v1217_v20 = vld [vmem:[%s1173_s12 + $0xa8] sm:$0xff]  ;;  %v284_v23 = vld [vmem:[%s1173_s12 + $0x20] sm:$0xff] }
  0x14   : > { %884 = vst [vmem:[%s1181_s17 + $0xa8] sm:$0x1] %v1217_v20  ;;  %v285_v24 = vld [vmem:[%s1173_s12 + $0x28] sm:$0x1]  ;;  %v287_v25 = vld [vmem:[%s1173_s12 + $0x38] sm:$0xff]  ;;  %v334_v27 = vrot.slane %v283_v10, 1 }
  0x15   : > { %1025 = vmatpush3.bf16.msra.mxu0 %v1092_v2  ;;  %1036 = vmatprep.mubr.bf16.mxu0 %v385_v16  ;;  %v288_v26 = vld [vmem:[%s1173_s12 + $0x40] sm:$0x1]  ;;  %v335_v28 = vrot.slane %v284_v23, 1  ;;  %v337_v29 = vrot.slane %v285_v24, 1  ;;  %v339_v31 = vrot.slane %v286_v11, 1  ;;  %v340_v32 = vrot.slane %v287_v25, 1 }
  0x16   : > { %1026 = vmatprep.subr.bf16.mxu0 %v1093_v3  ;;  %v342_v33 = vrot.slane %v288_v26, 1  ;;  %v290_v38 = vld [vmem:[%s1173_s12 + $0x50] sm:$0xff]  ;;  %v291_v39 = vld [vmem:[%s1173_s12 + $0x58] sm:$0x1]  ;;  %v293_v40 = vld [vmem:[%s1173_s12 + $0x68] sm:$0xff]  ;;  %v344_v44 = vrot.slane %v289_v14, 1 }
  0x17   : > { %v1235_v34 = vsel %vm328_vm0, %v334_v27, %v335_v28  ;;  %v1238_v35 = vsel %vm328_vm0, %v335_v28, %v337_v29  ;;  %v1241_v36 = vsel %vm328_vm0, %v339_v31, %v340_v32  ;;  %v294_v41 = vld [vmem:[%s1173_s12 + $0x70] sm:$0x1]  ;;  %v345_v45 = vrot.slane %v290_v38, 1  ;;  %v296_v54 = vld [vmem:[%s1173_s12 + $0x80] sm:$0xff]  ;;  %v297_v55 = vld [vmem:[%s1173_s12 + $0x88] sm:$0x1] }
  0x18   : > { %v1244_v37 = vsel %vm328_vm0, %v340_v32, %v342_v33  ;;  %v386_v42 = vpack.c.bf16 %v1238_v35, %v1235_v34  ;;  %v347_v46 = vrot.slane %v291_v39, 1  ;;  %v349_v47 = vrot.slane %v292_v17, 1  ;;  %v299_v56 = vld [vmem:[%s1173_s12 + $0x98] sm:$0xff]  ;;  %v300_v57 = vld [vmem:[%s1173_s12 + $0xa0] sm:$0x1]  ;;  %v302_v6 = vld [vmem:[%s1173_s12 + $0xb0] sm:$0xff] }
  0x19   : > { %1027 = vmatpush3.bf16.msra.mxu0 %v1093_v3  ;;  %v387_v43 = vpack.c.bf16 %v1244_v37, %v1241_v36  ;;  %v350_v48 = vrot.slane %v293_v40, 1  ;;  %v352_v49 = vrot.slane %v294_v41, 1  ;;  %v1255_v50 = vsel %vm328_vm0, %v344_v44, %v345_v45  ;;  %v303_v7 = vld [vmem:[%s1173_s12 + $0xb8] sm:$0x1]  ;;  %v1099_v23 = vld [vmem:[%s1467_s5 + $0x20] sm:$0xff]   ;;  %v1101_v25 = vld [vmem:[%s1467_s5 + $0x10] sm:$0xff]  }
  0x1a   : > { %1028 = vmatprep.subr.bf16.mxu0 %v1094_v15  ;;  %v1258_v51 = vsel %vm328_vm0, %v345_v45, %v347_v46  ;;  %v354_v60 = vrot.slane %v1207_v18, 1  ;;  %v355_v61 = vrot.slane %v296_v54, 1  ;;  %v357_v62 = vrot.slane %v297_v55, 1  ;;  %v1098_v18 = vld [vmem:[%s1467_s5 + $0x28] ss:$0 sps:$4 sm:$0x77]  }
  0x1b   : > { %v1261_v52 = vsel %vm328_vm0, %v349_v47, %v350_v48  ;;  %v1264_v53 = vsel %vm328_vm0, %v350_v48, %v352_v49  ;;  %v388_v58 = vpack.c.bf16 %v1258_v51, %v1255_v50  ;;  %v359_v63 = vrot.slane %v1212_v19, 1  ;;  %v1100_v24 = vld [vmem:[%s1467_s5 + $0x18] sm:$0xff]   ;;  %v1102_v26 = vld [vmem:[%s1467_s5 + $0x8] sm:$0xff]   ;;  %v1103_v27 = vld [vmem:[%s1467_s5] sm:$0xff]  }
  0x1c   : > { %v389_v59 = vpack.c.bf16 %v1264_v53, %v1261_v52  ;;  %v360_v0 = vrot.slane %v299_v56, 1  ;;  %v362_v1 = vrot.slane %v300_v57, 1  ;;  %v1277_v2 = vsel %vm328_vm0, %v354_v60, %v355_v61  ;;  %v1324_v33 = vld [vmem:[%s1464_s2] ss:$0 sm:$0xff] }
  0x1d   : > { %1029 = vmatpush3.bf16.msra.mxu0 %v1094_v15  ;;  %v1280_v3 = vsel %vm328_vm0, %v355_v61, %v357_v62  ;;  %v364_v10 = vrot.slane %v1217_v20, 1  ;;  %v365_v11 = vrot.slane %v302_v6, 1  ;;  %v367_v14 = vrot.slane %v303_v7, 1  ;;  %v561_v38 = vld [vmem:[%s1465_s3] sm:$0x7] }
  0x1e   : > { %1030 = vmatprep.subr.bf16.mxu0 %v1095_v21  ;;  %v1283_v4 = vsel %vm328_vm0, %v359_v63, %v360_v0  ;;  %v1286_v5 = vsel %vm328_vm0, %v360_v0, %v362_v1  ;;  %v390_v8 = vpack.c.bf16 %v1280_v3, %v1277_v2  ;;  %v1112_v19 = vmov 65535   ;;  %v1348_v63 = vld [vmem:[%s1466_s4] ss:$0 sm:$0xff] }
  0x1f   : > { %v391_v9 = vpack.c.bf16 %v1286_v5, %v1283_v4  ;;  %v1296_v15 = vsel %vm328_vm0, %v364_v10, %v365_v11  ;;  %v1299_v16 = vsel %vm328_vm0, %v365_v11, %v367_v14  ;;  %v759_v20 = vsel %vm757_vm1, 4294967295, %v1112_v19 }
  0x20   : > { %v392_v17 = vpack.c.bf16 %v1299_v16, %v1296_v15  ;;  %v562_v28 = vlaneseq }
  0x21   : > { %1031 = vmatpush3.bf16.msra.mxu0 %v1095_v21  ;;  %v760_v21 = vsel %vm758_vm2, %v759_v20, 0 }
  0x22   : > { %1032 = vmatprep.subr.bf16.mxu0 %v1096_v22  ;;  %v563_v29 = vshrl.u32 %v562_v28, 7 }
  0x24   : > { %v564_v31 = vsub.s32 1, %v563_v29  ;;  %v618_v32 = vsub.s32 2, %v563_v29  ;;  %v584_v45 = vsub.s32 0, %v563_v29 }
  0x25   : > { %1033 = vmatpush3.bf16.msra.mxu0 %v1096_v22  ;;  %v762_v22 = vand.u32 %v1098_v18, %v760_v21 }
  0x26   : > { %1034 = vmatprep.subr.bf16.mxu0 %v1097_v30  ;;  %v1339_v56 = vrot.slane %v561_v38, %v584_v45 }
  0x27   : > { %1052 = vmatprep.subr.bf16.mxu1 %v762_v22 }
  0x28   : > { %1053 = vmatpush3.bf16.msra.mxu1 %v762_v22 }
  0x29   : > { %1035 = vmatpush3.bf16.msra.mxu0 %v1097_v30  ;;  %1054 = vmatprep.subr.bf16.mxu1 %v1099_v23 }
  0x2c   : > { %1037 = vmatmul.mubr.bf16.vlgmr.msra.gmra.mxu0 %v386_v42  ;;  %1055 = vmatpush3.bf16.msra.mxu1 %v1099_v23  ;;  %v1331_v42 = vrot.slane %v561_v38, %v564_v31 }
  0x2d   : > { %1040 = vmatprep.mubr.bf16.mxu0 %v387_v43  ;;  %1056 = vmatprep.subr.bf16.mxu1 %v1100_v24  ;;  %v1333_v43 = vrot.slane %v561_v38, %v618_v32 }
  0x30   : > { %1057 = vmatpush3.bf16.msra.mxu1 %v1100_v24 }
  0x31   : > { %1058 = vmatprep.subr.bf16.mxu1 %v1101_v25 }
  0x34   : > { %1041 = vmatmul.mubr.bf16.gmra.mxu0 %v388_v58  ;;  %1059 = vmatpush3.bf16.msra.mxu1 %v1101_v25 }
  0x35   : > { %1044 = vmatprep.mubr.bf16.mxu0 %v389_v59  ;;  %1060 = vmatprep.subr.bf16.mxu1 %v1102_v26 }
  0x38   : > { %1061 = vmatpush3.bf16.msra.mxu1 %v1102_v26 }
  0x39   : > { %1062 = vmatprep.subr.bf16.mxu1 %v1103_v27 }
  0x3c   : > { %1045 = vmatmul.mubr.bf16.gmra.mxu0 %v390_v8  ;;  %1063 = vmatpush3.bf16.msra.mxu1 %v1103_v27 }
  0x3d   : > { %1048 = vmatprep.mubr.bf16.mxu0 %v391_v9 }
  0x44   : > { %1049 = vmatmul.mubr.bf16.gmra.mxu0 %v392_v17 }
  0xec   : > { %v1038_v30 = vpop.f32.mrf.mxu0 }
  0xed   : > { %v507_v41 = vadd.f32 %v1038_v30, %v1324_v33 }
  0xee   : > { %v498_v39 = vpop.f32.mrf.mxu0 }
  0xef   : > { %v499_v40 = vadd.f32 %v1324_v33, %v498_v39  ;;  %v620_v49 = vmul.f32 %v1333_v43, %v507_v41  ;;  %v568_v6 = vmul.f32 %v1331_v42, %v507_v41  ;;  %v588_v17 = vmul.f32 %v1339_v56, %v507_v41 }
  0xf0   : > { %v1039_v44 = vpop.f32.mrf.mxu0 }
  0xf1   : > { %v566_v46 = vmul.f32 %v1331_v42, %v499_v40  ;;  %v510_v47 = vadd.f32 %v1039_v44, %v1324_v33  ;;  %v586_v61 = vmul.f32 %v1339_v56, %v499_v40 }
  0xf2   : > { %v501_v48 = vpop.f32.mrf.mxu0 }
  0xf3   : > { %v502_v54 = vadd.f32 %v1324_v33, %v501_v48  ;;  %v634_v57 = vadd.f32 %v620_v49, %v566_v46  ;;  %v621_v58 = vmul.f32 %v1333_v43, %v510_v47  ;;  %v602_v18 = vadd.f32 %v586_v61, %v568_v6 }
  0xf4   : > { %v1042_v55 = vpop.f32.mrf.mxu0  ;;  %v569_v20 = vmul.f32 %v1331_v42, %v510_v47  ;;  %v589_v27 = vmul.f32 %v1339_v56, %v510_v47 }
  0xf5   : > { %v567_v59 = vmul.f32 %v1331_v42, %v502_v54  ;;  %v587_v9 = vmul.f32 %v1339_v56, %v502_v54  ;;  %v657_v11 = vadd.f32 %v1348_v63, %v634_v57  ;;  %v523_v19 = vadd.f32 %v1042_v55, %v1324_v33 }
  0xf6   : > { %v514_v60 = vpop.f32.mrf.mxu0 }
  0xf7   : > { %v515_v62 = vadd.f32 %v1324_v33, %v514_v60  ;;  %v635_v0 = vadd.f32 %v621_v58, %v567_v59  ;;  %v603_v28 = vadd.f32 %v587_v9, %v569_v20  ;;  %v572_v32 = vmul.f32 %v1331_v42, %v523_v19 }
  0xf8   : > { %v1043_v1 = vpop.f32.mrf.mxu0  ;;  %v624_v38 = vmul.f32 %v1333_v43, %v523_v19  ;;  %v592_v41 = vmul.f32 %v1339_v56, %v523_v19 }
  0xf9   : > { %v570_v7 = vmul.f32 %v1331_v42, %v515_v62  ;;  %v622_v8 = vmul.f32 %v1333_v43, %v515_v62  ;;  %v658_v14 = vadd.f32 %v1348_v63, %v635_v0  ;;  %v526_v21 = vadd.f32 %v1043_v1, %v1324_v33 }
  0xfa   : > { %v517_v10 = vpop.f32.mrf.mxu0  ;;  %v590_v39 = vmul.f32 %v1339_v56, %v515_v62 }
  0xfb   : > { %v518_v22 = vadd.f32 %v1324_v33, %v517_v10  ;;  %v673_v24 = vpack.c.bf16 %v658_v14, %v657_v11  ;;  %v604_v25 = vadd.f32 %v588_v17, %v570_v7  ;;  %v636_v26 = vadd.f32 %v622_v8, %v602_v18 }
  0xfc   : > { %v1046_v23 = vpop.f32.mrf.mxu0  ;;  %v625_v44 = vmul.f32 %v1333_v43, %v526_v21  ;;  %v606_v62 = vadd.f32 %v590_v39, %v572_v32  ;;  %v573_v1 = vmul.f32 %v1331_v42, %v526_v21  ;;  %v593_v10 = vmul.f32 %v1339_v56, %v526_v21 }
  0xfd   : > { %v571_v29 = vmul.f32 %v1331_v42, %v518_v22  ;;  %v623_v30 = vmul.f32 %v1333_v43, %v518_v22  ;;  %1064 = vmatprep.mubr.msk.bf16.mxu1 %vm732_vm3, %v673_v24  ;;  %v638_v48 = vadd.f32 %v624_v38, %v604_v25  ;;  %v659_v49 = vadd.f32 %v1348_v63, %v636_v26 }
  0xfe   : > { %v530_v31 = vpop.f32.mrf.mxu0  ;;  %v539_v54 = vadd.f32 %v1046_v23, %v1324_v33  ;;  %v591_v57 = vmul.f32 %v1339_v56, %v518_v22 }
  0xff   : > { %v531_v40 = vadd.f32 %v1324_v33, %v530_v31  ;;  %v605_v45 = vadd.f32 %v589_v27, %v571_v29  ;;  %v637_v46 = vadd.f32 %v623_v30, %v603_v28  ;;  %v661_v14 = vadd.f32 %v1348_v63, %v638_v48 }
 0x100   : > { %v1047_v47 = vpop.f32.mrf.mxu0  ;;  %v628_v11 = vmul.f32 %v1333_v43, %v539_v54  ;;  %v607_v18 = vadd.f32 %v591_v57, %v573_v1  ;;  %v576_v27 = vmul.f32 %v1331_v42, %v539_v54  ;;  %v596_v32 = vmul.f32 %v1339_v56, %v539_v54 }
 0x101   : > { %v574_v55 = vmul.f32 %v1331_v42, %v531_v40  ;;  %v639_v58 = vadd.f32 %v625_v44, %v605_v45  ;;  %v660_v59 = vadd.f32 %v1348_v63, %v637_v46  ;;  %v626_v60 = vmul.f32 %v1333_v43, %v531_v40 }
 0x102   : > { %v533_v61 = vpop.f32.mrf.mxu0  ;;  %v542_v6 = vadd.f32 %v1047_v47, %v1324_v33  ;;  %v594_v24 = vmul.f32 %v1339_v56, %v531_v40 }
 0x103   : > { %v608_v0 = vadd.f32 %v592_v41, %v574_v55  ;;  %v534_v7 = vadd.f32 %v1324_v33, %v533_v61  ;;  %v674_v9 = vpack.c.bf16 %v660_v59, %v659_v49  ;;  %v662_v17 = vadd.f32 %v1348_v63, %v639_v58 }
 0x104   : > { %v1050_v8 = vpop.f32.mrf.mxu0  ;;  %v640_v19 = vadd.f32 %v626_v60, %v606_v62  ;;  %v629_v28 = vmul.f32 %v1333_v43, %v542_v6  ;;  %v610_v48 = vadd.f32 %v594_v24, %v576_v27  ;;  %v577_v49 = vmul.f32 %v1331_v42, %v542_v6 }
 0x105   : > { %v575_v20 = vmul.f32 %v1331_v42, %v534_v7  ;;  %v627_v22 = vmul.f32 %v1333_v43, %v534_v7  ;;  %1065 = vmatmul.mubr.msk.bf16.vlgmr.msra.gmra.mxu1 %vm732_vm3, %v674_v9  ;;  %v642_v25 = vadd.f32 %v628_v11, %v608_v0  ;;  %v675_v26 = vpack.c.bf16 %v662_v17, %v661_v14 }
 0x106   : > { %v546_v23 = vpop.f32.mrf.mxu0  ;;  %v595_v38 = vmul.f32 %v1339_v56, %v534_v7  ;;  %v555_v39 = vadd.f32 %v1050_v8, %v1324_v33  ;;  %v663_v40 = vadd.f32 %v1348_v63, %v640_v19  ;;  %v597_v61 = vmul.f32 %v1339_v56, %v542_v6 }
 0x107   : > { %v547_v21 = vadd.f32 %v1324_v33, %v546_v23  ;;  %v609_v29 = vadd.f32 %v593_v10, %v575_v20  ;;  %v641_v30 = vadd.f32 %v627_v22, %v607_v18  ;;  %1068 = vmatprep.mubr.msk.bf16.mxu1 %vm732_vm3, %v675_v26  ;;  %v665_v55 = vadd.f32 %v1348_v63, %v642_v25 }
 0x108   : > { %v1051_v31 = vpop.f32.mrf.mxu0  ;;  %v611_v62 = vadd.f32 %v595_v38, %v577_v49  ;;  %v632_v0 = vmul.f32 %v1333_v43, %v555_v39  ;;  %v580_v23 = vmul.f32 %v1331_v42, %v555_v39 }
 0x109   : > { %v578_v41 = vmul.f32 %v1331_v42, %v547_v21  ;;  %v643_v44 = vadd.f32 %v629_v28, %v609_v29  ;;  %v664_v45 = vadd.f32 %v1348_v63, %v641_v30  ;;  %v630_v46 = vmul.f32 %v1333_v43, %v547_v21 }
 0x10a   : > { %v549_v47 = vpop.f32.mrf.mxu0  ;;  %v558_v54 = vadd.f32 %v1051_v31, %v1324_v33  ;;  %v598_v6 = vmul.f32 %v1339_v56, %v547_v21 }
 0x10b   : > { %v612_v57 = vadd.f32 %v596_v32, %v578_v41  ;;  %v550_v58 = vadd.f32 %v1324_v33, %v549_v47  ;;  %v676_v59 = vpack.c.bf16 %v664_v45, %v663_v40  ;;  %v666_v60 = vadd.f32 %v1348_v63, %v643_v44 }
 0x10c   : > { %v644_v1 = vadd.f32 %v630_v46, %v610_v48  ;;  %v633_v10 = vmul.f32 %v1333_v43, %v558_v54  ;;  %v581_v19 = vmul.f32 %v1331_v42, %v558_v54  ;;  %v614_v27 = vadd.f32 %v598_v6, %v580_v23 }
 0x10d   : > { %v579_v7 = vmul.f32 %v1331_v42, %v550_v58  ;;  %v631_v8 = vmul.f32 %v1333_v43, %v550_v58  ;;  %1069 = vmatmul.mubr.msk.bf16.gmra.mxu1 %vm732_vm3, %v676_v59  ;;  %v677_v9 = vpack.c.bf16 %v666_v60, %v665_v55  ;;  %v646_v11 = vadd.f32 %v632_v0, %v612_v57  ;;  %v973_v42 = vld [vmem:[%s1468_s6] ss:$0 sm:$0xff] }
 0x10e   : > { %v599_v33 = vmul.f32 %v1339_v56, %v550_v58  ;;  %v667_v18 = vadd.f32 %v1348_v63, %v644_v1  ;;  %v671_v28 = vadd.f32 %v1348_v63, %v614_v27 }
 0x10f   : > { %v613_v14 = vadd.f32 %v597_v61, %v579_v7  ;;  %v645_v17 = vadd.f32 %v631_v8, %v611_v62  ;;  %1072 = vmatprep.mubr.msk.bf16.mxu1 %vm732_vm3, %v677_v9  ;;  %v669_v25 = vadd.f32 %v1348_v63, %v646_v11 }
 0x110   : > { %v615_v24 = vadd.f32 %v599_v33, %v581_v19 }
 0x111   : > { %v647_v20 = vadd.f32 %v633_v10, %v613_v14  ;;  %v668_v22 = vadd.f32 %v1348_v63, %v645_v17 }
 0x112   : > { %v672_v21 = vadd.f32 %v1348_v63, %v615_v24 }
 0x113   : > { %v678_v43 = vpack.c.bf16 %v668_v22, %v667_v18  ;;  %v670_v26 = vadd.f32 %v1348_v63, %v647_v20 }
 0x114   : > { %v680_v29 = vpack.c.bf16 %v672_v21, %v671_v28 }
 0x115   : > { %1073 = vmatmul.mubr.msk.bf16.gmra.mxu1 %vm732_vm3, %v678_v43  ;;  %v679_v56 = vpack.c.bf16 %v670_v26, %v669_v25 }
 0x117   : > { %1076 = vmatprep.mubr.msk.bf16.mxu1 %vm732_vm3, %v679_v56 }
 0x11d   : > { %1077 = vmatmul.mubr.msk.bf16.gmra.mxu1 %vm732_vm3, %v680_v29 }
 0x1c5   : > { %v1066_v30 = vpop.f32.mrf.mxu1 }
 0x1c6   : > { %v807_v31 = vadd.f32 %v1066_v30, %v973_v42 }
 0x1c7   : > { %v798_v32 = vpop.f32.mrf.mxu1 }
 0x1c8   : > { %v863_v38 = vadd.f32 %v807_v31, %v1235_v34  ;;  %v799_v39 = vadd.f32 %v973_v42, %v798_v32 }
 0x1c9   : > { %v1067_v41 = vpop.f32.mrf.mxu1 }
 0x1ca   : > { %887 = vst [vmem:[%s1181_s17 + $0x19] sm:$0xff] %v863_v38  ;;  %v861_v63 = vadd.f32 %v799_v39, %v1192_v12  ;;  %v810_v40 = vadd.f32 %v1067_v41, %v973_v42 }
 0x1cb   : > { %v801_v44 = vpop.f32.mrf.mxu1 }
 0x1cc   : > { %885 = vst [vmem:[%s1181_s17 + $0x1] sm:$0xff] %v861_v63  ;;  %v864_v45 = vadd.f32 %v810_v40, %v1238_v35  ;;  %v802_v46 = vadd.f32 %v973_v42, %v801_v44 }
 0x1cd   : > { %v1070_v47 = vpop.f32.mrf.mxu1 }
 0x1ce   : > { %888 = vst [vmem:[%s1181_s17 + $0x21] sm:$0xff] %v864_v45  ;;  %v862_v48 = vadd.f32 %v802_v46, %v1195_v13  ;;  %v823_v49 = vadd.f32 %v1070_v47, %v973_v42 }
 0x1cf   : > { %v814_v34 = vpop.f32.mrf.mxu1 }
 0x1d0   : > { %886 = vst [vmem:[%s1181_s17 + $0x9] sm:$0xff] %v862_v48  ;;  %v867_v54 = vadd.f32 %v823_v49, %v1255_v50  ;;  %v815_v55 = vadd.f32 %v973_v42, %v814_v34 }
 0x1d1   : > { %v1071_v12 = vpop.f32.mrf.mxu1 }
 0x1d2   : > { %891 = vst [vmem:[%s1181_s17 + $0x49] sm:$0xff] %v867_v54  ;;  %v865_v57 = vadd.f32 %v815_v55, %v1241_v36  ;;  %v826_v58 = vadd.f32 %v1071_v12, %v973_v42 }
 0x1d3   : > { %v817_v35 = vpop.f32.mrf.mxu1 }
 0x1d4   : > { %889 = vst [vmem:[%s1181_s17 + $0x31] sm:$0xff] %v865_v57  ;;  %v868_v59 = vadd.f32 %v826_v58, %v1258_v51  ;;  %v818_v60 = vadd.f32 %v973_v42, %v817_v35 }
 0x1d5   : > { %v1074_v13 = vpop.f32.mrf.mxu1 }
 0x1d6   : > { %892 = vst [vmem:[%s1181_s17 + $0x51] sm:$0xff] %v868_v59  ;;  %v866_v61 = vadd.f32 %v818_v60, %v1244_v37  ;;  %v839_v62 = vadd.f32 %v1074_v13, %v973_v42 }
 0x1d7   : > { %v830_v50 = vpop.f32.mrf.mxu1 }
 0x1d8   : > { %890 = vst [vmem:[%s1181_s17 + $0x39] sm:$0xff] %v866_v61  ;;  %v871_v0 = vadd.f32 %v839_v62, %v1277_v2  ;;  %v831_v1 = vadd.f32 %v973_v42, %v830_v50 }
 0x1d9   : > { %v1075_v36 = vpop.f32.mrf.mxu1 }
 0x1da   : > { %895 = vst [vmem:[%s1181_s17 + $0x79] sm:$0xff] %v871_v0  ;;  %v869_v7 = vadd.f32 %v831_v1, %v1261_v52  ;;  %v842_v8 = vadd.f32 %v1075_v36, %v973_v42 }
 0x1db   : > { %v833_v51 = vpop.f32.mrf.mxu1 }
 0x1dc   : > { %893 = vst [vmem:[%s1181_s17 + $0x61] sm:$0xff] %v869_v7  ;;  %v872_v9 = vadd.f32 %v842_v8, %v1280_v3  ;;  %v834_v10 = vadd.f32 %v973_v42, %v833_v51 }
 0x1dd   : > { %v1078_v37 = vpop.f32.mrf.mxu1 }
 0x1de   : > { %896 = vst [vmem:[%s1181_s17 + $0x81] sm:$0xff] %v872_v9  ;;  %v870_v11 = vadd.f32 %v834_v10, %v1264_v53  ;;  %v855_v2 = vadd.f32 %v1078_v37, %v973_v42 }
 0x1df   : > { %v846_v33 = vpop.f32.mrf.mxu1 }
 0x1e0   : > { %894 = vst [vmem:[%s1181_s17 + $0x69] sm:$0xff] %v870_v11  ;;  %v875_v14 = vadd.f32 %v855_v2, %v1296_v15  ;;  %v847_v17 = vadd.f32 %v973_v42, %v846_v33 }
 0x1e1   : > { %v1079_v52 = vpop.f32.mrf.mxu1 }
 0x1e2   : > { %899 = vst [vmem:[%s1181_s17 + $0xa9] sm:$0xff] %v875_v14  ;;  %v873_v6 = vadd.f32 %v847_v17, %v1283_v4  ;;  %v858_v18 = vadd.f32 %v1079_v52, %v973_v42 }
 0x1e3   : > { %v849_v19 = vpop.f32.mrf.mxu1 }
 0x1e4   : > { %897 = vst [vmem:[%s1181_s17 + $0x91] sm:$0xff] %v873_v6  ;;  %v876_v3 = vadd.f32 %v858_v18, %v1299_v16  ;;  %v850_v20 = vadd.f32 %v973_v42, %v849_v19 }
 0x1e6   : > { %900 = vst [vmem:[%s1181_s17 + $0xb1] sm:$0xff] %v876_v3  ;;  %v874_v53 = vadd.f32 %v850_v20, %v1286_v5 }
 0x1e8   : > { %898 = vst [vmem:[%s1181_s17 + $0x99] sm:$0xff] %v874_v53 }
 0x1e9 PF: > { %s17_s24 = sadd.s32 1, %s1110_s24  }
 0x1ea   : > { %p14_p4 = scmp.ge.s32.totalorder %s17_s24, 4  }
 0x1ec   :  { %16 = sbr.rel (!%p14_p4) target bundleno = 1 (0x1), region = 78 }

// kernel: transformer_forward.13
= control target key start
LH: loop header
LB: loop body
LE: loop exit
PB: predicated region body
PF: predicated region fallthrough
CT: control target
= control target key end

     0   :  { %s2062_s24 = smov 0   ;;  %s2385_s0 = inlined_call_operand.vmem [shape: f32[16,17,128], index: 0, kind: input, shape index: {}]   ;;  %s2386_s1 = inlined_call_operand.vmem [shape: f32[1,128], index: 1, kind: input, shape index: {}]   ;;  %s2387_s2 = inlined_call_operand.vmem [shape: f32[1,128], index: 2, kind: input, shape index: {}]   ;;  %s2388_s3 = inlined_call_operand.vmem [shape: bf16[128,384], index: 3, kind: input, shape index: {}]   ;;  %s2389_s4 = inlined_call_operand.vmem [shape: f32[1,384], index: 4, kind: input, shape index: {}]   ;;  %s2390_s5 = inlined_call_operand.vmem [shape: bf16[128,128], index: 5, kind: input, shape index: {}]   ;;  %s2391_s6 = inlined_call_operand.vmem [shape: f32[1,128], index: 6, kind: input, shape index: {}]   ;;  %s2392_s7 = inlined_call_operand.vmem [shape: f32[16,17,128], index: 7, kind: output, shape index: {}]  }
   0x1 LB: > { %s1650_s25 = sadd.s32 4294967295, %s2016_s24   ;;  %p1654_p0 = scmp.ge.s32.totalorder %s2016_s24, 1  ;;  %s2016_s24 = sphi %s2062_s24, %s17_s24  }
   0x2   : > { %p237_p1 = scmp.lt.s32.totalorder %s2016_s24, 17 }
   0x4   : > { %p238_p2 = pnand %p1654_p0, %p237_p1 }
   0x5   : > { %p269_p3 = scmp.lt.s32.totalorder (!%p238_p2), %s1650_s25, 15  ;;  %s2019_s23 = smov (!%p238_p2), 96  }
   0x6   : > { %241 = sbr.rel (%p238_p2) target bundleno = 2488 (0x9b8), region = 48  ;;  %s2020_s9 = smov (!%p238_p2), 64  }
   0x7   : > { %s2021_s10 = smov (!%p238_p2), 32  }
   0xb   : > { %s2394_s25 = smov (!%p269_p3, %s1650_s25), 15  ;;  %vm287_vm0 = vcmask 1040384   ;;  %v1913_v4 = vld [vmem:[%s2388_s3 + $0xac] ss:$12 sps:$4 sm:$0xff]   ;;  %v1915_v5 = vld [vmem:[%s2388_s3 + $0xa8] ss:$12 sps:$4 sm:$0xff]  }
   0xc   : > { %s1900_s26 = smul.u32 24, %s2394_s25  ;;  %v1916_v6 = vld [vmem:[%s2388_s3 + $0xb0] ss:$12 sps:$4 sm:$0xff]   ;;  %519 = vmatprep.subr.bf16.mxu0 %v1913_v4  ;;  %v1917_v20 = vld [vmem:[%s2388_s3 + $0x94] ss:$12 sps:$4 sm:$0xff]   ;;  %v2018_v34 = vmov 0  }
   0xd   : > { %1776 = vmatprep.subr.bf16.mxu1 %v1916_v6  ;;  %520 = vmatpush1.bf16.msra.mxu0 %v1915_v5  ;;  %v1919_v21 = vld [vmem:[%s2388_s3 + $0x90] ss:$12 sps:$4 sm:$0xff]   ;;  %v1920_v22 = vld [vmem:[%s2388_s3 + $0x98] ss:$12 sps:$4 sm:$0xff]   ;;  %v1924_v25 = vld [vmem:[%s2388_s3 + $0x80] ss:$12 sps:$4 sm:$0xff]  }
   0xe   : > { %s2078_s29 = scalar_lea.vmem %s2385_s0, %s1900_s26  ;;  %1777 = vmatpush3.bf16.msra.mxu1 %v1916_v6  ;;  %521 = vmatprep.subr.bf16.mxu0 %v1917_v20  ;;  %v1921_v23 = vld [vmem:[%s2388_s3 + $0x7c] ss:$12 sps:$4 sm:$0xff]   ;;  %v1923_v24 = vld [vmem:[%s2388_s3 + $0x78] ss:$12 sps:$4 sm:$0xff]   ;;  %v1927_v27 = vld [vmem:[%s2388_s3 + $0x60] ss:$12 sps:$4 sm:$0xff]   ;;  %s278_s8 = scalar_lea.vmem %s2392_s7, %s1900_s26 }
   0xf   : > { %v280_v0 = vld [vmem:[%s2078_s29] sm:$0xff]  ;;  %v282_v1 = vld [vmem:[%s2078_s29 + $0x10] sm:$0x1]  ;;  %v281_v2 = vld [vmem:[%s2078_s29 + $0x8] sm:$0xff]  ;;  %1778 = vmatprep.subr.bf16.mxu1 %v1920_v22  ;;  %551 = vmatprep.mubr.bf16.mxu0 %v2018_v34  ;;  %vm641_vm1 = vcmask 261120   ;;  %vm702_vm2 = vcmask 138240  }
  0x10   : > { %283 = vadd.xlane.f32.xlu0 %v280_v0  ;;  %v288_v3 = vsel %vm287_vm0, %v282_v1, 0.0  ;;  %v1925_v26 = vld [vmem:[%s2388_s3 + $0x64] ss:$12 sps:$4 sm:$0xff]   ;;  %v1928_v28 = vld [vmem:[%s2388_s3 + $0x68] ss:$12 sps:$4 sm:$0xff]   ;;  %vm709_vm3 = vcmask 131072  }
  0x11   : > { %289 = vadd.xlane.f32.xlu1 %v288_v3  ;;  %522 = vmatpush1.bf16.msra.mxu0 %v1919_v21  ;;  %v1929_v29 = vld [vmem:[%s2388_s3 + $0x4c] ss:$12 sps:$4 sm:$0xff]   ;;  %v1932_v30 = vld [vmem:[%s2388_s3 + $0x50] ss:$12 sps:$4 sm:$0xff]   ;;  %v1931_v31 = vld [vmem:[%s2388_s3 + $0x48] ss:$12 sps:$4 sm:$0xff]   ;;  %v376_v3 = vlaneseq }
  0x12   : > { %1779 = vmatpush3.bf16.msra.mxu1 %v1920_v22  ;;  %523 = vmatprep.subr.bf16.mxu0 %v1921_v23  ;;  %v1933_v32 = vld [vmem:[%s2388_s3 + $0x34] ss:$12 sps:$4 sm:$0xff]   ;;  %v1936_v33 = vld [vmem:[%s2388_s3 + $0x38] ss:$12 sps:$4 sm:$0xff]   ;;  %v1935_v35 = vld [vmem:[%s2388_s3 + $0x30] ss:$12 sps:$4 sm:$0xff]  }
  0x13   : > { %1780 = vmatprep.subr.bf16.mxu1 %v1924_v25  ;;  %v1937_v36 = vld [vmem:[%s2388_s3 + $0x1c] ss:$12 sps:$4 sm:$0xff]   ;;  %v1940_v37 = vld [vmem:[%s2388_s3 + $0x20] ss:$12 sps:$4 sm:$0xff]   ;;  %v1939_v38 = vld [vmem:[%s2388_s3 + $0x18] ss:$12 sps:$4 sm:$0xff]  }
  0x14   : > { %285 = vadd.xlane.f32.xlu0 %v281_v2  ;;  %v1941_v39 = vld [vmem:[%s2388_s3 + $0x4] ss:$12 sps:$4 sm:$0xff]   ;;  %v1944_v40 = vld [vmem:[%s2388_s3 + $0x8] ss:$12 sps:$4 sm:$0xff]   ;;  %v1943_v41 = vld [vmem:[%s2388_s3] ss:$12 sps:$4 sm:$0xff]  }
  0x15   : > { %524 = vmatpush1.bf16.msra.mxu0 %v1923_v24  ;;  %v1657_v53 = vld [vmem:[%s2386_s1] ss:$0 sm:$0xff]  ;;  %v377_v4 = vshrl.u32 %v376_v3, 7 }
  0x16   : > { %1781 = vmatpush3.bf16.msra.mxu1 %v1924_v25  ;;  %525 = vmatprep.subr.bf16.mxu0 %v1925_v26  ;;  %v1658_v59 = vld [vmem:[%s2387_s2] ss:$0 sm:$0xff] }
  0x17   : > { %1782 = vmatprep.subr.bf16.mxu1 %v1928_v28  ;;  %v386_v5 = vsub.s32 2, %v377_v4  ;;  %v374_v6 = vld [vmem:[%s2389_s4] sm:$0x7] }
  0x19   : > { %526 = vmatpush1.bf16.msra.mxu0 %v1927_v27 }
  0x1a   : > { %1783 = vmatpush3.bf16.msra.mxu1 %v1928_v28  ;;  %527 = vmatprep.subr.bf16.mxu0 %v1929_v29 }
  0x1b   : > { %1784 = vmatprep.subr.bf16.mxu1 %v1932_v30 }
  0x1d   : > { %528 = vmatpush1.bf16.msra.mxu0 %v1931_v31 }
  0x1e   : > { %1785 = vmatpush3.bf16.msra.mxu1 %v1932_v30  ;;  %529 = vmatprep.subr.bf16.mxu0 %v1933_v32 }
  0x1f   : > { %1786 = vmatprep.subr.bf16.mxu1 %v1936_v33 }
  0x21   : > { %530 = vmatpush1.bf16.msra.mxu0 %v1935_v35 }
  0x22   : > { %1787 = vmatpush3.bf16.msra.mxu1 %v1936_v33  ;;  %531 = vmatprep.subr.bf16.mxu0 %v1937_v36 }
  0x23   : > { %1788 = vmatprep.subr.bf16.mxu1 %v1940_v37 }
  0x25   : > { %532 = vmatpush1.bf16.msra.mxu0 %v1939_v38 }
  0x26   : > { %1789 = vmatpush3.bf16.msra.mxu1 %v1940_v37  ;;  %533 = vmatprep.subr.bf16.mxu0 %v1941_v39 }
  0x27   : > { %1790 = vmatprep.subr.bf16.mxu1 %v1944_v40 }
  0x29   : > { %534 = vmatpush1.bf16.msra.mxu0 %v1943_v41 }
  0x2a   : > { %1791 = vmatpush3.bf16.msra.mxu1 %v1944_v40 }
  0x99   : > { %v284_v7 = vpop.xlane.xlu0 %283 }
  0x9a   : > { %v292_v8 = vmul.f32 0.0078125, %v284_v7  ;;  %v290_v9 = vpop.xlane.xlu1 %289  ;;  %v378_v7 = vsub.s32 0, %v377_v4 }
  0x9b   : > { %v294_v10 = vmul.f32 0.0078125, %v290_v9 }
  0x9c   : > { %v2093_v11 = vsub.f32 %v280_v0, %v292_v8  ;;  %v387_v8 = vrot.slane %v374_v6, %v386_v5  ;;  %v379_v9 = vrot.slane %v374_v6, %v378_v7 }
  0x9d   : > { %v2095_v12 = vsub.f32 %v282_v1, %v294_v10  ;;  %v286_v13 = vpop.xlane.xlu0 %285 }
  0x9e   : > { %v293_v14 = vmul.f32 0.0078125, %v286_v13  ;;  %v298_v15 = vmul.f32 %v2093_v11, %v2093_v11 }
  0x9f   : > { %v300_v16 = vmul.f32 %v2095_v12, %v2095_v12 }
  0xa0   : > { %v2101_v17 = vsub.f32 %v281_v2, %v293_v14  ;;  %301 = vadd.xlane.f32.xlu1 %v298_v15  ;;  %v2185_v14 = vsel %vm287_vm0, 65535, %v2018_v34 }
  0xa1   : > { %v305_v18 = vsel %vm287_vm0, %v300_v16, 0.0 }
  0xa2   : > { %v299_v19 = vmul.f32 %v2101_v17, %v2101_v17 }
  0xa4   : > { %306 = vadd.xlane.f32.xlu1 %v305_v18  ;;  %303 = vadd.xlane.f32.xlu0 %v299_v19  ;;  %v382_v19 = vsub.s32 1, %v377_v4 }
  0xa6   : > { %v383_v30 = vrot.slane %v374_v6, %v382_v19 }
 0x129   : > { %v302_v42 = vpop.xlane.xlu1 %301 }
 0x12a   : > { %v308_v43 = vmul.f32 0.0078125, %v302_v42 }
 0x12c   : > { %v311_v44 = vadd.f32 1e-05, %v308_v43 }
 0x12d   : > { %v307_v45 = vpop.xlane.xlu1 %306  ;;  %v304_v46 = vpop.xlane.xlu0 %303 }
 0x12e   : > { %1953 = vrsqrt.f32 %v311_v44  ;;  %v310_v47 = vmul.f32 0.0078125, %v307_v45  ;;  %v309_v48 = vmul.f32 0.0078125, %v304_v46 }
 0x130   : > { %v313_v49 = vadd.f32 1e-05, %v310_v47  ;;  %v312_v50 = vadd.f32 1e-05, %v309_v48 }
 0x132   : > { %1955 = vrsqrt.f32 %v313_v49 }
 0x133   : > { %1957 = vrsqrt.f32 %v312_v50 }
 0x13b   : > { %v1954_v51 = vpop.eup %1953 }
 0x13c   : > { %v317_v52 = vmul.f32 %v1954_v51, %v2093_v11 }
 0x13e   : > { %v327_v58 = vmul.f32 %v1657_v53, %v317_v52 }
 0x13f   : > { %v1956_v54 = vpop.eup %1955 }
 0x140   : > { %v1958_v55 = vpop.eup %1957  ;;  %v319_v56 = vmul.f32 %v1956_v54, %v2095_v12  ;;  %v337_v63 = vadd.f32 %v1658_v59, %v327_v58 }
 0x141   : > { %v318_v57 = vmul.f32 %v1958_v55, %v2101_v17 }
 0x142   : > { %v329_v60 = vmul.f32 %v1657_v53, %v319_v56 }
 0x143   : > { %v328_v61 = vmul.f32 %v1657_v53, %v318_v57 }
 0x144   : > { %v339_v62 = vadd.f32 %v1658_v59, %v329_v60 }
 0x145   : > { %v338_v0 = vadd.f32 %v1658_v59, %v328_v61 }
 0x146   : > { %v341_v1 = vpack.c.bf16 %v339_v62, %v339_v62 }
 0x147   : > { %v340_v2 = vpack.c.bf16 %v338_v0, %v337_v63 }
 0x149   : > { %552 = vmatmul.mubr.bf16.vlgmr.msra.gmra.mxu0 %v340_v2  ;;  %1792 = vmatprep.mubr.bf16.mxu1 %v340_v2 }
 0x14a   : > { %1793 = vmatmul.mubr.bf16.vlgmr.msra.gmra.mxu1 %v341_v1  ;;  %561 = vmatprep.mubr.bf16.mxu0 %v2018_v34 }
 0x151   : > { %562 = vmatmul.mubr.bf16.gmra.mxu0 %v341_v1 }
 0x209   : > { %v553_v10 = vpop.f32.mrf.mxu0 }
 0x20a   : > { %v1794_v11 = vpop.f32.mrf.mxu1  ;;  %v554_v15 = vadd.f32 %v553_v10, %v379_v9 }
 0x20b   : > { %v613_v12 = vadd.f32 %v1794_v11, %v387_v8  ;;  %v555_v13 = vpop.f32.mrf.mxu0 }
 0x20c   : > { %v604_v16 = vpop.f32.mrf.mxu1  ;;  %v634_v24 = vmul.f32 0.17677669, %v554_v15  ;;  %v556_v37 = vadd.f32 %v555_v13, %v383_v30 }
 0x20d   : > { %v2187_v17 = vpack.c.bf16 %v613_v12, %v613_v12  ;;  %v557_v18 = vpop.f32.mrf.mxu0  ;;  %v605_v27 = vadd.f32 %v604_v16, %v387_v8 }
 0x20e   : > { %v558_v20 = vadd.f32 %v557_v18, %v379_v9  ;;  %v1795_v21 = vpop.f32.mrf.mxu1 }
 0x20f   : > { %v559_v22 = vpop.f32.mrf.mxu0  ;;  %v744_v23 = vand.u32 %v2185_v14, %v2187_v17 }
 0x210   : > { %v635_v25 = vmul.f32 0.17677669, %v558_v20  ;;  %v607_v26 = vpop.f32.mrf.mxu1  ;;  %v560_v34 = vadd.f32 %v559_v22, %v383_v30 }
 0x211   : > { %v608_v28 = vadd.f32 %v607_v26, %v387_v8  ;;  %v563_v29 = vpop.f32.mrf.mxu0  ;;  %1804 = vmatprep.subr.bf16.mxu1 %v744_v23 }
 0x212   : > { %v2191_v31 = vpack.c.bf16 %v635_v25, %v634_v24  ;;  %1805 = vmatpush3.bf16.msra.mxu1 %v744_v23  ;;  %v2201_v40 = vpack.c.bf16 %v560_v34, %v556_v37  ;;  %v564_v42 = vadd.f32 %v563_v29, %v379_v9 }
 0x213   : > { %v2193_v32 = vpack.c.bf16 %v608_v28, %v605_v27  ;;  %v565_v33 = vpop.f32.mrf.mxu0 }
 0x214   : > { %v566_v35 = vadd.f32 %v565_v33, %v383_v30  ;;  %1800 = vmatprep.mubr.msk.bf16.mxu0 %vm641_vm1, %v2191_v31  ;;  %v649_v43 = vsel %vm641_vm1, %v2201_v40, 0  ;;  %v636_v44 = vmul.f32 0.17677669, %v564_v42 }
 0x215   : > { %v567_v36 = vpop.f32.mrf.mxu0  ;;  %1806 = vmatprep.subr.bf16.mxu1 %v2193_v32 }
 0x216   : > { %v2198_v38 = vpack.c.bf16 %v566_v35, %v566_v35  ;;  %1807 = vmatpush3.bf16.msra.mxu1 %v2193_v32  ;;  %v2211_v45 = vpack.c.bf16 %v636_v44, %v636_v44  ;;  %v1945_v36 = vld [vmem:[%s2390_s5 + $0x18] sm:$0xff]  }
 0x217   : > { %v568_v39 = vpop.f32.mrf.mxu0 }
 0x218   : > { %1892 = vmatprep.subr.msk.bf16.mxu0 %vm641_vm1, %v2198_v38  ;;  %v652_v41 = vsel %vm641_vm1, %v2198_v38, 0 }
 0x219   : > { %1797 = vmatpush3.bf16.xpose.msra.mxu0 %v652_v41 }
 0x21a   : > { %1893 = vmatprep.subr.msk.bf16.mxu0 %vm641_vm1, %v2201_v40 }
 0x221   : > { %1799 = vmatpush3.bf16.xpose.msra.mxu0 %v649_v43 }
 0x228   : > { %1801 = vmatmul.mubr.msk.bf16.vlgmr.msra.gmra.mxu0 %vm641_vm1, %v2211_v45 }
 0x2e8   : > { %v1802_v46 = vpop.f32.mrf.mxu0 }
 0x2e9   : > { %v710_v51 = vsel %vm709_vm3, %v1802_v46, -inf }
 0x2ea   : > { %v688_v47 = vpop.f32.mrf.mxu0 }
 0x2eb   : > { %v703_v48 = vsel %vm702_vm2, %v688_v47, -inf }
 0x2ec   : > { %704 = vmax.xlane.f32.xlu0 %v703_v48  ;;  %v1803_v49 = vpop.f32.mrf.mxu0  ;;  %v1946_v48 = vld [vmem:[%s2390_s5 + $0x10] sm:$0xff]  }
 0x2ee   : > { %v691_v50 = vpop.f32.mrf.mxu0 }
 0x2ef   : > { %v706_v52 = vsel %vm702_vm2, %v691_v50, -inf }
 0x2f0   : > { %711 = vmax.xlane.f32.xlu0 %v710_v51  ;;  %707 = vmax.xlane.f32.xlu1 %v706_v52 }
 0x301   : > { %812 = vrot.lane.b32.xlu1 %v2198_v38, %s2019_s23 }
 0x305   : > { %804 = vrot.lane.b32.xlu1 %v2191_v31, %s2019_s23 }
 0x306   : > { %810 = vrot.lane.b32.xlu0 %v2201_v40, %s2019_s23 }
 0x309   : > { %806 = vrot.lane.b32.xlu1 %v2211_v45, %s2019_s23 }
 0x375   : > { %v705_v53 = vpop.xlane.xlu0 %704 }
 0x376   : > { %v713_v54 = vsub.f32 %v688_v47, %v705_v53 }
 0x378   : > { %v716_v55 = vmul.f32 1.442695, %v713_v54 }
 0x379   : > { %v712_v56 = vpop.xlane.xlu0 %711  ;;  %v708_v57 = vpop.xlane.xlu1 %707 }
 0x37a   : > { %v715_v58 = vsub.f32 %v1802_v46, %v712_v56  ;;  %v714_v59 = vsub.f32 %v691_v50, %v708_v57  ;;  %1959 = vpow2.f32 %v716_v55 }
 0x37c   : > { %v720_v60 = vmul.f32 1.442695, %v715_v58  ;;  %v718_v61 = vmul.f32 1.442695, %v714_v59 }
 0x37d   : > { %v813_v62 = vpop.permute.xlu1 %812  ;;  %v811_v6 = vpop.permute.xlu0 %810 }
 0x37e   : > { %1961 = vpow2.f32 %v720_v60  ;;  %1894 = vmatprep.subr.msk.bf16.mxu1 %vm641_vm1, %v813_v62  ;;  %v824_v4 = vsel %vm641_vm1, %v813_v62, 0  ;;  %v821_v7 = vsel %vm641_vm1, %v811_v6, 0 }
 0x37f   : > { %1963 = vpow2.f32 %v718_v61 }
 0x381   : > { %v805_v5 = vpop.permute.xlu1 %804 }
 0x385   : > { %v807_v8 = vpop.permute.xlu1 %806 }
 0x387   : > { %v2227_v63 = vpop.eup %1959 }
 0x388   : > { %v722_v49 = vsel %vm702_vm2, %v2227_v63, 0.0 }
 0x38b   : > { %v2229_v0 = vpop.eup %1961 }
 0x38c   : > { %v2231_v1 = vpop.eup %1963  ;;  %v732_v2 = vpack.c.bf16 %v2229_v0, %v2229_v0 }
 0x38d   : > { %v731_v3 = vpack.c.bf16 %v2231_v1, %v2227_v63  ;;  %v725_v50 = vsel %vm702_vm2, %v2231_v1, 0.0 }
 0x38f   : > { %1808 = vmatprep.mubr.msk.bf16.mxu1 %vm702_vm2, %v731_v3 }
 0x390   : > { %1809 = vmatmul.mubr.msk.bf16.vlgmr.msra.gmra.mxu1 %vm702_vm2, %v732_v2 }
 0x391   : > { %1813 = vmatpush3.bf16.xpose.msra.mxu1 %v824_v4  ;;  %1816 = vmatprep.mubr.msk.bf16.mxu1 %vm641_vm1, %v805_v5 }
 0x392   : > { %1895 = vmatprep.subr.msk.bf16.mxu1 %vm641_vm1, %v811_v6 }
 0x399   : > { %1815 = vmatpush3.bf16.xpose.msra.mxu1 %v821_v7 }
 0x3a0   : > { %1817 = vmatmul.mubr.msk.bf16.vlgmr.msra.gmra.mxu1 %vm641_vm1, %v807_v8 }
 0x450   : > { %v2244_v9 = vpop.f32.mrf.mxu1 }
 0x452   : > { %v2246_v10 = vpop.f32.mrf.mxu1 }
 0x454   : > { %v1811_v11 = vpop.f32.mrf.mxu1 }
 0x456   : > { %v2248_v12 = vpop.f32.mrf.mxu1 }
 0x460   : > { %v1818_v13 = vpop.f32.mrf.mxu1 }
 0x461   : > { %v880_v15 = vsel %vm709_vm3, %v1818_v13, -inf }
 0x462   : > { %881 = vmax.xlane.f32.xlu0 %v880_v15  ;;  %v860_v16 = vpop.f32.mrf.mxu1 }
 0x463   : > { %v874_v18 = vsel %vm702_vm2, %v860_v16, -inf }
 0x464   : > { %875 = vmax.xlane.f32.xlu1 %v874_v18  ;;  %v1819_v19 = vpop.f32.mrf.mxu1 }
 0x466   : > { %v863_v20 = vpop.f32.mrf.mxu1 }
 0x467   : > { %v877_v21 = vsel %vm702_vm2, %v863_v20, -inf }
 0x468   : > { %878 = vmax.xlane.f32.xlu0 %v877_v21 }
 0x475   : > { %905 = vrot.lane.b32.xlu1 %v2193_v32, %s2019_s23 }
 0x47e   : > { %907 = vrot.lane.b32.xlu0 %v2187_v17, %s2019_s23 }
 0x4eb   : > { %v882_v22 = vpop.xlane.xlu0 %881 }
 0x4ec   : > { %v885_v23 = vsub.f32 %v1818_v13, %v882_v22 }
 0x4ed   : > { %v876_v24 = vpop.xlane.xlu1 %875 }
 0x4ee   : > { %v883_v25 = vsub.f32 %v860_v16, %v876_v24  ;;  %v890_v27 = vmul.f32 1.442695, %v885_v23 }
 0x4f0   : > { %v886_v26 = vmul.f32 1.442695, %v883_v25 }
 0x4f1   : > { %v879_v28 = vpop.xlane.xlu0 %878  ;;  %v906_v35 = vpop.permute.xlu1 %905 }
 0x4f2   : > { %1965 = vpow2.f32 %v886_v26  ;;  %v884_v29 = vsub.f32 %v863_v20, %v879_v28 }
 0x4f3   : > { %1967 = vpow2.f32 %v890_v27 }
 0x4f4   : > { %v888_v30 = vmul.f32 1.442695, %v884_v29 }
 0x4f5   : > { %v908_v33 = vpop.permute.xlu0 %907 }
 0x4f6   : > { %1969 = vpow2.f32 %v888_v30  ;;  %v917_v34 = vand.u32 %v908_v33, %v2185_v14 }
 0x4f8   : > { %1820 = vmatprep.subr.bf16.mxu0 %v917_v34 }
 0x4f9   : > { %1821 = vmatpush3.bf16.msra.mxu0 %v917_v34 }
 0x4fa   : > { %1822 = vmatprep.subr.bf16.mxu0 %v906_v35 }
 0x4fd   : > { %1823 = vmatpush3.bf16.msra.mxu0 %v906_v35 }
 0x4fe   : > { %1828 = vmatprep.subr.bf16.mxu0 %v1945_v36 }
 0x4ff   : > { %v1966_v37 = vpop.eup %1965 }
 0x500   : > { %v892_v39 = vsel %vm702_vm2, %v1966_v37, 0.0  ;;  %v1968_v41 = vpop.eup %1967 }
 0x501   : > { %893 = vadd.xlane.f32.xlu1 %v892_v39  ;;  %v902_v46 = vpack.c.bf16 %v1968_v41, %v1968_v41  ;;  %v898_v47 = vsel %vm709_vm3, %v1968_v41, 0.0 }
 0x503   : > { %v1970_v42 = vpop.eup %1969 }
 0x504   : > { %v895_v43 = vsel %vm702_vm2, %v1970_v42, 0.0  ;;  %v901_v44 = vpack.c.bf16 %v1970_v42, %v1966_v37 }
 0x505   : > { %896 = vadd.xlane.f32.xlu0 %v895_v43 }
 0x506   : > { %1824 = vmatprep.mubr.msk.bf16.mxu0 %vm702_vm2, %v901_v44 }
 0x507   : > { %1825 = vmatmul.mubr.msk.bf16.vlgmr.msra.gmra.mxu0 %vm702_vm2, %v902_v46 }
 0x508   : > { %1829 = vmatpush3.bf16.msra.mxu0 %v1945_v36 }
 0x509   : > { %899 = vadd.xlane.f32.xlu0 %v898_v47  ;;  %1830 = vmatprep.subr.bf16.mxu0 %v1946_v48 }
 0x50c   : > { %1831 = vmatpush3.bf16.msra.mxu0 %v1946_v48 }
 0x512   : > { %1113 = vrot.lane.b32.xlu1 %v2198_v38, %s2020_s9 }
 0x516   : > { %1107 = vrot.lane.b32.xlu1 %v2191_v31, %s2020_s9 }
 0x51a   : > { %1109 = vrot.lane.b32.xlu1 %v2211_v45, %s2020_s9 }
 0x51e   : > { %1349 = vrot.lane.b32.xlu1 %v2198_v38, %s2021_s10  ;;  %v728_v38 = vsel %vm709_vm3, %v2229_v0, 0.0 }
 0x51f   : > { %1111 = vrot.lane.b32.xlu0 %v2201_v40, %s2020_s9 }
 0x522   : > { %1343 = vrot.lane.b32.xlu1 %v2191_v31, %s2021_s10  ;;  %v1947_v31 = vld [vmem:[%s2390_s5 + $0x8] sm:$0xff]  }
 0x523   : > { %1347 = vrot.lane.b32.xlu0 %v2201_v40, %s2021_s10  ;;  %v1948_v40 = vld [vmem:[%s2390_s5] sm:$0xff]   ;;  %1836 = vmatprep.subr.bf16.mxu1 %v1947_v31 }
 0x524   : > { %1837 = vmatpush3.bf16.msra.mxu1 %v1947_v31 }
 0x525   : > { %1838 = vmatprep.subr.bf16.mxu1 %v1948_v40 }
 0x527   : > { %1345 = vrot.lane.b32.xlu0 %v2211_v45, %s2021_s10 }
 0x528   : > { %1839 = vmatpush3.bf16.msra.mxu1 %v1948_v40 }
 0x546   : > { %723 = vadd.xlane.f32.xlu1 %v722_v49  ;;  %726 = vadd.xlane.f32.xlu0 %v725_v50 }
 0x54a   : > { %729 = vadd.xlane.f32.xlu0 %v728_v38 }
 0x58a   : > { %v894_v45 = vpop.xlane.xlu1 %893 }
 0x58b   : > { %1971 = vrcp.f32 %v894_v45 }
 0x58e   : > { %v1114_v51 = vpop.permute.xlu1 %1113  ;;  %v897_v52 = vpop.xlane.xlu0 %896 }
 0x58f   : > { %1896 = vmatprep.subr.msk.bf16.mxu0 %vm641_vm1, %v1114_v51  ;;  %v1125_v15 = vsel %vm641_vm1, %v1114_v51, 0 }
 0x592   : > { %v1108_v53 = vpop.permute.xlu1 %1107  ;;  %v900_v54 = vpop.xlane.xlu0 %899 }
 0x593   : > { %1973 = vrcp.f32 %v900_v54 }
 0x594   : > { %1975 = vrcp.f32 %v897_v52 }
 0x596   : > { %v1110_v55 = vpop.permute.xlu1 %1109  ;;  %v1112_v56 = vpop.permute.xlu0 %1111 }
 0x597   : > { %v1122_v18 = vsel %vm641_vm1, %v1112_v56, 0 }
 0x598   : > { %v1972_v62 = vpop.eup %1971 }
 0x59a   : > { %v1350_v57 = vpop.permute.xlu1 %1349  ;;  %v1348_v58 = vpop.permute.xlu0 %1347 }
 0x59b   : > { %v1361_v26 = vsel %vm641_vm1, %v1350_v57, 0 }
 0x59e   : > { %v1344_v61 = vpop.permute.xlu1 %1343  ;;  %v1346_v63 = vpop.permute.xlu0 %1345 }
 0x5a0   : > { %v1974_v1 = vpop.eup %1973 }
 0x5a1   : > { %v1976_v2 = vpop.eup %1975 }
 0x5c7   : > { %v1826_v59 = vpop.f32.mrf.mxu0 }
 0x5c8   : > { %v972_v3 = vmul.f32 %v1974_v1, %v1826_v59 }
 0x5c9   : > { %v953_v60 = vpop.f32.mrf.mxu0 }
 0x5ca   : > { %v968_v5 = vmul.f32 %v1972_v62, %v953_v60  ;;  %v974_v13 = vpack.c.bf16 %v972_v3, %v972_v3 }
 0x5cb   : > { %v1827_v0 = vpop.f32.mrf.mxu0 }
 0x5cd   : > { %v956_v4 = vpop.f32.mrf.mxu0 }
 0x5ce   : > { %v970_v6 = vmul.f32 %v1976_v2, %v956_v4 }
 0x5cf   : > { %v724_v7 = vpop.xlane.xlu1 %723  ;;  %v727_v8 = vpop.xlane.xlu0 %726 }
 0x5d0   : > { %v973_v11 = vpack.c.bf16 %v970_v6, %v968_v5  ;;  %1977 = vrcp.f32 %v724_v7  ;;  %v1949_v6 = vld [vmem:[%s2390_s5 + $0x28] sm:$0xff]   ;;  %v1950_v7 = vld [vmem:[%s2390_s5 + $0x20] sm:$0xff]  }
 0x5d1   : > { %1979 = vrcp.f32 %v727_v8 }
 0x5d2   : > { %1832 = vmatprep.mubr.msk.bf16.mxu0 %vm641_vm1, %v973_v11 }
 0x5d3   : > { %1833 = vmatmul.mubr.msk.bf16.vlgmr.msra.gmra.mxu0 %vm641_vm1, %v974_v13  ;;  %v730_v16 = vpop.xlane.xlu0 %729 }
 0x5d4   : > { %1845 = vmatpush3.bf16.xpose.msra.mxu0 %v1125_v15  ;;  %1981 = vrcp.f32 %v730_v16  ;;  %1848 = vmatprep.mubr.msk.bf16.mxu0 %vm641_vm1, %v1108_v53 }
 0x5d5   : > { %1897 = vmatprep.subr.msk.bf16.mxu0 %vm641_vm1, %v1112_v56 }
 0x5dc   : > { %1847 = vmatpush3.bf16.xpose.msra.mxu0 %v1122_v18 }
 0x5dd   : > { %v1978_v19 = vpop.eup %1977  ;;  %1898 = vmatprep.subr.msk.bf16.mxu0 %vm641_vm1, %v1350_v57 }
 0x5de   : > { %v1980_v20 = vpop.eup %1979  ;;  %v795_v21 = vmul.f32 %v1978_v19, %v2246_v10  ;;  %v1358_v10 = vsel %vm641_vm1, %v1348_v58, 0 }
 0x5df   : > { %v797_v22 = vmul.f32 %v1980_v20, %v2248_v12 }
 0x5e1   : > { %v1982_v23 = vpop.eup %1981  ;;  %v800_v24 = vpack.c.bf16 %v797_v22, %v795_v21 }
 0x5e2   : > { %v799_v25 = vmul.f32 %v1982_v23, %v2244_v9 }
 0x5e3   : > { %1840 = vmatprep.mubr.msk.bf16.mxu1 %vm641_vm1, %v800_v24  ;;  %1849 = vmatmul.mubr.msk.bf16.vlgmr.msra.gmra.mxu0 %vm641_vm1, %v1110_v55 }
 0x5e4   : > { %1869 = vmatpush3.bf16.xpose.msra.mxu0 %v1361_v26  ;;  %1872 = vmatprep.mubr.msk.bf16.mxu0 %vm641_vm1, %v1344_v61  ;;  %v801_v27 = vpack.c.bf16 %v799_v25, %v799_v25 }
 0x5e5   : > { %1899 = vmatprep.subr.msk.bf16.mxu0 %vm641_vm1, %v1348_v58 }
 0x5e6   : > { %1841 = vmatmul.mubr.msk.bf16.vlgmr.msra.gmra.mxu1 %vm641_vm1, %v801_v27 }
 0x5ec   : > { %1871 = vmatpush3.bf16.xpose.msra.mxu0 %v1358_v10 }
 0x5f3   : > { %1873 = vmatmul.mubr.msk.bf16.vlgmr.msra.gmra.mxu0 %vm641_vm1, %v1346_v63 }
 0x693   : > { %v1834_v9 = vpop.f32.mrf.mxu0 }
 0x695   : > { %v1027_v12 = vpop.f32.mrf.mxu0 }
 0x697   : > { %v1835_v28 = vpop.f32.mrf.mxu0 }
 0x699   : > { %v2316_v29 = vpop.f32.mrf.mxu0 }
 0x6a3   : > { %v1850_v30 = vpop.f32.mrf.mxu0 }
 0x6a4   : > { %v1181_v33 = vsel %vm709_vm3, %v1850_v30, -inf }
 0x6a5   : > { %1182 = vmax.xlane.f32.xlu0 %v1181_v33  ;;  %v1161_v34 = vpop.f32.mrf.mxu0 }
 0x6a6   : > { %v1842_v35 = vpop.f32.mrf.mxu1  ;;  %v1175_v39 = vsel %vm702_vm2, %v1161_v34, -inf }
 0x6a7   : > { %v2319_v36 = vadd.f32 %v1842_v35, %v1834_v9  ;;  %v1851_v37 = vpop.f32.mrf.mxu0 }
 0x6a8   : > { %v1093_v41 = vpop.f32.mrf.mxu1 }
 0x6a9   : > { %1176 = vmax.xlane.f32.xlu0 %v1175_v39  ;;  %v2322_v42 = vadd.f32 %v1093_v41, %v1027_v12  ;;  %v1164_v43 = vpop.f32.mrf.mxu0 }
 0x6aa   : > { %v1178_v44 = vsel %vm702_vm2, %v1164_v43, -inf  ;;  %v1843_v46 = vpop.f32.mrf.mxu1 }
 0x6ab   : > { %1179 = vmax.xlane.f32.xlu1 %v1178_v44 }
 0x6b3   : > { %v2325_v47 = vpop.f32.mrf.mxu0 }
 0x6b4   : > { %v1417_v5 = vsel %vm709_vm3, %v2325_v47, -inf }
 0x6b5   : > { %v1397_v48 = vpop.f32.mrf.mxu0 }
 0x6b6   : > { %v1411_v38 = vsel %vm702_vm2, %v1397_v48, -inf }
 0x6b7   : > { %v1875_v49 = vpop.f32.mrf.mxu0 }
 0x6b9   : > { %v1400_v50 = vpop.f32.mrf.mxu0 }
 0x6ba   : > { %v1414_v31 = vsel %vm702_vm2, %v1400_v50, -inf }
 0x6bc   : > { %1206 = vrot.lane.b32.xlu1 %v2187_v17, %s2020_s9 }
 0x6bf   : > { %1204 = vrot.lane.b32.xlu0 %v2193_v32, %s2020_s9 }
 0x6de   : > { %1412 = vmax.xlane.f32.xlu0 %v1411_v38  ;;  %v1951_v38 = vld [vmem:[%s2390_s5 + $0x38] sm:$0xff]  }
 0x6e0   : > { %1415 = vmax.xlane.f32.xlu1 %v1414_v31  ;;  %v1952_v31 = vld [vmem:[%s2390_s5 + $0x30] sm:$0xff]  }
 0x72e   : > { %v1183_v40 = vpop.xlane.xlu0 %1182 }
 0x72f   : > { %v1186_v45 = vsub.f32 %v1850_v30, %v1183_v40  ;;  %v1096_v30 = vpop.f32.mrf.mxu1 }
 0x731   : > { %v1191_v51 = vmul.f32 1.442695, %v1186_v45 }
 0x732   : > { %v1177_v52 = vpop.xlane.xlu0 %1176 }
 0x733   : > { %1983 = vpow2.f32 %v1191_v51  ;;  %v1184_v53 = vsub.f32 %v1161_v34, %v1177_v52 }
 0x734   : > { %v1180_v54 = vpop.xlane.xlu1 %1179 }
 0x735   : > { %v1187_v55 = vmul.f32 1.442695, %v1184_v53  ;;  %v1185_v56 = vsub.f32 %v1164_v43, %v1180_v54 }
 0x736   : > { %v1205_v60 = vpop.permute.xlu0 %1204 }
 0x737   : > { %1985 = vpow2.f32 %v1187_v55  ;;  %v1189_v57 = vmul.f32 1.442695, %v1185_v56 }
 0x738   : > { %v1207_v58 = vpop.permute.xlu1 %1206 }
 0x739   : > { %1987 = vpow2.f32 %v1189_v57  ;;  %v1216_v59 = vand.u32 %v1207_v58, %v2185_v14  ;;  %v1097_v57 = vadd.f32 %v1096_v30, %v2316_v29 }
 0x73b   : > { %1852 = vmatprep.subr.bf16.mxu1 %v1216_v59 }
 0x73c   : > { %1853 = vmatpush3.bf16.msra.mxu1 %v1216_v59 }
 0x73d   : > { %1854 = vmatprep.subr.bf16.mxu1 %v1205_v60 }
 0x740   : > { %v1984_v61 = vpop.eup %1983  ;;  %1855 = vmatpush3.bf16.msra.mxu1 %v1205_v60 }
 0x741   : > { %v1199_v62 = vsel %vm709_vm3, %v1984_v61, 0.0  ;;  %v1203_v4 = vpack.c.bf16 %v1984_v61, %v1984_v61  ;;  %1860 = vmatprep.subr.bf16.mxu1 %v1949_v6 }
 0x742   : > { %1200 = vadd.xlane.f32.xlu1 %v1199_v62 }
 0x744   : > { %v1986_v63 = vpop.eup %1985 }
 0x745   : > { %v1193_v0 = vsel %vm702_vm2, %v1986_v63, 0.0 }
 0x746   : > { %v1988_v1 = vpop.eup %1987  ;;  %1194 = vadd.xlane.f32.xlu1 %v1193_v0 }
 0x747   : > { %v1196_v2 = vsel %vm702_vm2, %v1988_v1, 0.0  ;;  %v1202_v3 = vpack.c.bf16 %v1988_v1, %v1986_v63 }
 0x748   : > { %1197 = vadd.xlane.f32.xlu0 %v1196_v2 }
 0x749   : > { %1856 = vmatprep.mubr.msk.bf16.mxu1 %vm702_vm2, %v1202_v3 }
 0x74a   : > { %1857 = vmatmul.mubr.msk.bf16.vlgmr.msra.gmra.mxu1 %vm702_vm2, %v1203_v4 }
 0x74b   : > { %1861 = vmatpush3.bf16.msra.mxu1 %v1949_v6 }
 0x74c   : > { %1418 = vmax.xlane.f32.xlu0 %v1417_v5  ;;  %1862 = vmatprep.subr.bf16.mxu1 %v1950_v7 }
 0x74f   : > { %1863 = vmatpush3.bf16.msra.mxu1 %v1950_v7 }
 0x757   : > { %1442 = vrot.lane.b32.xlu1 %v2187_v17, %s2021_s10 }
 0x762   : > { %1440 = vrot.lane.b32.xlu0 %v2193_v32, %s2021_s10 }
 0x767   : > { %v1413_v8 = vpop.xlane.xlu0 %1412 }
 0x768   : > { %v1420_v11 = vsub.f32 %v1397_v48, %v1413_v8 }
 0x769   : > { %v1416_v13 = vpop.xlane.xlu1 %1415 }
 0x76a   : > { %v1423_v15 = vmul.f32 1.442695, %v1420_v11  ;;  %v1421_v16 = vsub.f32 %v1400_v50, %v1416_v13 }
 0x76c   : > { %1989 = vpow2.f32 %v1423_v15  ;;  %v1425_v18 = vmul.f32 1.442695, %v1421_v16  ;;  %v2007_v16 = vld [vmem:[%s2078_s29 + $0x10] sm:$0x1] }
 0x76e   : > { %1991 = vpow2.f32 %v1425_v18 }
 0x779   : > { %v1990_v19 = vpop.eup %1989 }
 0x77a   : > { %v1429_v20 = vsel %vm702_vm2, %v1990_v19, 0.0 }
 0x77b   : > { %v1992_v21 = vpop.eup %1991  ;;  %1430 = vadd.xlane.f32.xlu1 %v1429_v20 }
 0x77c   : > { %v1438_v22 = vpack.c.bf16 %v1992_v21, %v1990_v19  ;;  %v1432_v23 = vsel %vm702_vm2, %v1992_v21, 0.0  ;;  %v2008_v21 = vld [vmem:[%s2078_s29] sm:$0xff] }
 0x781   : > { %1433 = vadd.xlane.f32.xlu0 %v1432_v23 }
 0x7cb   : > { %v1201_v17 = vpop.xlane.xlu1 %1200 }
 0x7cf   : > { %v1195_v24 = vpop.xlane.xlu1 %1194 }
 0x7d1   : > { %v1198_v32 = vpop.xlane.xlu0 %1197 }
 0x7d3   : > { %v1443_v25 = vpop.permute.xlu1 %1442 }
 0x7d4   : > { %v1452_v26 = vand.u32 %v1443_v25, %v2185_v14 }
 0x7d5   : > { %v1419_v27 = vpop.xlane.xlu0 %1418 }
 0x7d6   : > { %v1422_v10 = vsub.f32 %v2325_v47, %v1419_v27  ;;  %1876 = vmatprep.subr.bf16.mxu1 %v1452_v26 }
 0x7d8   : > { %v1427_v9 = vmul.f32 1.442695, %v1422_v10 }
 0x7d9   : > { %v1441_v49 = vpop.permute.xlu0 %1440 }
 0x7da   : > { %1993 = vpow2.f32 %v1427_v9 }
 0x7db   : > { %1995 = vrcp.f32 %v1201_v17 }
 0x7dc   : > { %1997 = vrcp.f32 %v1195_v24  ;;  %v2009_v24 = vld [vmem:[%s2078_s29 + $0x8] sm:$0xff] }
 0x7dd   : > { %1999 = vrcp.f32 %v1198_v32 }
 0x7e7   : > { %v1994_v12 = vpop.eup %1993 }
 0x7e8   : > { %v1435_v28 = vsel %vm709_vm3, %v1994_v12, 0.0  ;;  %v1996_v35 = vpop.eup %1995  ;;  %v1439_v50 = vpack.c.bf16 %v1994_v12, %v1994_v12 }
 0x7e9   : > { %1436 = vadd.xlane.f32.xlu1 %v1435_v28  ;;  %v1998_v39 = vpop.eup %1997 }
 0x7ea   : > { %v2000_v14 = vpop.eup %1999 }
 0x804   : > { %v1431_v40 = vpop.xlane.xlu1 %1430 }
 0x805   : > { %2001 = vrcp.f32 %v1431_v40 }
 0x80a   : > { %v1858_v33 = vpop.f32.mrf.mxu1  ;;  %v1434_v51 = vpop.xlane.xlu0 %1433 }
 0x80b   : > { %v1271_v41 = vmul.f32 %v1996_v35, %v1858_v33 }
 0x80c   : > { %v1252_v34 = vpop.f32.mrf.mxu1 }
 0x80d   : > { %v1267_v44 = vmul.f32 %v1998_v39, %v1252_v34  ;;  %v1273_v48 = vpack.c.bf16 %v1271_v41, %v1271_v41 }
 0x80e   : > { %v1859_v37 = vpop.f32.mrf.mxu1 }
 0x810   : > { %v1255_v43 = vpop.f32.mrf.mxu1 }
 0x811   : > { %v1269_v46 = vmul.f32 %v2000_v14, %v1255_v43 }
 0x812   : > { %v2002_v62 = vpop.eup %2001 }
 0x813   : > { %v1272_v47 = vpack.c.bf16 %v1269_v46, %v1267_v44 }
 0x815   : > { %1864 = vmatprep.mubr.msk.bf16.mxu1 %vm641_vm1, %v1272_v47 }
 0x816   : > { %1865 = vmatmul.mubr.msk.bf16.vlgmr.msra.gmra.mxu1 %vm641_vm1, %v1273_v48 }
 0x817   : > { %1877 = vmatpush3.bf16.msra.mxu1 %v1452_v26  ;;  %1880 = vmatprep.mubr.msk.bf16.mxu1 %vm702_vm2, %v1438_v22 }
 0x818   : > { %1878 = vmatprep.subr.bf16.mxu1 %v1441_v49 }
 0x81b   : > { %1879 = vmatpush3.bf16.msra.mxu1 %v1441_v49 }
 0x81c   : > { %1884 = vmatprep.subr.bf16.mxu1 %v1951_v38 }
 0x81e   : > { %1881 = vmatmul.mubr.msk.bf16.vlgmr.msra.gmra.mxu1 %vm702_vm2, %v1439_v50 }
 0x81f   : > { %1885 = vmatpush3.bf16.msra.mxu1 %v1951_v38 }
 0x820   : > { %1886 = vmatprep.subr.bf16.mxu1 %v1952_v31 }
 0x823   : > { %1887 = vmatpush3.bf16.msra.mxu1 %v1952_v31 }
 0x872   : > { %v1437_v45 = vpop.xlane.xlu1 %1436 }
 0x873   : > { %2003 = vrcp.f32 %v1437_v45 }
 0x874   : > { %2005 = vrcp.f32 %v1434_v51 }
 0x880   : > { %v2004_v0 = vpop.eup %2003 }
 0x881   : > { %v2006_v1 = vpop.eup %2005 }
 0x8d6   : > { %v1866_v52 = vpop.f32.mrf.mxu1 }
 0x8d7   : > { %v1342_v53 = vadd.f32 %v1866_v52, %v2319_v36 }
 0x8d8   : > { %v1326_v54 = vpop.f32.mrf.mxu1 }
 0x8d9   : > { %v1340_v55 = vadd.f32 %v1326_v54, %v2322_v42  ;;  %v1715_v42 = vld [vmem:[%s2391_s6] ss:$0 sm:$0xff] }
 0x8da   : > { %v1867_v56 = vpop.f32.mrf.mxu1 }
 0x8dc   : > { %v1329_v58 = vpop.f32.mrf.mxu1 }
 0x8dd   : > { %v1341_v59 = vadd.f32 %v1329_v58, %v1097_v57 }
 0x8de   : > { %v1882_v60 = vpop.f32.mrf.mxu1 }
 0x8df   : > { %v1507_v2 = vmul.f32 %v2004_v0, %v1882_v60 }
 0x8e0   : > { %v1488_v61 = vpop.f32.mrf.mxu1 }
 0x8e1   : > { %v1503_v4 = vmul.f32 %v2002_v62, %v1488_v61  ;;  %v1509_v6 = vpack.c.bf16 %v1507_v2, %v1507_v2 }
 0x8e2   : > { %v1883_v63 = vpop.f32.mrf.mxu1 }
 0x8e4   : > { %v1491_v3 = vpop.f32.mrf.mxu1 }
 0x8e5   : > { %v1505_v36 = vmul.f32 %v2006_v1, %v1491_v3 }
 0x8e7   : > { %v1508_v5 = vpack.c.bf16 %v1505_v36, %v1503_v4 }
 0x8e9   : > { %1888 = vmatprep.mubr.msk.bf16.mxu1 %vm641_vm1, %v1508_v5 }
 0x8ea   : > { %1889 = vmatmul.mubr.msk.bf16.vlgmr.msra.gmra.mxu1 %vm641_vm1, %v1509_v6 }
 0x9aa   : > { %v1890_v29 = vpop.f32.mrf.mxu1 }
 0x9ab   : > { %v1578_v7 = vadd.f32 %v1890_v29, %v1342_v53 }
 0x9ac   : > { %v1562_v8 = vpop.f32.mrf.mxu1 }
 0x9ad   : > { %v1588_v11 = vadd.f32 %v1715_v42, %v1578_v7  ;;  %v1576_v13 = vadd.f32 %v1562_v8, %v1340_v55 }
 0x9ae   : > { %v1891_v15 = vpop.f32.mrf.mxu1 }
 0x9af   : > { %v1591_v18 = vadd.f32 %v2007_v16, %v1588_v11  ;;  %v1586_v19 = vadd.f32 %v1715_v42, %v1576_v13 }
 0x9b0   : > { %v1565_v20 = vpop.f32.mrf.mxu1 }
 0x9b1   : > { %1594 = vst [vmem:[%s278_s8 + $0x10] sm:$0x1] %v1591_v18  ;;  %v1589_v22 = vadd.f32 %v2008_v21, %v1586_v19  ;;  %v1577_v23 = vadd.f32 %v1565_v20, %v1341_v59 }
 0x9b3   : > { %1592 = vst [vmem:[%s278_s8] sm:$0xff] %v1589_v22  ;;  %v1587_v17 = vadd.f32 %v1715_v42, %v1577_v23 }
 0x9b5   : > { %v1590_v32 = vadd.f32 %v2009_v24, %v1587_v17 }
 0x9b7   : > { %1593 = vst [vmem:[%s278_s8 + $0x8] sm:$0xff] %v1590_v32 }
 0x9b8 PF: > { %s17_s24 = sadd.s32 1, %s2016_s24  }
 0x9b9   : > { %p14_p4 = scmp.ge.s32.totalorder %s17_s24, 18  }
 0x9bb   :  { %16 = sbr.rel (!%p14_p4) target bundleno = 1 (0x1), region = 78 }

// kernel: transformer_forward.15
= control target key start
LH: loop header
LB: loop body
LE: loop exit
PB: predicated region body
PF: predicated region fallthrough
CT: control target
= control target key end

     0   :  { %s6013_s0 = inlined_call_operand.vmem [shape: f32[272,128], index: 0, kind: input, shape index: {}]   ;;  %s6014_s3 = inlined_call_operand.vmem [shape: bf16[128,512], index: 3, kind: input, shape index: {}]   ;;  %s6015_s1 = inlined_call_operand.vmem [shape: f32[1,128], index: 1, kind: input, shape index: {}]   ;;  %s6016_s2 = inlined_call_operand.vmem [shape: f32[1,128], index: 2, kind: input, shape index: {}]   ;;  %s6017_s5 = inlined_call_operand.vmem [shape: bf16[512,128], index: 5, kind: input, shape index: {}]   ;;  %s6018_s4 = inlined_call_operand.vmem [shape: f32[1,512], index: 4, kind: input, shape index: {}]   ;;  %s6019_s6 = inlined_call_operand.vmem [shape: f32[1,128], index: 6, kind: input, shape index: {}]   ;;  %s6020_s7 = inlined_call_operand.vmem [shape: f32[272,128], index: 7, kind: output, shape index: {}]  }
   0x1   :  { %v27_v0 = vld [vmem:[%s6013_s0] sm:$0xff]  ;;  %v29_v1 = vld [vmem:[%s6013_s0 + $0x10] sm:$0xff]  ;;  %v28_v2 = vld [vmem:[%s6013_s0 + $0x8] sm:$0xff] }
   0x2   :  { %61 = vadd.xlane.f32.xlu0 %v27_v0  ;;  %65 = vadd.xlane.f32.xlu1 %v29_v1  ;;  %v30_v3 = vld [vmem:[%s6013_s0 + $0x18] sm:$0xff]  ;;  %v3972_v4 = vld [vmem:[%s6013_s0 + $0x20] sm:$0xff]  ;;  %v3977_v5 = vld [vmem:[%s6013_s0 + $0x28] sm:$0xff] }
   0x3   :  { %v3984_v6 = vld [vmem:[%s6013_s0 + $0x30] sm:$0xff]  ;;  %v3989_v7 = vld [vmem:[%s6013_s0 + $0x38] sm:$0xff]  ;;  %v3996_v8 = vld [vmem:[%s6013_s0 + $0x40] sm:$0xff] }
   0x4   :  { %v4001_v9 = vld [vmem:[%s6013_s0 + $0x48] sm:$0xff]  ;;  %v4008_v10 = vld [vmem:[%s6013_s0 + $0x50] sm:$0xff]  ;;  %v4013_v11 = vld [vmem:[%s6013_s0 + $0x58] sm:$0xff] }
   0x5   :  { %v4020_v12 = vld [vmem:[%s6013_s0 + $0x60] sm:$0xff]  ;;  %v4025_v13 = vld [vmem:[%s6013_s0 + $0x68] sm:$0xff]  ;;  %v4032_v14 = vld [vmem:[%s6013_s0 + $0x70] sm:$0xff] }
   0x6   :  { %63 = vadd.xlane.f32.xlu0 %v28_v2  ;;  %67 = vadd.xlane.f32.xlu1 %v30_v3  ;;  %v4037_v15 = vld [vmem:[%s6013_s0 + $0x78] sm:$0xff]  ;;  %v4044_v16 = vld [vmem:[%s6013_s0 + $0x80] sm:$0xff]  ;;  %v4049_v17 = vld [vmem:[%s6013_s0 + $0x88] sm:$0xff] }
   0x7   :  { %v4056_v18 = vld [vmem:[%s6013_s0 + $0x90] sm:$0xff]  ;;  %v4061_v19 = vld [vmem:[%s6013_s0 + $0x98] sm:$0xff]  ;;  %v4088_v36 = vld [vmem:[%s6013_s0 + $0xa0] sm:$0xff] }
   0x8   :  { %v3188_v20 = vld [vmem:[%s6014_s3 + $0xe4] ss:$16 sps:$4 sm:$0xff]   ;;  %v3190_v21 = vld [vmem:[%s6014_s3 + $0xec] ss:$16 sps:$4 sm:$0xff]   ;;  %v3192_v22 = vld [vmem:[%s6014_s3 + $0xe0] ss:$16 sps:$4 sm:$0xff]  }
   0x9   :  { %749 = vmatprep.subr.bf16.mxu0 %v3188_v20  ;;  %v3193_v23 = vld [vmem:[%s6014_s3 + $0xe8] ss:$16 sps:$4 sm:$0xff]   ;;  %952 = vmatprep.subr.bf16.mxu1 %v3190_v21  ;;  %v4111_v47 = vld [vmem:[%s6013_s0 + $0xb0] sm:$0xff]  ;;  %v3196_v50 = vld [vmem:[%s6014_s3 + $0xcc] ss:$16 sps:$4 sm:$0xff]  }
   0xa   :  { %69 = vadd.xlane.f32.xlu0 %v3972_v4  ;;  %71 = vadd.xlane.f32.xlu1 %v3977_v5  ;;  %v4100_v42 = vld [vmem:[%s6013_s0 + $0xa8] sm:$0xff]  ;;  %v3194_v49 = vld [vmem:[%s6014_s3 + $0xc4] ss:$16 sps:$4 sm:$0xff]   ;;  %v3198_v51 = vld [vmem:[%s6014_s3 + $0xc0] ss:$16 sps:$4 sm:$0xff]  }
   0xb   :  { %750 = vmatpush1.bf16.msra.mxu0 %v3192_v22  ;;  %953 = vmatpush1.bf16.msra.mxu1 %v3193_v23  ;;  %v3199_v52 = vld [vmem:[%s6014_s3 + $0xc8] ss:$16 sps:$4 sm:$0xff]   ;;  %v3200_v58 = vld [vmem:[%s6014_s3 + $0xa4] ss:$16 sps:$4 sm:$0xff]   ;;  %v3202_v59 = vld [vmem:[%s6014_s3 + $0xac] ss:$16 sps:$4 sm:$0xff]  }
   0xc   :  { %v4134_v56 = vld [vmem:[%s6013_s0 + $0xb8] sm:$0xff]  ;;  %751 = vmatprep.subr.bf16.mxu0 %v3194_v49  ;;  %954 = vmatprep.subr.bf16.mxu1 %v3196_v50  ;;  %v3204_v60 = vld [vmem:[%s6014_s3 + $0xa0] ss:$16 sps:$4 sm:$0xff]   ;;  %v4180_v23 = vld [vmem:[%s6013_s0 + $0xc8] sm:$0xff] }
   0xd   :  { %v3205_v61 = vld [vmem:[%s6014_s3 + $0xa8] ss:$16 sps:$4 sm:$0xff]   ;;  %v3224_v49 = vld [vmem:[%s6014_s3 + $0x24] ss:$16 sps:$4 sm:$0xff]   ;;  %v3228_v50 = vld [vmem:[%s6014_s3 + $0x20] ss:$16 sps:$4 sm:$0xff]  }
   0xe   :  { %73 = vadd.xlane.f32.xlu0 %v3984_v6  ;;  %75 = vadd.xlane.f32.xlu1 %v3989_v7 }
   0xf   :  { %752 = vmatpush1.bf16.msra.mxu0 %v3198_v51  ;;  %955 = vmatpush1.bf16.msra.mxu1 %v3199_v52  ;;  %v3229_v51 = vld [vmem:[%s6014_s3 + $0x28] ss:$16 sps:$4 sm:$0xff]  }
  0x10   :  { %753 = vmatprep.subr.bf16.mxu0 %v3200_v58  ;;  %956 = vmatprep.subr.bf16.mxu1 %v3202_v59  ;;  %v3230_v59 = vld [vmem:[%s6014_s3 + $0x4] ss:$16 sps:$4 sm:$0xff]  }
  0x12   :  { %77 = vadd.xlane.f32.xlu0 %v3996_v8  ;;  %79 = vadd.xlane.f32.xlu1 %v4001_v9 }
  0x13   :  { %754 = vmatpush1.bf16.msra.mxu0 %v3204_v60  ;;  %957 = vmatpush1.bf16.msra.mxu1 %v3205_v61  ;;  %v3234_v60 = vld [vmem:[%s6014_s3] ss:$16 sps:$4 sm:$0xff]   ;;  %v3235_v61 = vld [vmem:[%s6014_s3 + $0x8] ss:$16 sps:$4 sm:$0xff]  }
  0x16   :  { %81 = vadd.xlane.f32.xlu0 %v4008_v10  ;;  %83 = vadd.xlane.f32.xlu1 %v4013_v11 }
  0x1a   :  { %85 = vadd.xlane.f32.xlu0 %v4020_v12  ;;  %87 = vadd.xlane.f32.xlu1 %v4025_v13 }
  0x1e   :  { %89 = vadd.xlane.f32.xlu0 %v4032_v14  ;;  %91 = vadd.xlane.f32.xlu1 %v4037_v15 }
  0x22   :  { %93 = vadd.xlane.f32.xlu0 %v4044_v16  ;;  %95 = vadd.xlane.f32.xlu1 %v4049_v17 }
  0x26   :  { %97 = vadd.xlane.f32.xlu0 %v4056_v18  ;;  %99 = vadd.xlane.f32.xlu1 %v4061_v19 }
  0x8b   :  { %v62_v24 = vpop.xlane.xlu0 %61  ;;  %v66_v25 = vpop.xlane.xlu1 %65 }
  0x8c   :  { %v130_v26 = vmul.f32 0.0078125, %v62_v24  ;;  %v132_v28 = vmul.f32 0.0078125, %v66_v25  ;;  %v3212_v25 = vld [vmem:[%s6014_s3 + $0x64] ss:$16 sps:$4 sm:$0xff]  }
  0x8e   :  { %v4077_v27 = vsub.f32 %v27_v0, %v130_v26  ;;  %v4083_v34 = vsub.f32 %v29_v1, %v132_v28  ;;  %v4157_v1 = vld [vmem:[%s6013_s0 + $0xc0] sm:$0xff]  ;;  %v3217_v28 = vld [vmem:[%s6014_s3 + $0x68] ss:$16 sps:$4 sm:$0xff]  }
  0x8f   :  { %v64_v29 = vpop.xlane.xlu0 %63  ;;  %v68_v30 = vpop.xlane.xlu1 %67  ;;  %v3216_v26 = vld [vmem:[%s6014_s3 + $0x60] ss:$16 sps:$4 sm:$0xff]  }
  0x90   :  { %v131_v31 = vmul.f32 0.0078125, %v64_v29  ;;  %v198_v32 = vmul.f32 %v4077_v27, %v4077_v27  ;;  %v133_v35 = vmul.f32 0.0078125, %v68_v30  ;;  %v200_v40 = vmul.f32 %v4083_v34, %v4083_v34 }
  0x92   :  { %v4081_v33 = vsub.f32 %v28_v2, %v131_v31  ;;  %232 = vadd.xlane.f32.xlu0 %v198_v32  ;;  %v4093_v39 = vsub.f32 %v30_v3, %v133_v35  ;;  %v3206_v3 = vld [vmem:[%s6014_s3 + $0x84] ss:$16 sps:$4 sm:$0xff]  }
  0x93   :  { %v70_v37 = vpop.xlane.xlu0 %69  ;;  %v72_v43 = vpop.xlane.xlu1 %71  ;;  %755 = vmatprep.subr.bf16.mxu0 %v3206_v3  ;;  %v4203_v32 = vld [vmem:[%s6013_s0 + $0xd0] sm:$0xff]  ;;  %v4272_v3 = vld [vmem:[%s6013_s0 + $0xe8] sm:$0xff] }
  0x94   :  { %v199_v38 = vmul.f32 %v4081_v33, %v4081_v33  ;;  %v134_v41 = vmul.f32 0.0078125, %v70_v37  ;;  %v201_v45 = vmul.f32 %v4093_v39, %v4093_v39  ;;  %v135_v46 = vmul.f32 0.0078125, %v72_v43  ;;  %v3218_v37 = vld [vmem:[%s6014_s3 + $0x44] ss:$16 sps:$4 sm:$0xff]  }
  0x96   :  { %101 = vadd.xlane.f32.xlu0 %v4088_v36  ;;  %234 = vadd.xlane.f32.xlu1 %v199_v38  ;;  %v4104_v44 = vsub.f32 %v3972_v4, %v134_v41  ;;  %v4127_v53 = vsub.f32 %v3977_v5, %v135_v46  ;;  %v3208_v4 = vld [vmem:[%s6014_s3 + $0x8c] ss:$16 sps:$4 sm:$0xff]   ;;  %v3210_v5 = vld [vmem:[%s6014_s3 + $0x80] ss:$16 sps:$4 sm:$0xff]  }
  0x97   :  { %v74_v48 = vpop.xlane.xlu0 %73  ;;  %v76_v57 = vpop.xlane.xlu1 %75  ;;  %958 = vmatprep.subr.bf16.mxu1 %v3208_v4  ;;  %756 = vmatpush1.bf16.msra.mxu0 %v3210_v5  ;;  %v3222_v38 = vld [vmem:[%s6014_s3 + $0x40] ss:$16 sps:$4 sm:$0xff]   ;;  %v4226_v46 = vld [vmem:[%s6013_s0 + $0xd8] sm:$0xff] }
  0x98   :  { %v202_v54 = vmul.f32 %v4104_v44, %v4104_v44  ;;  %v136_v55 = vmul.f32 0.0078125, %v74_v48  ;;  %v203_v63 = vmul.f32 %v4127_v53, %v4127_v53  ;;  %v137_v0 = vmul.f32 0.0078125, %v76_v57  ;;  %757 = vmatprep.subr.bf16.mxu0 %v3212_v25  ;;  %v4249_v57 = vld [vmem:[%s6013_s0 + $0xe0] sm:$0xff] }
  0x9a   :  { %236 = vadd.xlane.f32.xlu0 %v200_v40  ;;  %103 = vadd.xlane.f32.xlu1 %v4100_v42  ;;  %v4150_v62 = vsub.f32 %v3984_v6, %v136_v55  ;;  %v3211_v6 = vld [vmem:[%s6014_s3 + $0x88] ss:$16 sps:$4 sm:$0xff]   ;;  %v4173_v20 = vsub.f32 %v3989_v7, %v137_v0  ;;  %v3214_v7 = vld [vmem:[%s6014_s3 + $0x6c] ss:$16 sps:$4 sm:$0xff]  }
  0x9b   :  { %v78_v2 = vpop.xlane.xlu0 %77  ;;  %v80_v24 = vpop.xlane.xlu1 %79  ;;  %959 = vmatpush1.bf16.msra.mxu1 %v3211_v6  ;;  %758 = vmatpush1.bf16.msra.mxu0 %v3216_v26  ;;  %v3223_v40 = vld [vmem:[%s6014_s3 + $0x48] ss:$16 sps:$4 sm:$0xff]   ;;  %v3916_v6 = vmov 0  }
  0x9c   :  { %v204_v21 = vmul.f32 %v4150_v62, %v4150_v62  ;;  %v138_v22 = vmul.f32 0.0078125, %v78_v2  ;;  %v205_v30 = vmul.f32 %v4173_v20, %v4173_v20  ;;  %v139_v31 = vmul.f32 0.0078125, %v80_v24  ;;  %960 = vmatprep.subr.bf16.mxu1 %v3214_v7  ;;  %759 = vmatprep.subr.bf16.mxu0 %v3218_v37  ;;  %v4285_v24 = vld [vmem:[%s6013_s0 + $0xf0] sm:$0xff] }
  0x9d   :  { %781 = vmatprep.mubr.bf16.mxu0 %v3916_v6  ;;  %984 = vmatprep.mubr.bf16.mxu1 %v3916_v6 }
  0x9e   :  { %105 = vadd.xlane.f32.xlu0 %v4111_v47  ;;  %238 = vadd.xlane.f32.xlu1 %v201_v45  ;;  %v4196_v29 = vsub.f32 %v3996_v8, %v138_v22  ;;  %v3220_v8 = vld [vmem:[%s6014_s3 + $0x4c] ss:$16 sps:$4 sm:$0xff]   ;;  %v4219_v41 = vsub.f32 %v4001_v9, %v139_v31 }
  0x9f   :  { %v82_v35 = vpop.xlane.xlu0 %81  ;;  %961 = vmatpush1.bf16.msra.mxu1 %v3217_v28  ;;  %v84_v48 = vpop.xlane.xlu1 %83  ;;  %760 = vmatpush1.bf16.msra.mxu0 %v3222_v38  ;;  %v3226_v9 = vld [vmem:[%s6014_s3 + $0x2c] ss:$16 sps:$4 sm:$0xff]   ;;  %v4309_v38 = vld [vmem:[%s6013_s0 + $0x100] sm:$0xff] }
  0xa0   :  { %v206_v43 = vmul.f32 %v4196_v29, %v4196_v29  ;;  %v140_v45 = vmul.f32 0.0078125, %v82_v35  ;;  %962 = vmatprep.subr.bf16.mxu1 %v3220_v8  ;;  %v141_v55 = vmul.f32 0.0078125, %v84_v48  ;;  %761 = vmatprep.subr.bf16.mxu0 %v3224_v49 }
  0xa2   :  { %107 = vadd.xlane.f32.xlu1 %v4134_v56  ;;  %240 = vadd.xlane.f32.xlu0 %v202_v54  ;;  %v4242_v52 = vsub.f32 %v4008_v10, %v140_v45  ;;  %v207_v54 = vmul.f32 %v4219_v41, %v4219_v41  ;;  %v3232_v10 = vld [vmem:[%s6014_s3 + $0xc] ss:$16 sps:$4 sm:$0xff]  }
  0xa3   :  { %963 = vmatpush1.bf16.msra.mxu1 %v3223_v40  ;;  %v86_v58 = vpop.xlane.xlu0 %85  ;;  %762 = vmatpush1.bf16.msra.mxu0 %v3228_v50  ;;  %v88_v4 = vpop.xlane.xlu1 %87 }
  0xa4   :  { %964 = vmatprep.subr.bf16.mxu1 %v3226_v9  ;;  %v208_v0 = vmul.f32 %v4242_v52, %v4242_v52  ;;  %v142_v2 = vmul.f32 0.0078125, %v86_v58  ;;  %763 = vmatprep.subr.bf16.mxu0 %v3230_v59  ;;  %v143_v22 = vmul.f32 0.0078125, %v88_v4  ;;  %v4323_v9 = vld [vmem:[%s6013_s0 + $0x108] sm:$0xff] }
  0xa6   :  { %242 = vadd.xlane.f32.xlu1 %v203_v63  ;;  %109 = vadd.xlane.f32.xlu0 %v4157_v1  ;;  %v4265_v63 = vsub.f32 %v4013_v11, %v141_v55  ;;  %v4278_v11 = vsub.f32 %v4020_v12, %v142_v2  ;;  %v4291_v12 = vsub.f32 %v4025_v13, %v143_v22 }
  0xa7   :  { %965 = vmatpush1.bf16.msra.mxu1 %v3229_v51  ;;  %v90_v5 = vpop.xlane.xlu0 %89  ;;  %764 = vmatpush1.bf16.msra.mxu0 %v3234_v60  ;;  %v92_v25 = vpop.xlane.xlu1 %91 }
  0xa8   :  { %966 = vmatprep.subr.bf16.mxu1 %v3232_v10  ;;  %2574 = vmatprep.subr.bf16.mxu0 %v3916_v6  ;;  %v210_v26 = vmul.f32 %v4278_v11, %v4278_v11  ;;  %v144_v28 = vmul.f32 0.0078125, %v90_v5  ;;  %v145_v31 = vmul.f32 0.0078125, %v92_v25  ;;  %v211_v13 = vmul.f32 %v4291_v12, %v4291_v12 }
  0xaa   :  { %111 = vadd.xlane.f32.xlu1 %v4180_v23  ;;  %244 = vadd.xlane.f32.xlu0 %v204_v21  ;;  %v209_v21 = vmul.f32 %v4265_v63, %v4265_v63  ;;  %v4302_v37 = vsub.f32 %v4032_v14, %v144_v28 }
  0xab   :  { %967 = vmatpush1.bf16.msra.mxu1 %v3235_v61  ;;  %v94_v7 = vpop.xlane.xlu0 %93  ;;  %v96_v35 = vpop.xlane.xlu1 %95 }
  0xac   :  { %2743 = vmatprep.subr.bf16.mxu1 %v3916_v6  ;;  %v146_v8 = vmul.f32 0.0078125, %v94_v7  ;;  %v212_v14 = vmul.f32 %v4302_v37, %v4302_v37  ;;  %v147_v48 = vmul.f32 0.0078125, %v96_v35 }
  0xae   :  { %246 = vadd.xlane.f32.xlu1 %v205_v30  ;;  %113 = vadd.xlane.f32.xlu0 %v4203_v32  ;;  %v4298_v30 = vld [vmem:[%s6013_s0 + $0xf8] sm:$0xff]  ;;  %v4316_v45 = vsub.f32 %v4044_v16, %v146_v8  ;;  %v4329_v16 = vsub.f32 %v4049_v17, %v147_v48 }
  0xaf   :  { %v98_v40 = vpop.xlane.xlu0 %97  ;;  %v100_v50 = vpop.xlane.xlu1 %99 }
  0xb0   :  { %v148_v49 = vmul.f32 0.0078125, %v98_v40  ;;  %v149_v55 = vmul.f32 0.0078125, %v100_v50  ;;  %v215_v59 = vmul.f32 %v4329_v16, %v4329_v16 }
  0xb2   :  { %115 = vadd.xlane.f32.xlu1 %v4226_v46  ;;  %248 = vadd.xlane.f32.xlu0 %v206_v43  ;;  %v4312_v43 = vsub.f32 %v4037_v15, %v145_v31  ;;  %v4332_v51 = vsub.f32 %v4056_v18, %v148_v49  ;;  %v4337_v58 = vsub.f32 %v4061_v19, %v149_v55 }
  0xb4   :  { %v213_v15 = vmul.f32 %v4312_v43, %v4312_v43  ;;  %v216_v10 = vmul.f32 %v4332_v51, %v4332_v51  ;;  %v217_v17 = vmul.f32 %v4337_v58, %v4337_v58 }
  0xb6   :  { %250 = vadd.xlane.f32.xlu1 %v207_v54  ;;  %117 = vadd.xlane.f32.xlu0 %v4249_v57  ;;  %v214_v54 = vmul.f32 %v4316_v45, %v4316_v45 }
  0xba   :  { %119 = vadd.xlane.f32.xlu1 %v4272_v3  ;;  %252 = vadd.xlane.f32.xlu0 %v208_v0 }
  0xbe   :  { %254 = vadd.xlane.f32.xlu1 %v209_v21  ;;  %121 = vadd.xlane.f32.xlu0 %v4285_v24 }
  0xc2   :  { %123 = vadd.xlane.f32.xlu1 %v4298_v30  ;;  %256 = vadd.xlane.f32.xlu0 %v210_v26 }
  0xc6   :  { %258 = vadd.xlane.f32.xlu1 %v211_v13  ;;  %125 = vadd.xlane.f32.xlu0 %v4309_v38 }
  0xca   :  { %127 = vadd.xlane.f32.xlu1 %v4323_v9  ;;  %260 = vadd.xlane.f32.xlu0 %v212_v14 }
  0xce   :  { %262 = vadd.xlane.f32.xlu1 %v213_v15  ;;  %264 = vadd.xlane.f32.xlu0 %v214_v54 }
  0xd2   :  { %266 = vadd.xlane.f32.xlu1 %v215_v59  ;;  %268 = vadd.xlane.f32.xlu0 %v216_v10 }
  0xd6   :  { %270 = vadd.xlane.f32.xlu1 %v217_v17 }
 0x11b   :  { %v233_v18 = vpop.xlane.xlu0 %232 }
 0x11c   :  { %v300_v60 = vmul.f32 0.0078125, %v233_v18 }
 0x11e   :  { %v334_v61 = vadd.f32 1e-05, %v300_v60 }
 0x11f   :  { %v235_v0 = vpop.xlane.xlu1 %234  ;;  %v102_v2 = vpop.xlane.xlu0 %101 }
 0x120   :  { %3268 = vrsqrt.f32 %v334_v61  ;;  %v301_v19 = vmul.f32 0.0078125, %v235_v0  ;;  %v150_v4 = vmul.f32 0.0078125, %v102_v2 }
 0x122   :  { %v335_v5 = vadd.f32 1e-05, %v301_v19  ;;  %v4346_v21 = vsub.f32 %v4088_v36, %v150_v4  ;;  %v4369_v19 = vld [vmem:[%s6015_s1] ss:$0 sm:$0xff] }
 0x123   :  { %v104_v22 = vpop.xlane.xlu1 %103  ;;  %v237_v25 = vpop.xlane.xlu0 %236 }
 0x124   :  { %3270 = vrsqrt.f32 %v335_v5  ;;  %v151_v7 = vmul.f32 0.0078125, %v104_v22  ;;  %v302_v26 = vmul.f32 0.0078125, %v237_v25  ;;  %v218_v28 = vmul.f32 %v4346_v21, %v4346_v21 }
 0x126   :  { %v4351_v31 = vsub.f32 %v4100_v42, %v151_v7  ;;  %v336_v35 = vadd.f32 1e-05, %v302_v26  ;;  %272 = vadd.xlane.f32.xlu0 %v218_v28 }
 0x127   :  { %v239_v13 = vpop.xlane.xlu1 %238  ;;  %v106_v8 = vpop.xlane.xlu0 %105 }
 0x128   :  { %3272 = vrsqrt.f32 %v336_v35  ;;  %v303_v40 = vmul.f32 0.0078125, %v239_v13  ;;  %v152_v14 = vmul.f32 0.0078125, %v106_v8  ;;  %v219_v36 = vmul.f32 %v4351_v31, %v4351_v31  ;;  %v4381_v13 = vld [vmem:[%s6016_s2] ss:$0 sm:$0xff] }
 0x12a   :  { %v337_v48 = vadd.f32 1e-05, %v303_v40  ;;  %v4356_v49 = vsub.f32 %v4111_v47, %v152_v14  ;;  %274 = vadd.xlane.f32.xlu1 %v219_v36 }
 0x12b   :  { %v108_v50 = vpop.xlane.xlu1 %107  ;;  %v241_v15 = vpop.xlane.xlu0 %240 }
 0x12c   :  { %3274 = vrsqrt.f32 %v337_v48  ;;  %v153_v42 = vmul.f32 0.0078125, %v108_v50  ;;  %v304_v54 = vmul.f32 0.0078125, %v241_v15  ;;  %v220_v55 = vmul.f32 %v4356_v49, %v4356_v49 }
 0x12d   :  { %v3269_v59 = vpop.eup %3268 }
 0x12e   :  { %v4361_v10 = vsub.f32 %v4134_v56, %v153_v42  ;;  %v338_v17 = vadd.f32 1e-05, %v304_v54  ;;  %276 = vadd.xlane.f32.xlu0 %v220_v55  ;;  %v402_v47 = vmul.f32 %v3269_v59, %v4077_v27 }
 0x12f   :  { %v243_v18 = vpop.xlane.xlu1 %242  ;;  %v110_v60 = vpop.xlane.xlu0 %109 }
 0x130   :  { %3276 = vrsqrt.f32 %v338_v17  ;;  %v305_v61 = vmul.f32 0.0078125, %v243_v18  ;;  %v154_v0 = vmul.f32 0.0078125, %v110_v60  ;;  %v221_v2 = vmul.f32 %v4361_v10, %v4361_v10 }
 0x131   :  { %v3271_v4 = vpop.eup %3270  ;;  %v443_v7 = vmul.f32 %v4369_v19, %v402_v47 }
 0x132   :  { %v339_v56 = vadd.f32 1e-05, %v305_v61  ;;  %v4372_v5 = vsub.f32 %v4157_v1, %v154_v0  ;;  %278 = vadd.xlane.f32.xlu1 %v221_v2  ;;  %v403_v22 = vmul.f32 %v3271_v4, %v4081_v33 }
 0x133   :  { %v112_v27 = vpop.xlane.xlu1 %111  ;;  %v245_v25 = vpop.xlane.xlu0 %244  ;;  %v484_v48 = vadd.f32 %v4381_v13, %v443_v7 }
 0x134   :  { %3278 = vrsqrt.f32 %v339_v56  ;;  %v155_v26 = vmul.f32 0.0078125, %v112_v27  ;;  %v306_v28 = vmul.f32 0.0078125, %v245_v25  ;;  %v222_v35 = vmul.f32 %v4372_v5, %v4372_v5 }
 0x135   :  { %v3273_v1 = vpop.eup %3272  ;;  %v444_v8 = vmul.f32 %v4369_v19, %v403_v22 }
 0x136   :  { %v4385_v33 = vsub.f32 %v4180_v23, %v155_v26  ;;  %v340_v40 = vadd.f32 1e-05, %v306_v28  ;;  %280 = vadd.xlane.f32.xlu0 %v222_v35  ;;  %v404_v15 = vmul.f32 %v3273_v1, %v4083_v34 }
 0x137   :  { %v247_v14 = vpop.xlane.xlu1 %246  ;;  %v114_v36 = vpop.xlane.xlu0 %113  ;;  %v485_v50 = vadd.f32 %v4381_v13, %v444_v8 }
 0x138   :  { %3280 = vrsqrt.f32 %v340_v40  ;;  %v307_v42 = vmul.f32 0.0078125, %v247_v14  ;;  %v156_v54 = vmul.f32 0.0078125, %v114_v36  ;;  %v223_v55 = vmul.f32 %v4385_v33, %v4385_v33 }
 0x139   :  { %v3275_v59 = vpop.eup %3274  ;;  %v518_v17 = vpack.c.bf16 %v485_v50, %v484_v48  ;;  %v445_v34 = vmul.f32 %v4369_v19, %v404_v15 }
 0x13a   :  { %v341_v23 = vadd.f32 1e-05, %v307_v42  ;;  %v4393_v18 = vsub.f32 %v4203_v32, %v156_v54  ;;  %282 = vadd.xlane.f32.xlu1 %v223_v55  ;;  %v405_v60 = vmul.f32 %v3275_v59, %v4093_v39 }
 0x13b   :  { %782 = vmatmul.mubr.bf16.vlgmr.msra.gmra.mxu0 %v518_v17  ;;  %985 = vmatmul.mubr.bf16.vlgmr.msra.gmra.mxu1 %v518_v17  ;;  %v116_v47 = vpop.xlane.xlu1 %115  ;;  %v249_v61 = vpop.xlane.xlu0 %248  ;;  %v486_v7 = vadd.f32 %v4381_v13, %v445_v34 }
 0x13c   :  { %3282 = vrsqrt.f32 %v341_v23  ;;  %v157_v0 = vmul.f32 0.0078125, %v116_v47  ;;  %v308_v2 = vmul.f32 0.0078125, %v249_v61  ;;  %v224_v4 = vmul.f32 %v4393_v18, %v4393_v18  ;;  %791 = vmatprep.mubr.bf16.mxu0 %v3916_v6  ;;  %994 = vmatprep.mubr.bf16.mxu1 %v3916_v6 }
 0x13d   :  { %v3277_v32 = vpop.eup %3276  ;;  %v446_v56 = vmul.f32 %v4369_v19, %v405_v60 }
 0x13e   :  { %v4403_v39 = vsub.f32 %v4226_v46, %v157_v0  ;;  %v342_v22 = vadd.f32 1e-05, %v308_v2  ;;  %284 = vadd.xlane.f32.xlu0 %v224_v4  ;;  %v406_v28 = vmul.f32 %v3277_v32, %v4104_v44 }
 0x13f   :  { %v251_v27 = vpop.xlane.xlu1 %250  ;;  %v118_v25 = vpop.xlane.xlu0 %117  ;;  %v487_v26 = vadd.f32 %v4381_v13, %v446_v56 }
 0x140   :  { %3284 = vrsqrt.f32 %v342_v22  ;;  %v309_v35 = vmul.f32 0.0078125, %v251_v27  ;;  %v158_v1 = vmul.f32 0.0078125, %v118_v25  ;;  %v225_v8 = vmul.f32 %v4403_v39, %v4403_v39 }
 0x141   :  { %v3279_v40 = vpop.eup %3278  ;;  %v519_v14 = vpack.c.bf16 %v487_v26, %v486_v7  ;;  %v447_v44 = vmul.f32 %v4369_v19, %v406_v28 }
 0x142   :  { %v343_v46 = vadd.f32 1e-05, %v309_v35  ;;  %v4411_v36 = vsub.f32 %v4249_v57, %v158_v1  ;;  %286 = vadd.xlane.f32.xlu1 %v225_v8  ;;  %v407_v48 = vmul.f32 %v3279_v40, %v4127_v53 }
 0x143   :  { %792 = vmatmul.mubr.bf16.gmra.mxu0 %v519_v14  ;;  %995 = vmatmul.mubr.bf16.gmra.mxu1 %v519_v14  ;;  %v120_v50 = vpop.xlane.xlu1 %119  ;;  %v253_v15 = vpop.xlane.xlu0 %252  ;;  %v488_v47 = vadd.f32 %v4381_v13, %v447_v44 }
 0x144   :  { %3286 = vrsqrt.f32 %v343_v46  ;;  %v159_v42 = vmul.f32 0.0078125, %v120_v50  ;;  %v310_v54 = vmul.f32 0.0078125, %v253_v15  ;;  %v226_v55 = vmul.f32 %v4411_v36, %v4411_v36  ;;  %801 = vmatprep.mubr.bf16.mxu0 %v3916_v6  ;;  %1004 = vmatprep.mubr.bf16.mxu1 %v3916_v6 }
 0x145   :  { %v3281_v57 = vpop.eup %3280  ;;  %v448_v59 = vmul.f32 %v4369_v19, %v407_v48 }
 0x146   :  { %v4421_v53 = vsub.f32 %v4272_v3, %v159_v42  ;;  %v344_v17 = vadd.f32 1e-05, %v310_v54  ;;  %288 = vadd.xlane.f32.xlu0 %v226_v55  ;;  %v408_v34 = vmul.f32 %v3281_v57, %v4150_v62 }
 0x147   :  { %v255_v23 = vpop.xlane.xlu1 %254  ;;  %v122_v60 = vpop.xlane.xlu0 %121  ;;  %v489_v61 = vadd.f32 %v4381_v13, %v448_v59 }
 0x148   :  { %3288 = vrsqrt.f32 %v344_v17  ;;  %v311_v0 = vmul.f32 0.0078125, %v255_v23  ;;  %v160_v2 = vmul.f32 0.0078125, %v122_v60  ;;  %v227_v4 = vmul.f32 %v4421_v53, %v4421_v53 }
 0x149   :  { %v3283_v32 = vpop.eup %3282  ;;  %v520_v56 = vpack.c.bf16 %v489_v61, %v488_v47  ;;  %v449_v62 = vmul.f32 %v4369_v19, %v408_v34 }
 0x14a   :  { %v345_v3 = vadd.f32 1e-05, %v311_v0  ;;  %v4429_v22 = vsub.f32 %v4285_v24, %v160_v2  ;;  %290 = vadd.xlane.f32.xlu1 %v227_v4  ;;  %v409_v27 = vmul.f32 %v3283_v32, %v4173_v20 }
 0x14b   :  { %802 = vmatmul.mubr.bf16.gmra.mxu0 %v520_v56  ;;  %1005 = vmatmul.mubr.bf16.gmra.mxu1 %v520_v56  ;;  %v124_v25 = vpop.xlane.xlu1 %123  ;;  %v257_v7 = vpop.xlane.xlu0 %256  ;;  %v490_v46 = vadd.f32 %v4381_v13, %v449_v62 }
 0x14c   :  { %3290 = vrsqrt.f32 %v345_v3  ;;  %v161_v26 = vmul.f32 0.0078125, %v124_v25  ;;  %v312_v28 = vmul.f32 0.0078125, %v257_v7  ;;  %v228_v35 = vmul.f32 %v4429_v22, %v4429_v22  ;;  %811 = vmatprep.mubr.bf16.mxu0 %v3916_v6  ;;  %1014 = vmatprep.mubr.bf16.mxu1 %v3916_v6 }
 0x14d   :  { %v3285_v24 = vpop.eup %3284  ;;  %v450_v1 = vmul.f32 %v4369_v19, %v409_v27 }
 0x14e   :  { %v4439_v20 = vsub.f32 %v4298_v30, %v161_v26  ;;  %v346_v8 = vadd.f32 1e-05, %v312_v28  ;;  %292 = vadd.xlane.f32.xlu0 %v228_v35  ;;  %v410_v50 = vmul.f32 %v3285_v24, %v4196_v29 }
 0x14f   :  { %v259_v40 = vpop.xlane.xlu1 %258  ;;  %v126_v14 = vpop.xlane.xlu0 %125  ;;  %v491_v48 = vadd.f32 %v4381_v13, %v450_v1 }
 0x150   :  { %3292 = vrsqrt.f32 %v346_v8  ;;  %v313_v15 = vmul.f32 0.0078125, %v259_v40  ;;  %v162_v44 = vmul.f32 0.0078125, %v126_v14  ;;  %v229_v42 = vmul.f32 %v4439_v20, %v4439_v20 }
 0x151   :  { %v3287_v54 = vpop.eup %3286  ;;  %v521_v55 = vpack.c.bf16 %v491_v48, %v490_v46  ;;  %v451_v29 = vmul.f32 %v4369_v19, %v410_v50 }
 0x152   :  { %v347_v30 = vadd.f32 1e-05, %v313_v15  ;;  %v4447_v57 = vsub.f32 %v4309_v38, %v162_v44  ;;  %294 = vadd.xlane.f32.xlu1 %v229_v42  ;;  %v411_v59 = vmul.f32 %v3287_v54, %v4219_v41 }
 0x153   :  { %812 = vmatmul.mubr.bf16.gmra.mxu0 %v521_v55  ;;  %1015 = vmatmul.mubr.bf16.gmra.mxu1 %v521_v55  ;;  %v128_v17 = vpop.xlane.xlu1 %127  ;;  %v261_v23 = vpop.xlane.xlu0 %260  ;;  %v492_v56 = vadd.f32 %v4381_v13, %v451_v29 }
 0x154   :  { %3294 = vrsqrt.f32 %v347_v30  ;;  %v163_v60 = vmul.f32 0.0078125, %v128_v17  ;;  %v314_v47 = vmul.f32 0.0078125, %v261_v23  ;;  %v230_v61 = vmul.f32 %v4447_v57, %v4447_v57  ;;  %821 = vmatprep.mubr.bf16.mxu0 %v3916_v6  ;;  %1024 = vmatprep.mubr.bf16.mxu1 %v3916_v6 }
 0x155   :  { %v3289_v38 = vpop.eup %3288  ;;  %v452_v34 = vmul.f32 %v4369_v19, %v411_v59 }
 0x156   :  { %v4457_v41 = vsub.f32 %v4323_v9, %v163_v60  ;;  %v348_v0 = vadd.f32 1e-05, %v314_v47  ;;  %296 = vadd.xlane.f32.xlu0 %v230_v61  ;;  %v412_v2 = vmul.f32 %v3289_v38, %v4242_v52 }
 0x157   :  { %v263_v4 = vpop.xlane.xlu1 %262  ;;  %v265_v32 = vpop.xlane.xlu0 %264  ;;  %v493_v3 = vadd.f32 %v4381_v13, %v452_v34  ;;  %v3236_v34 = vld [vmem:[%s6017_s5 + $0x38] sm:$0xff]  }
 0x158   :  { %3296 = vrsqrt.f32 %v348_v0  ;;  %v315_v27 = vmul.f32 0.0078125, %v263_v4  ;;  %v316_v25 = vmul.f32 0.0078125, %v265_v32  ;;  %v231_v7 = vmul.f32 %v4457_v41, %v4457_v41  ;;  %v3237_v4 = vld [vmem:[%s6017_s5 + $0xb8] sm:$0xff]   ;;  %2575 = vmatpush1.bf16.msra.mxu0 %v3236_v34  ;;  %v3259_v34 = vld [vmem:[%s6017_s5 + $0xe0] sm:$0xff]  }
 0x159   :  { %v3291_v62 = vpop.eup %3290  ;;  %v522_v26 = vpack.c.bf16 %v493_v3, %v492_v56  ;;  %v453_v52 = vmul.f32 %v4369_v19, %v412_v2  ;;  %2744 = vmatpush1.bf16.msra.mxu1 %v3237_v4  ;;  %2576 = vmatprep.subr.bf16.mxu0 %v3916_v6 }
 0x15a   :  { %v349_v9 = vadd.f32 1e-05, %v315_v27  ;;  %298 = vadd.xlane.f32.xlu1 %v231_v7  ;;  %v413_v28 = vmul.f32 %v3291_v62, %v4265_v63  ;;  %v350_v35 = vadd.f32 1e-05, %v316_v25  ;;  %2745 = vmatprep.subr.bf16.mxu1 %v3916_v6  ;;  %v3238_v25 = vld [vmem:[%s6017_s5 + $0x30] sm:$0xff]  }
 0x15b   :  { %822 = vmatmul.mubr.bf16.gmra.mxu0 %v522_v26  ;;  %1025 = vmatmul.mubr.bf16.gmra.mxu1 %v522_v26  ;;  %v267_v24 = vpop.xlane.xlu1 %266  ;;  %v269_v8 = vpop.xlane.xlu0 %268  ;;  %v494_v48 = vadd.f32 %v4381_v13, %v453_v52  ;;  %v3239_v7 = vld [vmem:[%s6017_s5 + $0xb0] sm:$0xff]   ;;  %v3240_v26 = vld [vmem:[%s6017_s5 + $0x28] sm:$0xff]  }
 0x15c   :  { %3298 = vrsqrt.f32 %v349_v9  ;;  %v317_v1 = vmul.f32 0.0078125, %v267_v24  ;;  %831 = vmatprep.mubr.bf16.mxu0 %v3916_v6  ;;  %1034 = vmatprep.mubr.bf16.mxu1 %v3916_v6  ;;  %v454_v40 = vmul.f32 %v4369_v19, %v413_v28  ;;  %v318_v15 = vmul.f32 0.0078125, %v269_v8  ;;  %v3242_v8 = vld [vmem:[%s6017_s5 + $0x20] sm:$0xff]  }
 0x15d   :  { %v3293_v14 = vpop.eup %3292  ;;  %3300 = vrsqrt.f32 %v350_v35  ;;  %2577 = vmatpush1.bf16.msra.mxu0 %v3238_v25  ;;  %2746 = vmatpush1.bf16.msra.mxu1 %v3239_v7  ;;  %v3260_v7 = vld [vmem:[%s6017_s5 + $0x58] sm:$0xff]  }
 0x15e   :  { %v351_v46 = vadd.f32 1e-05, %v317_v1  ;;  %v495_v63 = vadd.f32 %v4381_v13, %v454_v40  ;;  %v414_v50 = vmul.f32 %v3293_v14, %v4278_v11  ;;  %v352_v23 = vadd.f32 1e-05, %v318_v15  ;;  %2578 = vmatprep.subr.bf16.mxu0 %v3916_v6  ;;  %2747 = vmatprep.subr.bf16.mxu1 %v3916_v6  ;;  %v3243_v40 = vld [vmem:[%s6017_s5 + $0xa0] sm:$0xff]  }
 0x15f   :  { %v271_v44 = vpop.xlane.xlu1 %270 }
 0x160   :  { %3302 = vrsqrt.f32 %v351_v46  ;;  %v319_v42 = vmul.f32 0.0078125, %v271_v44  ;;  %v523_v54 = vpack.c.bf16 %v495_v63, %v494_v48  ;;  %v455_v17 = vmul.f32 %v4369_v19, %v414_v50  ;;  %v3244_v50 = vld [vmem:[%s6017_s5 + $0x18] sm:$0xff]  }
 0x161   :  { %v3295_v55 = vpop.eup %3294  ;;  %2579 = vmatpush1.bf16.msra.mxu0 %v3240_v26 }
 0x162   :  { %v353_v30 = vadd.f32 1e-05, %v319_v42  ;;  %v415_v59 = vmul.f32 %v3295_v55, %v4291_v12  ;;  %v496_v60 = vadd.f32 %v4381_v13, %v455_v17  ;;  %2580 = vmatprep.subr.bf16.mxu0 %v3916_v6  ;;  %v3246_v42 = vld [vmem:[%s6017_s5 + $0x10] sm:$0xff]   ;;  %v3250_v17 = vld [vmem:[%s6017_s5] sm:$0xff]  }
 0x163   :  { %832 = vmatmul.mubr.bf16.gmra.mxu0 %v523_v54  ;;  %1035 = vmatmul.mubr.bf16.gmra.mxu1 %v523_v54  ;;  %v3247_v54 = vld [vmem:[%s6017_s5 + $0x90] sm:$0xff]  }
 0x164   :  { %841 = vmatprep.mubr.bf16.mxu0 %v3916_v6  ;;  %1044 = vmatprep.mubr.bf16.mxu1 %v3916_v6  ;;  %v456_v11 = vmul.f32 %v4369_v19, %v415_v59  ;;  %3304 = vrsqrt.f32 %v353_v30  ;;  %v3248_v30 = vld [vmem:[%s6017_s5 + $0x8] sm:$0xff]  }
 0x165   :  { %v3297_v29 = vpop.eup %3296  ;;  %3306 = vrsqrt.f32 %v352_v23  ;;  %2581 = vmatpush1.bf16.msra.mxu0 %v3242_v8  ;;  %v3249_v59 = vld [vmem:[%s6017_s5 + $0x88] sm:$0xff]   ;;  %v3251_v23 = vld [vmem:[%s6017_s5 + $0x80] sm:$0xff]  }
 0x166   :  { %v497_v47 = vadd.f32 %v4381_v13, %v456_v11  ;;  %v416_v61 = vmul.f32 %v3297_v29, %v4302_v37  ;;  %2582 = vmatprep.subr.bf16.mxu0 %v3916_v6  ;;  %v3252_v11 = vld [vmem:[%s6017_s5 + $0x78] sm:$0xff]  }
 0x167   :  { %v3253_v29 = vld [vmem:[%s6017_s5 + $0xf8] sm:$0xff]  }
 0x168   :  { %v524_v12 = vpack.c.bf16 %v497_v47, %v496_v60  ;;  %v457_v2 = vmul.f32 %v4369_v19, %v416_v61  ;;  %v3254_v60 = vld [vmem:[%s6017_s5 + $0x70] sm:$0xff]   ;;  %v3256_v61 = vld [vmem:[%s6017_s5 + $0x68] sm:$0xff]  }
 0x169   :  { %v3299_v38 = vpop.eup %3298  ;;  %2583 = vmatpush1.bf16.msra.mxu0 %v3244_v50  ;;  %v3255_v47 = vld [vmem:[%s6017_s5 + $0xf0] sm:$0xff]  }
 0x16a   :  { %v417_v0 = vmul.f32 %v3299_v38, %v4312_v43  ;;  %v3301_v32 = vpop.eup %3300  ;;  %v498_v43 = vadd.f32 %v4381_v13, %v457_v2  ;;  %2584 = vmatprep.subr.bf16.mxu0 %v3916_v6  ;;  %v3258_v38 = vld [vmem:[%s6017_s5 + $0x60] sm:$0xff]  }
 0x16b   :  { %842 = vmatmul.mubr.bf16.gmra.mxu0 %v524_v12  ;;  %1045 = vmatmul.mubr.bf16.gmra.mxu1 %v524_v12  ;;  %v418_v62 = vmul.f32 %v3301_v32, %v4316_v45  ;;  %v3257_v12 = vld [vmem:[%s6017_s5 + $0xe8] sm:$0xff]  }
 0x16c   :  { %851 = vmatprep.mubr.bf16.mxu0 %v3916_v6  ;;  %1054 = vmatprep.mubr.bf16.mxu1 %v3916_v6  ;;  %v458_v37 = vmul.f32 %v4369_v19, %v417_v0 }
 0x16d   :  { %v3303_v56 = vpop.eup %3302  ;;  %v459_v45 = vmul.f32 %v4369_v19, %v418_v62  ;;  %2585 = vmatpush1.bf16.msra.mxu0 %v3246_v42  ;;  %v3261_v62 = vld [vmem:[%s6017_s5 + $0xd8] sm:$0xff]  }
 0x16e   :  { %v499_v3 = vadd.f32 %v4381_v13, %v458_v37  ;;  %v419_v27 = vmul.f32 %v3303_v56, %v4329_v16  ;;  %v3241_v16 = vld [vmem:[%s6017_s5 + $0xa8] sm:$0xff]   ;;  %2586 = vmatprep.subr.bf16.mxu0 %v3916_v6 }
 0x16f   :  { %2748 = vmatpush1.bf16.msra.mxu1 %v3241_v16  ;;  %v500_v14 = vadd.f32 %v4381_v13, %v459_v45 }
 0x170   :  { %v525_v9 = vpack.c.bf16 %v499_v3, %v498_v43  ;;  %v460_v28 = vmul.f32 %v4369_v19, %v419_v27  ;;  %2749 = vmatprep.subr.bf16.mxu1 %v3916_v6 }
 0x171   :  { %v3305_v52 = vpop.eup %3304  ;;  %2587 = vmatpush1.bf16.msra.mxu0 %v3248_v30 }
 0x172   :  { %v3307_v35 = vpop.eup %3306  ;;  %v501_v24 = vadd.f32 %v4381_v13, %v460_v28  ;;  %v421_v1 = vmul.f32 %v3305_v52, %v4337_v58  ;;  %2588 = vmatprep.subr.bf16.mxu0 %v3916_v6  ;;  %v3262_v28 = vld [vmem:[%s6017_s5 + $0x50] sm:$0xff]  }
 0x173   :  { %852 = vmatmul.mubr.bf16.gmra.mxu0 %v525_v9  ;;  %1055 = vmatmul.mubr.bf16.gmra.mxu1 %v525_v9  ;;  %v420_v46 = vmul.f32 %v3307_v35, %v4332_v51  ;;  %v3245_v51 = vld [vmem:[%s6017_s5 + $0x98] sm:$0xff]   ;;  %v3263_v52 = vld [vmem:[%s6017_s5 + $0xd0] sm:$0xff]  }
 0x174   :  { %861 = vmatprep.mubr.bf16.mxu0 %v3916_v6  ;;  %1064 = vmatprep.mubr.bf16.mxu1 %v3916_v6  ;;  %v526_v48 = vpack.c.bf16 %v501_v24, %v500_v14  ;;  %v462_v58 = vmul.f32 %v4369_v19, %v421_v1  ;;  %v3265_v14 = vld [vmem:[%s6017_s5 + $0xc8] sm:$0xff]  }
 0x175   :  { %2750 = vmatpush1.bf16.msra.mxu1 %v3243_v40  ;;  %v461_v63 = vmul.f32 %v4369_v19, %v420_v46  ;;  %2589 = vmatpush1.bf16.msra.mxu0 %v3250_v17  ;;  %v3264_v40 = vld [vmem:[%s6017_s5 + $0x48] sm:$0xff]  }
 0x176   :  { %2751 = vmatprep.subr.bf16.mxu1 %v3916_v6  ;;  %v503_v15 = vadd.f32 %v4381_v13, %v462_v58  ;;  %2590 = vmatprep.subr.bf16.mxu0 %v3916_v6 }
 0x177   :  { %v502_v44 = vadd.f32 %v4381_v13, %v461_v63 }
 0x179   :  { %2752 = vmatpush1.bf16.msra.mxu1 %v3245_v51  ;;  %v527_v55 = vpack.c.bf16 %v503_v15, %v502_v44  ;;  %2591 = vmatpush2.bf16.msra.mxu0 %v3252_v11  ;;  %v3266_v51 = vld [vmem:[%s6017_s5 + $0x40] sm:$0xff]  }
 0x17a   :  { %2753 = vmatprep.subr.bf16.mxu1 %v3916_v6  ;;  %2592 = vmatprep.subr.bf16.mxu0 %v3916_v6  ;;  %v3267_v15 = vld [vmem:[%s6017_s5 + $0xc0] sm:$0xff]  }
 0x17b   :  { %862 = vmatmul.mubr.bf16.gmra.mxu0 %v526_v48  ;;  %1065 = vmatmul.mubr.bf16.gmra.mxu1 %v526_v48 }
 0x17c   :  { %871 = vmatprep.mubr.bf16.mxu0 %v3916_v6  ;;  %1074 = vmatprep.mubr.bf16.mxu1 %v3916_v6 }
 0x17d   :  { %2754 = vmatpush1.bf16.msra.mxu1 %v3247_v54  ;;  %2593 = vmatpush2.bf16.msra.mxu0 %v3254_v60 }
 0x17e   :  { %2755 = vmatprep.subr.bf16.mxu1 %v3916_v6  ;;  %2594 = vmatprep.subr.bf16.mxu0 %v3916_v6 }
 0x181   :  { %2756 = vmatpush1.bf16.msra.mxu1 %v3249_v59  ;;  %2595 = vmatpush2.bf16.msra.mxu0 %v3256_v61 }
 0x182   :  { %2757 = vmatprep.subr.bf16.mxu1 %v3916_v6  ;;  %2596 = vmatprep.subr.bf16.mxu0 %v3916_v6 }
 0x183   :  { %872 = vmatmul.mubr.bf16.gmra.mxu0 %v527_v55  ;;  %1075 = vmatmul.mubr.bf16.gmra.mxu1 %v527_v55 }
 0x184   :  { %881 = vmatprep.mubr.bf16.mxu0 %v3916_v6  ;;  %1084 = vmatprep.mubr.bf16.mxu1 %v3916_v6 }
 0x185   :  { %2758 = vmatpush1.bf16.msra.mxu1 %v3251_v23  ;;  %2597 = vmatpush2.bf16.msra.mxu0 %v3258_v38 }
 0x186   :  { %2759 = vmatprep.subr.bf16.mxu1 %v3916_v6  ;;  %2598 = vmatprep.subr.bf16.mxu0 %v3916_v6 }
 0x189   :  { %2760 = vmatpush2.bf16.msra.mxu1 %v3253_v29  ;;  %2599 = vmatpush2.bf16.msra.mxu0 %v3260_v7 }
 0x18a   :  { %2761 = vmatprep.subr.bf16.mxu1 %v3916_v6  ;;  %2600 = vmatprep.subr.bf16.mxu0 %v3916_v6 }
 0x18d   :  { %2762 = vmatpush2.bf16.msra.mxu1 %v3255_v47  ;;  %2601 = vmatpush2.bf16.msra.mxu0 %v3262_v28 }
 0x18e   :  { %2763 = vmatprep.subr.bf16.mxu1 %v3916_v6  ;;  %2602 = vmatprep.subr.bf16.mxu0 %v3916_v6 }
 0x191   :  { %2764 = vmatpush2.bf16.msra.mxu1 %v3257_v12  ;;  %2603 = vmatpush2.bf16.msra.mxu0 %v3264_v40 }
 0x192   :  { %2765 = vmatprep.subr.bf16.mxu1 %v3916_v6  ;;  %2604 = vmatprep.subr.bf16.mxu0 %v3916_v6 }
 0x195   :  { %2766 = vmatpush2.bf16.msra.mxu1 %v3259_v34  ;;  %2605 = vmatpush2.bf16.msra.mxu0 %v3266_v51 }
 0x196   :  { %2767 = vmatprep.subr.bf16.mxu1 %v3916_v6 }
 0x199   :  { %2768 = vmatpush2.bf16.msra.mxu1 %v3261_v62 }
 0x19a   :  { %2769 = vmatprep.subr.bf16.mxu1 %v3916_v6 }
 0x19d   :  { %2770 = vmatpush2.bf16.msra.mxu1 %v3263_v52 }
 0x19e   :  { %2771 = vmatprep.subr.bf16.mxu1 %v3916_v6 }
 0x1a1   :  { %2772 = vmatpush2.bf16.msra.mxu1 %v3265_v14 }
 0x1a2   :  { %2773 = vmatprep.subr.bf16.mxu1 %v3916_v6 }
 0x1a5   :  { %2774 = vmatpush2.bf16.msra.mxu1 %v3267_v15 }
 0x1af   :  { %v273_v0 = vpop.xlane.xlu0 %272 }
 0x1b0   :  { %v320_v2 = vmul.f32 0.0078125, %v273_v0 }
 0x1b2   :  { %v354_v4 = vadd.f32 1e-05, %v320_v2 }
 0x1b3   :  { %v275_v32 = vpop.xlane.xlu1 %274 }
 0x1b4   :  { %3308 = vrsqrt.f32 %v354_v4  ;;  %v321_v37 = vmul.f32 0.0078125, %v275_v32 }
 0x1b6   :  { %v355_v56 = vadd.f32 1e-05, %v321_v37 }
 0x1b7   :  { %v277_v43 = vpop.xlane.xlu0 %276 }
 0x1b8   :  { %3310 = vrsqrt.f32 %v355_v56  ;;  %v322_v3 = vmul.f32 0.0078125, %v277_v43 }
 0x1ba   :  { %v356_v27 = vadd.f32 1e-05, %v322_v3 }
 0x1bb   :  { %v279_v25 = vpop.xlane.xlu1 %278 }
 0x1bc   :  { %3312 = vrsqrt.f32 %v356_v27  ;;  %v323_v26 = vmul.f32 0.0078125, %v279_v25 }
 0x1be   :  { %v357_v16 = vadd.f32 1e-05, %v323_v26 }
 0x1bf   :  { %v281_v9 = vpop.xlane.xlu0 %280 }
 0x1c0   :  { %3314 = vrsqrt.f32 %v357_v16  ;;  %v324_v45 = vmul.f32 0.0078125, %v281_v9 }
 0x1c1   :  { %v3309_v35 = vpop.eup %3308 }
 0x1c2   :  { %v358_v24 = vadd.f32 1e-05, %v324_v45  ;;  %v422_v1 = vmul.f32 %v3309_v35, %v4346_v21 }
 0x1c3   :  { %v283_v8 = vpop.xlane.xlu1 %282 }
 0x1c4   :  { %3316 = vrsqrt.f32 %v358_v24  ;;  %v325_v46 = vmul.f32 0.0078125, %v283_v8  ;;  %v463_v63 = vmul.f32 %v4369_v19, %v422_v1 }
 0x1c5   :  { %v3311_v48 = vpop.eup %3310 }
 0x1c6   :  { %v359_v58 = vadd.f32 1e-05, %v325_v46  ;;  %v423_v21 = vmul.f32 %v3311_v48, %v4351_v31  ;;  %v504_v55 = vadd.f32 %v4381_v13, %v463_v63 }
 0x1c7   :  { %v285_v50 = vpop.xlane.xlu0 %284 }
 0x1c8   :  { %3318 = vrsqrt.f32 %v359_v58  ;;  %v326_v44 = vmul.f32 0.0078125, %v285_v50  ;;  %v464_v42 = vmul.f32 %v4369_v19, %v423_v21 }
 0x1c9   :  { %v3313_v31 = vpop.eup %3312 }
 0x1ca   :  { %v360_v54 = vadd.f32 1e-05, %v326_v44  ;;  %v505_v30 = vadd.f32 %v4381_v13, %v464_v42  ;;  %v424_v59 = vmul.f32 %v3313_v31, %v4356_v49 }
 0x1cb   :  { %v287_v17 = vpop.xlane.xlu1 %286 }
 0x1cc   :  { %3320 = vrsqrt.f32 %v360_v54  ;;  %v327_v23 = vmul.f32 0.0078125, %v287_v17  ;;  %v528_v11 = vpack.c.bf16 %v505_v30, %v504_v55  ;;  %v465_v61 = vmul.f32 %v4369_v19, %v424_v59 }
 0x1cd   :  { %v3315_v29 = vpop.eup %3314 }
 0x1ce   :  { %v361_v60 = vadd.f32 1e-05, %v327_v23  ;;  %882 = vmatmul.mubr.bf16.gmra.mxu0 %v528_v11  ;;  %1085 = vmatmul.mubr.bf16.gmra.mxu1 %v528_v11  ;;  %v425_v47 = vmul.f32 %v3315_v29, %v4361_v10  ;;  %v506_v2 = vadd.f32 %v4381_v13, %v465_v61  ;;  %v569_v11 = vlaneseq }
 0x1cf   :  { %v289_v12 = vpop.xlane.xlu0 %288  ;;  %891 = vmatprep.mubr.bf16.mxu0 %v3916_v6  ;;  %1094 = vmatprep.mubr.bf16.mxu1 %v3916_v6 }
 0x1d0   :  { %3322 = vrsqrt.f32 %v361_v60  ;;  %v328_v38 = vmul.f32 0.0078125, %v289_v12  ;;  %v466_v49 = vmul.f32 %v4369_v19, %v425_v47  ;;  %v3880_v60 = vld [vmem:[%s6015_s1] ss:$0 sm:$0xff] }
 0x1d1   :  { %v3317_v34 = vpop.eup %3316 }
 0x1d2   :  { %v362_v0 = vadd.f32 1e-05, %v328_v38  ;;  %v507_v4 = vadd.f32 %v4381_v13, %v466_v49  ;;  %v426_v32 = vmul.f32 %v3317_v34, %v4372_v5 }
 0x1d3   :  { %v291_v10 = vpop.xlane.xlu1 %290 }
 0x1d4   :  { %3324 = vrsqrt.f32 %v362_v0  ;;  %v329_v37 = vmul.f32 0.0078125, %v291_v10  ;;  %v529_v56 = vpack.c.bf16 %v507_v4, %v506_v2  ;;  %v467_v25 = vmul.f32 %v4369_v19, %v426_v32  ;;  %v567_v4 = vld [vmem:[%s6018_s4] sm:$0xf] }
 0x1d5   :  { %v3319_v43 = vpop.eup %3318 }
 0x1d6   :  { %v363_v3 = vadd.f32 1e-05, %v329_v37  ;;  %892 = vmatmul.mubr.bf16.gmra.mxu0 %v529_v56  ;;  %1095 = vmatmul.mubr.bf16.gmra.mxu1 %v529_v56  ;;  %v427_v27 = vmul.f32 %v3319_v43, %v4385_v33  ;;  %v508_v9 = vadd.f32 %v4381_v13, %v467_v25 }
 0x1d7   :  { %v293_v7 = vpop.xlane.xlu0 %292  ;;  %901 = vmatprep.mubr.bf16.mxu0 %v3916_v6  ;;  %1104 = vmatprep.mubr.bf16.mxu1 %v3916_v6 }
 0x1d8   :  { %3326 = vrsqrt.f32 %v363_v3  ;;  %v330_v62 = vmul.f32 0.0078125, %v293_v7  ;;  %v468_v5 = vmul.f32 %v4369_v19, %v427_v27 }
 0x1d9   :  { %v3321_v26 = vpop.eup %3320 }
 0x1da   :  { %v364_v16 = vadd.f32 1e-05, %v330_v62  ;;  %v509_v28 = vadd.f32 %v4381_v13, %v468_v5  ;;  %v428_v52 = vmul.f32 %v3321_v26, %v4393_v18 }
 0x1db   :  { %v295_v33 = vpop.xlane.xlu1 %294 }
 0x1dc   :  { %3328 = vrsqrt.f32 %v364_v16  ;;  %v331_v45 = vmul.f32 0.0078125, %v295_v33  ;;  %v530_v35 = vpack.c.bf16 %v509_v28, %v508_v9  ;;  %v469_v40 = vmul.f32 %v4369_v19, %v428_v52 }
 0x1dd   :  { %v3323_v24 = vpop.eup %3322 }
 0x1de   :  { %v365_v1 = vadd.f32 1e-05, %v331_v45  ;;  %902 = vmatmul.mubr.bf16.gmra.mxu0 %v530_v35  ;;  %1105 = vmatmul.mubr.bf16.gmra.mxu1 %v530_v35  ;;  %v429_v8 = vmul.f32 %v3323_v24, %v4403_v39  ;;  %v510_v21 = vadd.f32 %v4381_v13, %v469_v40 }
 0x1df   :  { %v297_v14 = vpop.xlane.xlu0 %296  ;;  %911 = vmatprep.mubr.bf16.mxu0 %v3916_v6  ;;  %1114 = vmatprep.mubr.bf16.mxu1 %v3916_v6 }
 0x1e0   :  { %3330 = vrsqrt.f32 %v365_v1  ;;  %v332_v46 = vmul.f32 0.0078125, %v297_v14  ;;  %v470_v18 = vmul.f32 %v4369_v19, %v429_v8 }
 0x1e1   :  { %v3325_v48 = vpop.eup %3324 }
 0x1e2   :  { %v366_v58 = vadd.f32 1e-05, %v332_v46  ;;  %v511_v63 = vadd.f32 %v4381_v13, %v470_v18  ;;  %v430_v50 = vmul.f32 %v3325_v48, %v4411_v36 }
 0x1e3   :  { %v299_v39 = vpop.xlane.xlu1 %298 }
 0x1e4   :  { %3332 = vrsqrt.f32 %v366_v58  ;;  %v333_v51 = vmul.f32 0.0078125, %v299_v39  ;;  %v531_v15 = vpack.c.bf16 %v511_v63, %v510_v21  ;;  %v471_v54 = vmul.f32 %v4369_v19, %v430_v50 }
 0x1e5   :  { %v3327_v44 = vpop.eup %3326 }
 0x1e6   :  { %v367_v42 = vadd.f32 1e-05, %v333_v51  ;;  %912 = vmatmul.mubr.bf16.gmra.mxu0 %v531_v15  ;;  %1115 = vmatmul.mubr.bf16.gmra.mxu1 %v531_v15  ;;  %v431_v31 = vmul.f32 %v3327_v44, %v4421_v53  ;;  %v512_v30 = vadd.f32 %v4381_v13, %v471_v54 }
 0x1e7   :  { %921 = vmatprep.mubr.bf16.mxu0 %v3916_v6  ;;  %1124 = vmatprep.mubr.bf16.mxu1 %v3916_v6 }
 0x1e8   :  { %3334 = vrsqrt.f32 %v367_v42  ;;  %v472_v55 = vmul.f32 %v4369_v19, %v431_v31 }
 0x1e9   :  { %v3329_v36 = vpop.eup %3328 }
 0x1ea   :  { %v513_v59 = vadd.f32 %v4381_v13, %v472_v55  ;;  %v432_v17 = vmul.f32 %v3329_v36, %v4429_v22  ;;  %v570_v13 = vshrl.u32 %v569_v11, 7  ;;  %v3881_v22 = vld [vmem:[%s6016_s2] ss:$0 sm:$0xff] }
 0x1ec   :  { %v532_v23 = vpack.c.bf16 %v513_v59, %v512_v30  ;;  %v473_v47 = vmul.f32 %v3880_v60, %v432_v17  ;;  %v571_v34 = vsub.s32 0, %v570_v13  ;;  %v579_v0 = vsub.s32 2, %v570_v13 }
 0x1ed   :  { %v3331_v29 = vpop.eup %3330  ;;  %v575_v32 = vsub.s32 1, %v570_v13  ;;  %v583_v10 = vsub.s32 3, %v570_v13 }
 0x1ee   :  { %922 = vmatmul.mubr.bf16.gmra.mxu0 %v532_v23  ;;  %1125 = vmatmul.mubr.bf16.gmra.mxu1 %v532_v23  ;;  %v433_v53 = vmul.f32 %v3331_v29, %v4439_v20  ;;  %v514_v12 = vadd.f32 %v3881_v22, %v473_v47  ;;  %v4688_v43 = vrot.slane %v567_v4, %v579_v0 }
 0x1ef   :  { %931 = vmatprep.mubr.bf16.mxu0 %v3916_v6  ;;  %1134 = vmatprep.mubr.bf16.mxu1 %v3916_v6  ;;  %v4690_v27 = vrot.slane %v567_v4, %v575_v32  ;;  %v4692_v25 = vrot.slane %v567_v4, %v583_v10 }
 0x1f0   :  { %v474_v19 = vmul.f32 %v3880_v60, %v433_v53 }
 0x1f1   :  { %v3333_v61 = vpop.eup %3332 }
 0x1f2   :  { %v515_v38 = vadd.f32 %v3881_v22, %v474_v19  ;;  %v434_v20 = vmul.f32 %v3333_v61, %v4447_v57  ;;  %v4686_v57 = vrot.slane %v567_v4, %v571_v34 }
 0x1f4   :  { %v533_v49 = vpack.c.bf16 %v515_v38, %v514_v12  ;;  %v475_v56 = vmul.f32 %v3880_v60, %v434_v20 }
 0x1f5   :  { %v3335_v2 = vpop.eup %3334 }
 0x1f6   :  { %932 = vmatmul.mubr.bf16.gmra.mxu0 %v533_v49  ;;  %1135 = vmatmul.mubr.bf16.gmra.mxu1 %v533_v49  ;;  %v435_v37 = vmul.f32 %v3335_v2, %v4457_v41  ;;  %v516_v7 = vadd.f32 %v3881_v22, %v475_v56 }
 0x1f7   :  { %941 = vmatprep.mubr.bf16.mxu0 %v3916_v6  ;;  %1144 = vmatprep.mubr.bf16.mxu1 %v3916_v6 }
 0x1f8   :  { %v476_v3 = vmul.f32 %v3880_v60, %v435_v37 }
 0x1fa   :  { %v517_v62 = vadd.f32 %v3881_v22, %v476_v3 }
 0x1fb   :  { %v783_v5 = vpop.f32.mrf.mxu0  ;;  %v986_v26 = vpop.f32.mrf.mxu1 }
 0x1fc   :  { %v4695_v41 = vadd.f32 %v783_v5, %v4686_v57  ;;  %v4698_v16 = vadd.f32 %v986_v26, %v4688_v43  ;;  %v534_v6 = vpack.c.bf16 %v517_v62, %v516_v7 }
 0x1fd   :  { %v785_v9 = vpop.f32.mrf.mxu0  ;;  %v988_v28 = vpop.f32.mrf.mxu1 }
 0x1fe   :  { %v3018_v52 = vmul.f32 -1.702, %v4695_v41  ;;  %v3020_v33 = vmul.f32 -1.702, %v4698_v16  ;;  %v4703_v45 = vadd.f32 %v785_v9, %v4690_v27  ;;  %v4706_v35 = vadd.f32 %v988_v28, %v4692_v25  ;;  %942 = vmatmul.mubr.bf16.gmra.mxu0 %v534_v6  ;;  %1145 = vmatmul.mubr.bf16.gmra.mxu1 %v534_v6 }
 0x1ff   :  { %v787_v24 = vpop.f32.mrf.mxu0  ;;  %v990_v1 = vpop.f32.mrf.mxu1 }
 0x200   :  { %v1427_v8 = vmul.f32 1.442695, %v3018_v52  ;;  %v1431_v40 = vmul.f32 1.442695, %v3020_v33  ;;  %v3019_v14 = vmul.f32 -1.702, %v4703_v45  ;;  %v4710_v46 = vadd.f32 %v787_v24, %v4686_v57 }
 0x201   :  { %v3021_v18 = vmul.f32 -1.702, %v4706_v35  ;;  %v4714_v48 = vadd.f32 %v990_v1, %v4688_v43  ;;  %v789_v58 = vpop.f32.mrf.mxu0  ;;  %v992_v21 = vpop.f32.mrf.mxu1 }
 0x202   :  { %3336 = vpow2.f32 %v1427_v8  ;;  %v1429_v63 = vmul.f32 1.442695, %v3019_v14  ;;  %v3022_v50 = vmul.f32 -1.702, %v4710_v46  ;;  %v4718_v39 = vadd.f32 %v789_v58, %v4690_v27 }
 0x203   :  { %3338 = vpow2.f32 %v1431_v40  ;;  %v1433_v51 = vmul.f32 1.442695, %v3021_v18  ;;  %v3024_v15 = vmul.f32 -1.702, %v4714_v48  ;;  %v4722_v44 = vadd.f32 %v992_v21, %v4692_v25  ;;  %v793_v42 = vpop.f32.mrf.mxu0  ;;  %v996_v31 = vpop.f32.mrf.mxu1 }
 0x204   :  { %3340 = vpow2.f32 %v1429_v63  ;;  %v1435_v54 = vmul.f32 1.442695, %v3022_v50  ;;  %v3023_v55 = vmul.f32 -1.702, %v4718_v39  ;;  %v4726_v36 = vadd.f32 %v793_v42, %v4686_v57 }
 0x205   :  { %3342 = vpow2.f32 %v1433_v51  ;;  %v1439_v30 = vmul.f32 1.442695, %v3024_v15  ;;  %v3025_v59 = vmul.f32 -1.702, %v4722_v44  ;;  %v4730_v17 = vadd.f32 %v996_v31, %v4688_v43  ;;  %v795_v23 = vpop.f32.mrf.mxu0  ;;  %v998_v11 = vpop.f32.mrf.mxu1 }
 0x206   :  { %3344 = vpow2.f32 %v1435_v54  ;;  %v1437_v29 = vmul.f32 1.442695, %v3023_v55  ;;  %v3026_v53 = vmul.f32 -1.702, %v4726_v36  ;;  %v4734_v60 = vadd.f32 %v795_v23, %v4690_v27 }
 0x207   :  { %3346 = vpow2.f32 %v1439_v30  ;;  %v1441_v47 = vmul.f32 1.442695, %v3025_v59  ;;  %v3028_v19 = vmul.f32 -1.702, %v4730_v17  ;;  %v4738_v13 = vadd.f32 %v998_v11, %v4692_v25  ;;  %v797_v61 = vpop.f32.mrf.mxu0  ;;  %v1000_v22 = vpop.f32.mrf.mxu1 }
 0x208   :  { %3348 = vpow2.f32 %v1437_v29  ;;  %v1443_v12 = vmul.f32 1.442695, %v3026_v53  ;;  %v3027_v38 = vmul.f32 -1.702, %v4734_v60  ;;  %v4742_v20 = vadd.f32 %v797_v61, %v4686_v57 }
 0x209   :  { %3350 = vpow2.f32 %v1441_v47  ;;  %v1447_v49 = vmul.f32 1.442695, %v3028_v19  ;;  %v3029_v34 = vmul.f32 -1.702, %v4738_v13  ;;  %v4746_v0 = vadd.f32 %v1000_v22, %v4688_v43  ;;  %v799_v2 = vpop.f32.mrf.mxu0  ;;  %v1002_v4 = vpop.f32.mrf.mxu1 }
 0x20a   :  { %3352 = vpow2.f32 %v1443_v12  ;;  %v1445_v32 = vmul.f32 1.442695, %v3027_v38  ;;  %v3030_v10 = vmul.f32 -1.702, %v4742_v20  ;;  %v4750_v37 = vadd.f32 %v799_v2, %v4690_v27 }
 0x20b   :  { %3354 = vpow2.f32 %v1447_v49  ;;  %v1449_v56 = vmul.f32 1.442695, %v3029_v34  ;;  %v3032_v3 = vmul.f32 -1.702, %v4746_v0  ;;  %v4754_v7 = vadd.f32 %v1002_v4, %v4692_v25  ;;  %v803_v62 = vpop.f32.mrf.mxu0  ;;  %v1006_v5 = vpop.f32.mrf.mxu1 }
 0x20c   :  { %3356 = vpow2.f32 %v1445_v32  ;;  %v1451_v26 = vmul.f32 1.442695, %v3030_v10  ;;  %v3031_v6 = vmul.f32 -1.702, %v4750_v37  ;;  %v4759_v31 = vadd.f32 %v803_v62, %v4686_v57 }
 0x20d   :  { %3358 = vpow2.f32 %v1449_v56  ;;  %v1455_v9 = vmul.f32 1.442695, %v3032_v3  ;;  %v3033_v28 = vmul.f32 -1.702, %v4754_v7  ;;  %v805_v52 = vpop.f32.mrf.mxu0  ;;  %v1008_v33 = vpop.f32.mrf.mxu1  ;;  %v4762_v29 = vadd.f32 %v1006_v5, %v4688_v43 }
 0x20e   :  { %3360 = vpow2.f32 %v1451_v26  ;;  %v1453_v24 = vmul.f32 1.442695, %v3031_v6  ;;  %v3034_v38 = vmul.f32 -1.702, %v4759_v31  ;;  %v4766_v2 = vadd.f32 %v805_v52, %v4690_v27 }
 0x20f   :  { %v3337_v1 = vpop.eup %3336  ;;  %3362 = vpow2.f32 %v1455_v9  ;;  %v1457_v8 = vmul.f32 1.442695, %v3033_v28  ;;  %v807_v40 = vpop.f32.mrf.mxu0  ;;  %v3036_v10 = vmul.f32 -1.702, %v4762_v29  ;;  %v4770_v5 = vadd.f32 %v1008_v33, %v4692_v25 }
 0x210   :  { %v1010_v14 = vpop.f32.mrf.mxu1  ;;  %v3339_v18 = vpop.eup %3338  ;;  %v1699_v58 = vadd.f32 1.0, %v3337_v1  ;;  %3364 = vpow2.f32 %v1453_v24  ;;  %v1459_v28 = vmul.f32 1.442695, %v3034_v38  ;;  %v4773_v52 = vadd.f32 %v807_v40, %v4686_v57 }
 0x211   :  { %v3341_v21 = vpop.eup %3340  ;;  %v1701_v63 = vadd.f32 1.0, %v3339_v18  ;;  %3366 = vpow2.f32 %v1457_v8  ;;  %v809_v50 = vpop.f32.mrf.mxu0  ;;  %v3035_v8 = vmul.f32 -1.702, %v4766_v2  ;;  %v4777_v18 = vadd.f32 %v1010_v14, %v4688_v43 }
 0x212   :  { %v1012_v51 = vpop.f32.mrf.mxu1  ;;  %v3343_v15 = vpop.eup %3342  ;;  %3368 = vrcp.f32 %v1699_v58  ;;  %v1700_v42 = vadd.f32 1.0, %v3341_v21  ;;  %v1463_v21 = vmul.f32 1.442695, %v3036_v10 }
 0x213   :  { %v3345_v54 = vpop.eup %3344  ;;  %3370 = vrcp.f32 %v1701_v63  ;;  %v1702_v55 = vadd.f32 1.0, %v3343_v15  ;;  %v813_v30 = vpop.f32.mrf.mxu0  ;;  %v4780_v63 = vadd.f32 %v809_v50, %v4690_v27 }
 0x214   :  { %v1016_v59 = vpop.f32.mrf.mxu1  ;;  %v3347_v23 = vpop.eup %3346  ;;  %3372 = vrcp.f32 %v1700_v42  ;;  %v1703_v11 = vadd.f32 1.0, %v3345_v54  ;;  %v3037_v54 = vmul.f32 -1.702, %v4770_v5 }
 0x215   :  { %v3349_v53 = vpop.eup %3348  ;;  %3374 = vrcp.f32 %v1702_v55  ;;  %v1705_v47 = vadd.f32 1.0, %v3347_v23  ;;  %v815_v19 = vpop.f32.mrf.mxu0  ;;  %v4784_v55 = vadd.f32 %v1012_v51, %v4692_v25  ;;  %v4794_v38 = vadd.f32 %v1016_v59, %v4688_v43 }
 0x216   :  { %v1018_v61 = vpop.f32.mrf.mxu1  ;;  %v3351_v22 = vpop.eup %3350  ;;  %3376 = vrcp.f32 %v1703_v11  ;;  %v1704_v12 = vadd.f32 1.0, %v3349_v53  ;;  %v3038_v53 = vmul.f32 -1.702, %v4773_v52  ;;  %v1465_v10 = vmul.f32 1.442695, %v3037_v54 }
 0x217   :  { %v3353_v49 = vpop.eup %3352  ;;  %3378 = vrcp.f32 %v1705_v47  ;;  %v1706_v34 = vadd.f32 1.0, %v3351_v22  ;;  %v817_v56 = vpop.f32.mrf.mxu0  ;;  %v4788_v47 = vadd.f32 %v813_v30, %v4686_v57  ;;  %6055 = vst [vmem:[#allocation3_spill] sm:$0xff] %v4794_v38  ;;  %v4808_v59 = vadd.f32 %v1018_v61, %v4692_v25 }
 0x218   :  { %v3355_v4 = vpop.eup %3354  ;;  %3380 = vrcp.f32 %v1704_v12  ;;  %v1707_v32 = vadd.f32 1.0, %v3353_v49  ;;  %v1020_v26 = vpop.f32.mrf.mxu1  ;;  %v3040_v12 = vmul.f32 -1.702, %v4777_v18  ;;  %v1461_v49 = vmul.f32 1.442695, %v3035_v8 }
 0x219   :  { %v3357_v3 = vpop.eup %3356  ;;  %3382 = vrcp.f32 %v1706_v34  ;;  %v1709_v62 = vadd.f32 1.0, %v3355_v4  ;;  %v819_v15 = vpop.f32.mrf.mxu0  ;;  %6054 = vst [vmem:[#allocation2_spill] sm:$0xff] %v4788_v47  ;;  %v3039_v34 = vmul.f32 -1.702, %v4780_v63  ;;  %v4800_v4 = vadd.f32 %v815_v19, %v4690_v27  ;;  %6057 = vst [vmem:[#allocation5_spill] sm:$0xff] %v4808_v59 }
 0x21a   :  { %v3359_v6 = vpop.eup %3358  ;;  %3384 = vrcp.f32 %v1707_v32  ;;  %v1708_v9 = vadd.f32 1.0, %v3357_v3  ;;  %v1022_v23 = vpop.f32.mrf.mxu1  ;;  %v3041_v3 = vmul.f32 -1.702, %v4784_v55  ;;  %v3042_v19 = vmul.f32 -1.702, %v4788_v47 }
 0x21b   :  { %v3361_v24 = vpop.eup %3360  ;;  %3386 = vrcp.f32 %v1709_v62  ;;  %v1710_v1 = vadd.f32 1.0, %v3359_v6  ;;  %6056 = vst [vmem:[#allocation4_spill] sm:$0xff] %v4800_v4  ;;  %v4802_v30 = vpop.f32.mrf.mxu0  ;;  %v1471_v8 = vmul.f32 1.442695, %v3040_v12 }
 0x21c   :  { %v3363_v58 = vpop.eup %3362  ;;  %3388 = vrcp.f32 %v1708_v9  ;;  %v1711_v33 = vadd.f32 1.0, %v3361_v24  ;;  %v4810_v62 = vpop.f32.mrf.mxu1  ;;  %v1467_v9 = vmul.f32 1.442695, %v3038_v53  ;;  %v4816_v24 = vadd.f32 %v817_v56, %v4686_v57 }
 0x21d   :  { %v3365_v42 = vpop.eup %3364  ;;  %3390 = vrcp.f32 %v1710_v1  ;;  %v1713_v40 = vadd.f32 1.0, %v3363_v58  ;;  %v3044_v58 = vmul.f32 -1.702, %v4794_v38  ;;  %v4826_v54 = vpop.f32.mrf.mxu0 }
 0x21e   :  { %v3367_v11 = vpop.eup %3366  ;;  %3392 = vrcp.f32 %v1711_v33  ;;  %v1712_v14 = vadd.f32 1.0, %v3365_v42  ;;  %6058 = vst [vmem:[#allocation6_spill] sm:$0xff] %v4816_v24  ;;  %v4820_v33 = vadd.f32 %v1020_v26, %v4688_v43  ;;  %v1469_v42 = vmul.f32 1.442695, %v3039_v34  ;;  %v4834_v26 = vpop.f32.mrf.mxu1 }
 0x21f   :  { %v4790_v50 = vpop.eup %3368  ;;  %3394 = vrcp.f32 %v1713_v40  ;;  %v1714_v22 = vadd.f32 1.0, %v3367_v11  ;;  %v3043_v40 = vmul.f32 -1.702, %v4800_v4  ;;  %v3045_v11 = vmul.f32 -1.702, %v4808_v59  ;;  %v4845_v59 = vpop.f32.mrf.mxu0 }
 0x220   :  { %v4796_v51 = vpop.eup %3370  ;;  %3396 = vrcp.f32 %v1712_v14  ;;  %6059 = vst [vmem:[#allocation7_spill] sm:$0xff] %v4820_v33  ;;  %v4832_v14 = vadd.f32 %v1022_v23, %v4692_v25  ;;  %v3048_v34 = vmul.f32 -1.702, %v4820_v33 }
 0x221   :  { %v4804_v32 = vpop.eup %3372  ;;  %3398 = vrcp.f32 %v1714_v22  ;;  %v1475_v22 = vmul.f32 1.442695, %v3042_v19  ;;  %v4858_v38 = vpop.f32.mrf.mxu0 }
 0x222   :  { %v4812_v6 = vpop.eup %3374  ;;  %3400 = vpow2.f32 %v1459_v28  ;;  %v4824_v28 = vadd.f32 %v819_v15, %v4690_v27  ;;  %6061 = vst [vmem:[#allocation9_spill] sm:$0xff] %v4832_v14  ;;  %v3046_v15 = vmul.f32 -1.702, %v4816_v24  ;;  %v3049_v19 = vmul.f32 -1.702, %v4832_v14  ;;  %v4850_v24 = vpop.f32.mrf.mxu1 }
 0x223   :  { %v3377_v1 = vpop.eup %3376  ;;  %3402 = vpow2.f32 %v1463_v21  ;;  %v1473_v21 = vmul.f32 1.442695, %v3041_v3  ;;  %v1477_v3 = vmul.f32 1.442695, %v3043_v40 }
 0x224   :  { %v3379_v61 = vpop.eup %3378  ;;  %3404 = vpow2.f32 %v1461_v49  ;;  %6060 = vst [vmem:[#allocation8_spill] sm:$0xff] %v4824_v28  ;;  %v1479_v49 = vmul.f32 1.442695, %v3044_v58  ;;  %v3047_v23 = vmul.f32 -1.702, %v4824_v28  ;;  %v4862_v14 = vpop.f32.mrf.mxu1 }
 0x225   :  { %v4828_v56 = vpop.eup %3380  ;;  %3406 = vpow2.f32 %v1465_v10  ;;  %v1483_v58 = vmul.f32 1.442695, %v3046_v15  ;;  %v4871_v15 = vadd.f32 %v4802_v30, %v4686_v57  ;;  %v4886_v30 = vadd.f32 %v4810_v62, %v4688_v43 }
 0x226   :  { %v4836_v53 = vpop.eup %3382  ;;  %3408 = vpow2.f32 %v1467_v9  ;;  %v1481_v9 = vmul.f32 1.442695, %v3045_v11  ;;  %v1485_v28 = vmul.f32 1.442695, %v3047_v23  ;;  %v1489_v11 = vmul.f32 1.442695, %v3049_v19 }
 0x227   :  { %v4839_v12 = vpop.eup %3384  ;;  %3410 = vpow2.f32 %v1471_v8 }
 0x228   :  { %v4842_v10 = vpop.eup %3386  ;;  %3412 = vpow2.f32 %v1469_v42  ;;  %v1487_v42 = vmul.f32 1.442695, %v3048_v34  ;;  %v4875_v34 = vmul.f32 %v4790_v50, %v4695_v41  ;;  %v4892_v41 = vmul.f32 %v4804_v32, %v4703_v45 }
 0x229   :  { %v4847_v4 = vpop.eup %3388  ;;  %3414 = vpow2.f32 %v1473_v21  ;;  %v4905_v45 = vmul.f32 %v4828_v56, %v4718_v39  ;;  %v4909_v32 = vadd.f32 %v4826_v54, %v4690_v27  ;;  %v2114_v39 = vmul.f32 %v4836_v53, %v4722_v44 }
 0x22a   :  { %v4852_v8 = vpop.eup %3390  ;;  %3416 = vpow2.f32 %v1475_v22  ;;  %v4867_v22 = vmul.f32 %v3377_v1, %v4710_v46  ;;  %v4888_v1 = vpop.f32.mrf.mxu0  ;;  %v4918_v56 = vmul.f32 %v4839_v12, %v4726_v36  ;;  %v4931_v36 = vadd.f32 %v4845_v59, %v4686_v57 }
 0x22b   :  { %v4854_v33 = vpop.eup %3392  ;;  %3418 = vpow2.f32 %v1479_v49  ;;  %v3051_v53 = vmul.f32 -1.702, %v4909_v32 }
 0x22c   :  { %v4856_v40 = vpop.eup %3394  ;;  %3420 = vpow2.f32 %v1477_v3  ;;  %v4879_v3 = vmul.f32 %v4796_v51, %v4698_v16  ;;  %v4896_v16 = vmul.f32 %v4812_v6, %v4706_v35 }
 0x22d   :  { %v4860_v21 = vpop.eup %3396  ;;  %3422 = vpow2.f32 %v1481_v9  ;;  %v4882_v9 = vmul.f32 %v3379_v61, %v4714_v48  ;;  %v4898_v48 = vpop.f32.mrf.mxu1 }
 0x22e   :  { %v4864_v47 = vpop.eup %3398  ;;  %3424 = vpow2.f32 %v1483_v58 }
 0x22f   :  { %v3401_v49 = vpop.eup %3400  ;;  %3426 = vpow2.f32 %v1487_v42 }
 0x230   :  { %v3403_v23 = vpop.eup %3402  ;;  %v1715_v46 = vadd.f32 1.0, %v3401_v49  ;;  %3428 = vpow2.f32 %v1485_v28  ;;  %v3050_v28 = vmul.f32 -1.702, %v4871_v15  ;;  %v3052_v49 = vmul.f32 -1.702, %v4886_v30 }
 0x231   :  { %v3405_v19 = vpop.eup %3404  ;;  %v1717_v50 = vadd.f32 1.0, %v3403_v23  ;;  %3430 = vpow2.f32 %v1489_v11  ;;  %v835_v23 = vpop.f32.mrf.mxu0 }
 0x232   :  { %v3407_v51 = vpop.eup %3406  ;;  %3432 = vrcp.f32 %v1715_v46  ;;  %v1716_v61 = vadd.f32 1.0, %v3405_v19  ;;  %v4920_v19 = vpop.f32.mrf.mxu1 }
 0x233   :  { %v3409_v58 = vpop.eup %3408  ;;  %3434 = vrcp.f32 %v1717_v50  ;;  %v1718_v35 = vadd.f32 1.0, %v3407_v51 }
 0x234   :  { %v3411_v6 = vpop.eup %3410  ;;  %3436 = vrcp.f32 %v1716_v61  ;;  %v1719_v11 = vadd.f32 1.0, %v3409_v58  ;;  %v4922_v61 = vmul.f32 1.442695, %v3050_v28  ;;  %v4926_v58 = vadd.f32 %v4834_v26, %v4692_v25 }
 0x235   :  { %v3413_v46 = vpop.eup %3412  ;;  %3438 = vrcp.f32 %v1718_v35  ;;  %v1721_v54 = vadd.f32 1.0, %v3411_v6  ;;  %v4935_v35 = vmul.f32 %v4842_v10, %v4730_v17  ;;  %v1495_v6 = vmul.f32 1.442695, %v3052_v49 }
 0x236   :  { %v3415_v50 = vpop.eup %3414  ;;  %3440 = vrcp.f32 %v1719_v11  ;;  %v1720_v51 = vadd.f32 1.0, %v3413_v46  ;;  %v837_v11 = vpop.f32.mrf.mxu0  ;;  %v4939_v46 = vmul.f32 %v4847_v4, %v4734_v60  ;;  %v3053_v10 = vmul.f32 -1.702, %v4926_v58 }
 0x237   :  { %v3417_v42 = vpop.eup %3416  ;;  %3442 = vrcp.f32 %v1721_v54  ;;  %v1722_v44 = vadd.f32 1.0, %v3415_v50  ;;  %v4943_v54 = vmul.f32 %v4852_v8, %v4738_v13  ;;  %v1040_v50 = vpop.f32.mrf.mxu1  ;;  %v1493_v4 = vmul.f32 1.442695, %v3051_v53 }
 0x238   :  { %v3419_v12 = vpop.eup %3418  ;;  %3444 = vrcp.f32 %v1720_v51  ;;  %v1723_v28 = vadd.f32 1.0, %v3417_v42  ;;  %v4948_v42 = vadd.f32 %v4850_v24, %v4688_v43  ;;  %v3054_v51 = vmul.f32 -1.702, %v4931_v36 }
 0x239   :  { %v3421_v26 = vpop.eup %3420  ;;  %3446 = vrcp.f32 %v1722_v44  ;;  %v1725_v59 = vadd.f32 1.0, %v3419_v12  ;;  %v4953_v44 = vadd.f32 %v4858_v38, %v4690_v27  ;;  %v839_v12 = vpop.f32.mrf.mxu0  ;;  %v4964_v38 = vadd.f32 %v4888_v1, %v4686_v57 }
 0x23a   :  { %v3423_v62 = vpop.eup %3422  ;;  %3448 = vrcp.f32 %v1723_v28  ;;  %v1724_v17 = vadd.f32 1.0, %v3421_v26  ;;  %6062 = vst [vmem:[#allocation10_spill] sm:$0xff] %v4948_v42  ;;  %v2244_v28 = vpack.c.bf16 %v4905_v45, %v4892_v41  ;;  %v1042_v53 = vpop.f32.mrf.mxu1  ;;  %v4968_v41 = vadd.f32 %v4898_v48, %v4688_v43 }
 0x23b   :  { %v3425_v49 = vpop.eup %3424  ;;  %3450 = vrcp.f32 %v1725_v59  ;;  %v1726_v60 = vadd.f32 1.0, %v3423_v62  ;;  %v4959_v62 = vadd.f32 %v4862_v14, %v4692_v25  ;;  %v2246_v59 = vpack.c.bf16 %v2114_v39, %v4896_v16  ;;  %6063 = vst [vmem:[#allocation11_spill] sm:$0xff] %v4964_v38 }
 0x23c   :  { %v3427_v13 = vpop.eup %3426  ;;  %3452 = vrcp.f32 %v1724_v17  ;;  %v1727_v8 = vadd.f32 1.0, %v3425_v49  ;;  %6064 = vst [vmem:[#allocation12_spill] sm:$0xff] %v4968_v41  ;;  %2606 = vmatprep.mubr.bf16.mxu0 %v2244_v28  ;;  %v4974_v16 = vadd.f32 %v835_v23, %v4690_v27  ;;  %v6066_v39 = vpack.c.bf16 %v4867_v22, %v4875_v34  ;;  %v843_v28 = vpop.f32.mrf.mxu0 }
 0x23d   :  { %v3429_v26 = vpop.eup %3428  ;;  %3454 = vrcp.f32 %v1726_v60  ;;  %v1729_v24 = vadd.f32 1.0, %v3427_v13  ;;  %v3056_v60 = vmul.f32 -1.702, %v4948_v42  ;;  %2775 = vmatprep.mubr.bf16.mxu1 %v2246_v59  ;;  %v4983_v48 = vmul.f32 %v4860_v21, %v4750_v37  ;;  %v1046_v37 = vpop.f32.mrf.mxu1 }
 0x23e   :  { %v3431_v17 = vpop.eup %3430  ;;  %3456 = vrcp.f32 %v1727_v8  ;;  %v1728_v49 = vadd.f32 1.0, %v3429_v26  ;;  %6065 = vst [vmem:[#allocation13_spill] sm:$0xff] %v4974_v16  ;;  %2607 = vmatmul.mubr.bf16.vlgmr.msra.gmra.mxu0 %v6066_v39  ;;  %v1497_v13 = vmul.f32 1.442695, %v3053_v10  ;;  %v3055_v8 = vmul.f32 -1.702, %v4953_v44 }
 0x23f   :  { %v4970_v45 = vpop.eup %3432  ;;  %3458 = vrcp.f32 %v1729_v24  ;;  %v1730_v14 = vadd.f32 1.0, %v3431_v17  ;;  %v6067_v23 = vpack.c.bf16 %v4882_v9, %v4879_v3  ;;  %v1499_v22 = vmul.f32 1.442695, %v3054_v51 }
 0x240   :  { %v4979_v1 = vpop.eup %3434  ;;  %3460 = vrcp.f32 %v1728_v49  ;;  %v3057_v34 = vmul.f32 -1.702, %v4959_v62  ;;  %v4994_v24 = vadd.f32 %v4920_v19, %v4692_v25  ;;  %v3058_v10 = vmul.f32 -1.702, %v4964_v38 }
 0x241   :  { %2776 = vmatmul.mubr.bf16.vlgmr.msra.gmra.mxu1 %v6067_v23  ;;  %v4989_v26 = vpop.eup %3436  ;;  %3462 = vrcp.f32 %v1730_v14  ;;  %v3060_v3 = vmul.f32 -1.702, %v4968_v41  ;;  %v5002_v9 = vadd.f32 %v837_v11, %v4686_v57  ;;  %v1503_v51 = vmul.f32 1.442695, %v3056_v60  ;;  %v845_v11 = vpop.f32.mrf.mxu0 }
 0x242   :  { %6068 = vst [vmem:[#allocation14_spill] sm:$0xff] %v4994_v24  ;;  %v4996_v21 = vpop.eup %3438  ;;  %3464 = vpow2.f32 %v4922_v61  ;;  %v3059_v17 = vmul.f32 -1.702, %v4974_v16  ;;  %v5008_v19 = vadd.f32 %v1040_v50, %v4688_v43  ;;  %v1501_v61 = vmul.f32 1.442695, %v3055_v8  ;;  %v1048_v41 = vpop.f32.mrf.mxu1 }
 0x243   :  { %6069 = vst [vmem:[#allocation15_spill] sm:$0xff] %v5002_v9  ;;  %v5004_v59 = vpop.eup %3440  ;;  %3466 = vpow2.f32 %v1495_v6  ;;  %v5013_v14 = vadd.f32 %v839_v12, %v4690_v27  ;;  %v5016_v39 = vadd.f32 %v1042_v53, %v4692_v25  ;;  %v2122_v6 = vmul.f32 %v4864_v47, %v4754_v7 }
 0x244   :  { %6070 = vst [vmem:[#allocation16_spill] sm:$0xff] %v5008_v19  ;;  %v5010_v49 = vpop.eup %3442  ;;  %3468 = vpow2.f32 %v1493_v4  ;;  %v1505_v60 = vmul.f32 1.442695, %v3057_v34  ;;  %v3061_v50 = vmul.f32 -1.702, %v4994_v24  ;;  %v5030_v7 = vadd.f32 %v843_v28, %v4686_v57 }
 0x245   :  { %6071 = vst [vmem:[#allocation17_spill] sm:$0xff] %v5016_v39  ;;  %v5018_v23 = vpop.eup %3444  ;;  %3470 = vpow2.f32 %v1497_v13  ;;  %v1507_v4 = vmul.f32 1.442695, %v3058_v10  ;;  %v1511_v12 = vmul.f32 1.442695, %v3060_v3  ;;  %v5037_v34 = vadd.f32 %v1046_v37, %v4688_v43  ;;  %v847_v10 = vpop.f32.mrf.mxu0 }
 0x246   :  { %v5023_v38 = vpop.eup %3446  ;;  %3472 = vpow2.f32 %v1499_v22  ;;  %v3062_v8 = vmul.f32 -1.702, %v5002_v9  ;;  %v1509_v16 = vmul.f32 1.442695, %v3059_v17  ;;  %v3064_v42 = vmul.f32 -1.702, %v5008_v19  ;;  %v1050_v19 = vpop.f32.mrf.mxu1 }
 0x247   :  { %v5026_v53 = vpop.eup %3448  ;;  %3474 = vpow2.f32 %v1503_v51  ;;  %v3063_v13 = vmul.f32 -1.702, %v5013_v14  ;;  %v3065_v22 = vmul.f32 -1.702, %v5016_v39  ;;  %v2119_v51 = vmul.f32 %v4854_v33, %v4742_v20 }
 0x248   :  { %v5032_v47 = vpop.eup %3450  ;;  %3476 = vpow2.f32 %v1501_v61  ;;  %v2121_v28 = vmul.f32 %v4856_v40, %v4746_v0  ;;  %v1513_v17 = vmul.f32 1.442695, %v3061_v50  ;;  %v1515_v9 = vmul.f32 1.442695, %v3062_v8 }
 0x249   :  { %v5039_v3 = vpop.eup %3452  ;;  %3478 = vpow2.f32 %v1505_v60  ;;  %v5048_v24 = vadd.f32 %v845_v11, %v4690_v27  ;;  %v2248_v37 = vpack.c.bf16 %v4983_v48, %v4939_v46  ;;  %v1519_v20 = vmul.f32 1.442695, %v3064_v42  ;;  %v849_v11 = vpop.f32.mrf.mxu0 }
 0x24a   :  { %v5045_v61 = vpop.eup %3454  ;;  %3480 = vpow2.f32 %v1507_v4  ;;  %v3066_v33 = vmul.f32 -1.702, %v5030_v7  ;;  %v2250_v0 = vpack.c.bf16 %v2122_v6, %v4943_v54  ;;  %v1517_v60 = vmul.f32 1.442695, %v3063_v13  ;;  %v1052_v42 = vpop.f32.mrf.mxu1 }
 0x24b   :  { %v5052_v39 = vpop.eup %3456  ;;  %3482 = vpow2.f32 %v1511_v12  ;;  %v1521_v50 = vmul.f32 1.442695, %v3065_v22  ;;  %v3068_v4 = vmul.f32 -1.702, %v5037_v34  ;;  %2614 = vmatprep.mubr.bf16.mxu0 %v2248_v37  ;;  %v5062_v46 = vadd.f32 %v1048_v41, %v4692_v25 }
 0x24c   :  { %v5056_v40 = vpop.eup %3458  ;;  %3484 = vpow2.f32 %v1509_v16  ;;  %2783 = vmatprep.mubr.bf16.mxu1 %v2250_v0  ;;  %v2247_v48 = vpack.c.bf16 %v2119_v51, %v4918_v56  ;;  %v2249_v54 = vpack.c.bf16 %v2121_v28, %v4935_v35  ;;  %v5070_v16 = vmul.f32 %v4970_v45, %v4759_v31  ;;  %v1056_v28 = vpop.f32.mrf.mxu1 }
 0x24d   :  { %v5059_v8 = vpop.eup %3460  ;;  %3486 = vpow2.f32 %v1513_v17  ;;  %v5074_v12 = vmul.f32 %v4979_v1, %v4762_v29  ;;  %v3067_v41 = vmul.f32 -1.702, %v5048_v24  ;;  %v5079_v22 = vmul.f32 %v4989_v26, %v4766_v2 }
 0x24e   :  { %v5066_v6 = vpop.eup %3462  ;;  %3488 = vpow2.f32 %v1515_v9  ;;  %v5081_v56 = vmul.f32 1.442695, %v3066_v33  ;;  %v5084_v35 = vadd.f32 %v847_v10, %v4686_v57  ;;  %2615 = vmatmul.mubr.bf16.gmra.mxu0 %v2247_v48  ;;  %2784 = vmatmul.mubr.bf16.gmra.mxu1 %v2249_v54  ;;  %v2126_v29 = vmul.f32 %v4996_v21, %v4770_v5  ;;  %v853_v9 = vpop.f32.mrf.mxu0 }
 0x24f   :  { %v3465_v13 = vpop.eup %3464  ;;  %3490 = vpow2.f32 %v1519_v20  ;;  %v5088_v1 = vmul.f32 1.442695, %v3068_v4  ;;  %v5092_v2 = vmul.f32 %v5004_v59, %v4773_v52  ;;  %v3069_v10 = vmul.f32 -1.702, %v5062_v46 }
 0x250   :  { %v3467_v31 = vpop.eup %3466  ;;  %v1731_v45 = vadd.f32 1.0, %v3465_v13  ;;  %3492 = vpow2.f32 %v1517_v60  ;;  %v5095_v20 = vmul.f32 1.442695, %v3067_v41  ;;  %v5098_v5 = vadd.f32 %v1050_v19, %v4688_v43  ;;  %v855_v19 = vpop.f32.mrf.mxu0 }
 0x251   :  { %v3469_v51 = vpop.eup %3468  ;;  %v1733_v26 = vadd.f32 1.0, %v3467_v31  ;;  %3494 = vpow2.f32 %v1521_v50  ;;  %v5102_v33 = vmul.f32 %v5010_v49, %v4777_v18  ;;  %v3070_v59 = vmul.f32 -1.702, %v5084_v35  ;;  %v1058_v49 = vpop.f32.mrf.mxu1 }
 0x252   :  { %v3471_v17 = vpop.eup %3470  ;;  %3496 = vrcp.f32 %v1731_v45  ;;  %v1732_v37 = vadd.f32 1.0, %v3469_v51  ;;  %v2128_v60 = vmul.f32 %v5018_v23, %v4780_v63  ;;  %v2130_v50 = vmul.f32 %v5023_v38, %v4784_v55  ;;  %v6072_v38 = vld [vmem:[#allocation2_spill] sm:$0xff] }
 0x253   :  { %v3473_v21 = vpop.eup %3472  ;;  %3498 = vrcp.f32 %v1733_v26  ;;  %v1734_v52 = vadd.f32 1.0, %v3471_v17  ;;  %v5109_v41 = vmul.f32 1.442695, %v3069_v10  ;;  %v5112_v18 = vadd.f32 %v849_v11, %v4690_v27  ;;  %v857_v17 = vpop.f32.mrf.mxu0 }
 0x254   :  { %v3475_v0 = vpop.eup %3474  ;;  %3500 = vrcp.f32 %v1732_v37  ;;  %v1735_v4 = vadd.f32 1.0, %v3473_v21  ;;  %v3072_v63 = vmul.f32 -1.702, %v5098_v5  ;;  %v5116_v23 = vadd.f32 %v1052_v42, %v4692_v25 }
 0x255   :  { %v3477_v48 = vpop.eup %3476  ;;  %3502 = vrcp.f32 %v1734_v52  ;;  %v1737_v54 = vadd.f32 1.0, %v3475_v0  ;;  %v5120_v45 = vmul.f32 %v5026_v53, %v6072_v38  ;;  %v5122_v26 = vmul.f32 1.442695, %v3070_v59  ;;  %v6073_v0 = vld [vmem:[#allocation3_spill] sm:$0xff] }
 0x256   :  { %v3479_v13 = vpop.eup %3478  ;;  %3504 = vrcp.f32 %v1735_v4  ;;  %v1736_v31 = vadd.f32 1.0, %v3477_v48  ;;  %v2252_v37 = vpack.c.bf16 %v2128_v60, %v5079_v22  ;;  %v2254_v21 = vpack.c.bf16 %v2130_v50, %v2126_v29  ;;  %v1060_v48 = vpop.f32.mrf.mxu1 }
 0x257   :  { %v3481_v55 = vpop.eup %3480  ;;  %3506 = vrcp.f32 %v1737_v54  ;;  %v1738_v51 = vadd.f32 1.0, %v3479_v13  ;;  %v5127_v42 = vmul.f32 %v5032_v47, %v6073_v0  ;;  %v3071_v53 = vmul.f32 -1.702, %v5112_v18  ;;  %v6077_v0 = vld [vmem:[#allocation5_spill] sm:$0xff] }
 0x258   :  { %v3483_v11 = vpop.eup %3482  ;;  %3508 = vrcp.f32 %v1736_v31  ;;  %v1739_v10 = vadd.f32 1.0, %v3481_v55  ;;  %v5130_v13 = vmul.f32 1.442695, %v3072_v63  ;;  %v5133_v31 = vadd.f32 %v853_v9, %v4686_v57  ;;  %2622 = vmatprep.mubr.bf16.mxu0 %v2252_v37  ;;  %2791 = vmatprep.mubr.bf16.mxu1 %v2254_v21  ;;  %v859_v9 = vpop.f32.mrf.mxu0 }
 0x259   :  { %v3485_v52 = vpop.eup %3484  ;;  %3510 = vrcp.f32 %v1738_v51  ;;  %v1741_v4 = vadd.f32 1.0, %v3483_v11  ;;  %v2251_v47 = vpack.c.bf16 %v5092_v2, %v5070_v16  ;;  %v2253_v60 = vpack.c.bf16 %v5102_v33, %v5074_v12  ;;  %v1062_v2 = vpop.f32.mrf.mxu1  ;;  %v6076_v33 = vld [vmem:[#allocation4_spill] sm:$0xff] }
 0x25a   :  { %v3487_v54 = vpop.eup %3486  ;;  %3512 = vrcp.f32 %v1739_v10  ;;  %v1740_v59 = vadd.f32 1.0, %v3485_v52  ;;  %v3073_v63 = vmul.f32 -1.702, %v5116_v23  ;;  %v5141_v38 = vadd.f32 %v1056_v28, %v4688_v43 }
 0x25b   :  { %v3489_v22 = vpop.eup %3488  ;;  %3514 = vrcp.f32 %v1741_v4  ;;  %v1742_v29 = vadd.f32 1.0, %v3487_v54  ;;  %v5144_v10 = vadd.f32 %v855_v19, %v4690_v27  ;;  %v5147_v16 = vadd.f32 %v1058_v49, %v4692_v25  ;;  %2623 = vmatmul.mubr.bf16.gmra.mxu0 %v2251_v47  ;;  %2792 = vmatmul.mubr.bf16.gmra.mxu1 %v2253_v60  ;;  %v863_v47 = vpop.f32.mrf.mxu0 }
 0x25c   :  { %v3491_v50 = vpop.eup %3490  ;;  %3516 = vrcp.f32 %v1740_v59  ;;  %v1743_v55 = vadd.f32 1.0, %v3489_v22  ;;  %v2132_v37 = vmul.f32 %v5039_v3, %v6076_v33  ;;  %v1533_v21 = vmul.f32 1.442695, %v3071_v53  ;;  %v6078_v59 = vld [vmem:[#allocation6_spill] sm:$0xff] }
 0x25d   :  { %v3493_v51 = vpop.eup %3492  ;;  %3518 = vrcp.f32 %v1742_v29  ;;  %v1745_v11 = vadd.f32 1.0, %v3491_v50  ;;  %6074 = vst [vmem:[#allocation2_spill] sm:$0xff] %v5144_v10  ;;  %6075 = vst [vmem:[#allocation3_spill] sm:$0xff] %v5147_v16  ;;  %v2134_v4 = vmul.f32 %v5045_v61, %v6077_v0  ;;  %v3074_v49 = vmul.f32 -1.702, %v5133_v31  ;;  %v6079_v29 = vld [vmem:[#allocation7_spill] sm:$0xff] }
 0x25e   :  { %v3495_v12 = vpop.eup %3494  ;;  %3520 = vrcp.f32 %v1743_v55  ;;  %v1744_v28 = vadd.f32 1.0, %v3493_v51  ;;  %v5160_v22 = vmul.f32 %v5052_v39, %v6078_v59  ;;  %v5164_v3 = vmul.f32 %v5056_v40, %v6079_v29  ;;  %v1066_v51 = vpop.f32.mrf.mxu1  ;;  %v6080_v39 = vld [vmem:[#allocation8_spill] sm:$0xff]  ;;  %v6081_v40 = vld [vmem:[#allocation9_spill] sm:$0xff] }
 0x25f   :  { %v5151_v52 = vpop.eup %3496  ;;  %3522 = vrcp.f32 %v1745_v11  ;;  %v1746_v19 = vadd.f32 1.0, %v3495_v12  ;;  %v1537_v53 = vmul.f32 1.442695, %v3073_v63  ;;  %v3076_v61 = vmul.f32 -1.702, %v5141_v38 }
 0x260   :  { %v5156_v54 = vpop.eup %3498  ;;  %3524 = vrcp.f32 %v1744_v28  ;;  %v3075_v50 = vmul.f32 -1.702, %v5144_v10  ;;  %v3077_v55 = vmul.f32 -1.702, %v5147_v16  ;;  %v2136_v12 = vmul.f32 %v5059_v8, %v6080_v39 }
 0x261   :  { %v5166_v60 = vpop.eup %3500  ;;  %3526 = vrcp.f32 %v1746_v19  ;;  %v2138_v33 = vmul.f32 %v5066_v6, %v6081_v40  ;;  %v5179_v63 = vadd.f32 %v857_v17, %v4686_v57  ;;  %v1539_v0 = vmul.f32 1.442695, %v3074_v49 }
 0x262   :  { %v5171_v11 = vpop.eup %3502  ;;  %3528 = vpow2.f32 %v5081_v56  ;;  %v5185_v19 = vadd.f32 %v1060_v48, %v4688_v43  ;;  %v5188_v59 = vadd.f32 %v859_v9, %v4690_v27  ;;  %v5194_v6 = vadd.f32 %v1062_v2, %v4692_v25  ;;  %v1068_v2 = vpop.f32.mrf.mxu1 }
 0x263   :  { %v5181_v28 = vpop.eup %3504  ;;  %3530 = vpow2.f32 %v5088_v1  ;;  %v5197_v56 = vadd.f32 %v863_v47, %v4686_v57  ;;  %v5200_v17 = vadd.f32 %v1066_v51, %v4688_v43  ;;  %v865_v1 = vpop.f32.mrf.mxu0  ;;  %v1543_v48 = vmul.f32 1.442695, %v3076_v61 }
 0x264   :  { %v5190_v8 = vpop.eup %3506  ;;  %3532 = vpow2.f32 %v5095_v20  ;;  %v1541_v9 = vmul.f32 1.442695, %v3075_v50  ;;  %v1545_v29 = vmul.f32 1.442695, %v3077_v55  ;;  %v3078_v20 = vmul.f32 -1.702, %v5179_v63 }
 0x265   :  { %6082 = vst [vmem:[#allocation4_spill] sm:$0xff] %v5197_v56  ;;  %6083 = vst [vmem:[#allocation5_spill] sm:$0xff] %v5200_v17  ;;  %v3509_v49 = vpop.eup %3508  ;;  %3534 = vpow2.f32 %v5109_v41  ;;  %v2256_v40 = vpack.c.bf16 %v2136_v12, %v2132_v37  ;;  %v2258_v16 = vpack.c.bf16 %v2138_v33, %v2134_v4  ;;  %v3080_v51 = vmul.f32 -1.702, %v5185_v19  ;;  %v867_v4 = vpop.f32.mrf.mxu0 }
 0x266   :  { %v3511_v39 = vpop.eup %3510  ;;  %3536 = vpow2.f32 %v5122_v26  ;;  %v3079_v10 = vmul.f32 -1.702, %v5188_v59  ;;  %v5211_v41 = vadd.f32 %v865_v1, %v4690_v27  ;;  %v3081_v26 = vmul.f32 -1.702, %v5194_v6 }
 0x267   :  { %v5205_v47 = vpop.eup %3512  ;;  %3538 = vpow2.f32 %v5130_v13  ;;  %v3082_v50 = vmul.f32 -1.702, %v5197_v56  ;;  %v3084_v37 = vmul.f32 -1.702, %v5200_v17  ;;  %2630 = vmatprep.mubr.bf16.mxu0 %v2256_v40  ;;  %2799 = vmatprep.mubr.bf16.mxu1 %v2258_v16  ;;  %v5221_v55 = vadd.f32 %v1068_v2, %v4692_v25  ;;  %v1070_v2 = vpop.f32.mrf.mxu1 }
 0x268   :  { %6084 = vst [vmem:[#allocation6_spill] sm:$0xff] %v5211_v41  ;;  %v5213_v61 = vpop.eup %3514  ;;  %3540 = vpow2.f32 %v1533_v21  ;;  %v2255_v12 = vpack.c.bf16 %v5160_v22, %v5120_v45  ;;  %v2257_v21 = vpack.c.bf16 %v5164_v3, %v5127_v42  ;;  %v1547_v1 = vmul.f32 1.442695, %v3078_v20 }
 0x269   :  { %v5218_v13 = vpop.eup %3516  ;;  %3542 = vpow2.f32 %v1537_v53  ;;  %6085 = vst [vmem:[#allocation7_spill] sm:$0xff] %v5221_v55  ;;  %v1551_v40 = vmul.f32 1.442695, %v3080_v51  ;;  %v3083_v16 = vmul.f32 -1.702, %v5211_v41  ;;  %v5231_v53 = vadd.f32 %v867_v4, %v4686_v57 }
 0x26a   :  { %v3519_v33 = vpop.eup %3518  ;;  %3544 = vpow2.f32 %v1539_v0  ;;  %2631 = vmatmul.mubr.bf16.gmra.mxu0 %v2255_v12  ;;  %2800 = vmatmul.mubr.bf16.gmra.mxu1 %v2257_v21  ;;  %v1549_v45 = vmul.f32 1.442695, %v3079_v10  ;;  %v1553_v42 = vmul.f32 1.442695, %v3081_v26  ;;  %v5235_v3 = vmul.f32 1.442695, %v3082_v50 }
 0x26b   :  { %v5227_v56 = vpop.eup %3520  ;;  %3546 = vpow2.f32 %v1543_v48  ;;  %6086 = vst [vmem:[#allocation8_spill] sm:$0xff] %v5231_v53  ;;  %v5237_v0 = vmul.f32 1.442695, %v3084_v37  ;;  %v5240_v48 = vmul.f32 -1.702, %v5221_v55  ;;  %v2139_v51 = vmul.f32 %v5151_v52, %v4871_v15 }
 0x26c   :  { %v5233_v17 = vpop.eup %3522  ;;  %3548 = vpow2.f32 %v1541_v9  ;;  %v2141_v4 = vmul.f32 %v5156_v54, %v4886_v30  ;;  %v5247_v10 = vadd.f32 %v1070_v2, %v4688_v43  ;;  %v869_v9 = vpop.f32.mrf.mxu0  ;;  %v2140_v26 = vmul.f32 %v5166_v60, %v4909_v32  ;;  %v6087_v2 = vld [vmem:[#allocation10_spill] sm:$0xff] }
 0x26d   :  { %v3525_v22 = vpop.eup %3524  ;;  %3550 = vpow2.f32 %v1545_v29  ;;  %v5251_v50 = vmul.f32 1.442695, %v3083_v16  ;;  %v5254_v37 = vmul.f32 -1.702, %v5231_v53  ;;  %v2144_v15 = vmul.f32 %v3509_v49, %v4953_v44  ;;  %v1072_v60 = vpop.f32.mrf.mxu1 }
 0x26e   :  { %v3527_v20 = vpop.eup %3526  ;;  %3552 = vpow2.f32 %v1547_v1  ;;  %v2146_v30 = vmul.f32 %v3511_v39, %v4959_v62  ;;  %v2142_v21 = vmul.f32 %v5171_v11, %v4926_v58  ;;  %v5261_v32 = vadd.f32 %v869_v9, %v4690_v27  ;;  %v873_v49 = vpop.f32.mrf.mxu0  ;;  %v6088_v58 = vld [vmem:[#allocation17_spill] sm:$0xff] }
 0x26f   :  { %v3529_v29 = vpop.eup %3528  ;;  %3554 = vpow2.f32 %v1551_v40  ;;  %v2143_v16 = vmul.f32 %v5181_v28, %v4931_v36  ;;  %v2145_v44 = vmul.f32 %v5190_v8, %v6087_v2  ;;  %v2154_v11 = vmul.f32 %v3527_v20, %v6088_v58  ;;  %v6089_v36 = vld [vmem:[#allocation13_spill] sm:$0xff]  ;;  %v6090_v8 = vld [vmem:[#allocation14_spill] sm:$0xff]  ;;  %v1076_v2 = vpop.f32.mrf.mxu1 }
 0x270   :  { %v3531_v12 = vpop.eup %3530  ;;  %v1747_v52 = vadd.f32 1.0, %v3529_v29  ;;  %3556 = vpow2.f32 %v1549_v45  ;;  %v2152_v45 = vmul.f32 %v3525_v22, %v5013_v14  ;;  %v2262_v55 = vpack.c.bf16 %v2146_v30, %v2142_v21  ;;  %v875_v22 = vpop.f32.mrf.mxu0 }
 0x271   :  { %v3533_v54 = vpop.eup %3532  ;;  %v1749_v1 = vadd.f32 1.0, %v3531_v12  ;;  %3558 = vpow2.f32 %v1553_v42  ;;  %v2260_v12 = vpack.c.bf16 %v2144_v15, %v2140_v26  ;;  %v2148_v28 = vmul.f32 %v5218_v13, %v6089_v36 }
 0x272   :  { %v3535_v40 = vpop.eup %3534  ;;  %3560 = vrcp.f32 %v1747_v52  ;;  %v1748_v62 = vadd.f32 1.0, %v3533_v54  ;;  %v2150_v52 = vmul.f32 %v3519_v33, %v6090_v8  ;;  %2807 = vmatprep.mubr.bf16.mxu1 %v2262_v55  ;;  %v2259_v20 = vpack.c.bf16 %v2143_v16, %v2139_v51 }
 0x273   :  { %v3537_v39 = vpop.eup %3536  ;;  %3562 = vrcp.f32 %v1749_v1  ;;  %v1750_v42 = vadd.f32 1.0, %v3535_v40  ;;  %2638 = vmatprep.mubr.bf16.mxu0 %v2260_v12  ;;  %v2261_v1 = vpack.c.bf16 %v2145_v44, %v2141_v4  ;;  %v2264_v15 = vpack.c.bf16 %v2152_v45, %v2148_v28  ;;  %v6091_v44 = vld [vmem:[#allocation15_spill] sm:$0xff]  ;;  %v6092_v45 = vld [vmem:[#allocation16_spill] sm:$0xff] }
 0x274   :  { %v3539_v9 = vpop.eup %3538  ;;  %3564 = vrcp.f32 %v1748_v62  ;;  %v1751_v29 = vadd.f32 1.0, %v3537_v39  ;;  %v2266_v30 = vpack.c.bf16 %v2154_v11, %v2150_v52  ;;  %v3088_v33 = vmul.f32 -1.702, %v5247_v10  ;;  %2639 = vmatmul.mubr.bf16.gmra.mxu0 %v2259_v20  ;;  %v877_v11 = vpop.f32.mrf.mxu0  ;;  %v6094_v28 = vld [vmem:[#allocation12_spill] sm:$0xff] }
 0x275   :  { %v3541_v53 = vpop.eup %3540  ;;  %3566 = vrcp.f32 %v1750_v42  ;;  %v1753_v54 = vadd.f32 1.0, %v3539_v9  ;;  %v5274_v62 = vadd.f32 %v1072_v60, %v4692_v25  ;;  %2808 = vmatmul.mubr.bf16.gmra.mxu1 %v2261_v1  ;;  %v3087_v51 = vmul.f32 -1.702, %v5261_v32  ;;  %2646 = vmatprep.mubr.bf16.mxu0 %v2264_v15  ;;  %v6093_v9 = vld [vmem:[#allocation11_spill] sm:$0xff] }
 0x276   :  { %v3543_v41 = vpop.eup %3542  ;;  %3568 = vrcp.f32 %v1751_v29  ;;  %v1752_v14 = vadd.f32 1.0, %v3541_v53  ;;  %v5278_v4 = vadd.f32 %v873_v49, %v4686_v57  ;;  %2815 = vmatprep.mubr.bf16.mxu1 %v2266_v30  ;;  %v2151_v39 = vmul.f32 %v5227_v56, %v6091_v44 }
 0x277   :  { %v3545_v40 = vpop.eup %3544  ;;  %3570 = vrcp.f32 %v1753_v54  ;;  %v1754_v26 = vadd.f32 1.0, %v3543_v41  ;;  %v1078_v41 = vpop.f32.mrf.mxu1  ;;  %v2153_v60 = vmul.f32 %v5233_v17, %v6092_v45  ;;  %v2147_v29 = vmul.f32 %v5205_v47, %v6093_v9 }
 0x278   :  { %v3547_v21 = vpop.eup %3546  ;;  %3572 = vrcp.f32 %v1752_v14  ;;  %v1755_v13 = vadd.f32 1.0, %v3545_v40  ;;  %v5287_v12 = vadd.f32 %v1076_v2, %v4688_v43  ;;  %v2149_v8 = vmul.f32 %v5213_v61, %v6094_v28  ;;  %v879_v40 = vpop.f32.mrf.mxu0 }
 0x279   :  { %v3549_v53 = vpop.eup %3548  ;;  %3574 = vrcp.f32 %v1754_v26  ;;  %v1757_v55 = vadd.f32 1.0, %v3547_v21  ;;  %v5292_v17 = vadd.f32 %v875_v22, %v4690_v27  ;;  %v3089_v14 = vmul.f32 -1.702, %v5274_v62  ;;  %v1080_v20 = vpop.f32.mrf.mxu1 }
 0x27a   :  { %v3551_v16 = vpop.eup %3550  ;;  %3576 = vrcp.f32 %v1755_v13  ;;  %v1756_v58 = vadd.f32 1.0, %v3549_v53  ;;  %v3090_v47 = vmul.f32 -1.702, %v5278_v4  ;;  %v2263_v26 = vpack.c.bf16 %v2151_v39, %v2147_v29 }
 0x27b   :  { %v3553_v42 = vpop.eup %3552  ;;  %3578 = vrcp.f32 %v1757_v55  ;;  %v1758_v49 = vadd.f32 1.0, %v3551_v16  ;;  %v2265_v15 = vpack.c.bf16 %v2153_v60, %v2149_v8  ;;  %v3092_v22 = vmul.f32 -1.702, %v5287_v12  ;;  %v1082_v60 = vpop.f32.mrf.mxu1 }
 0x27c   :  { %v3555_v36 = vpop.eup %3554  ;;  %3580 = vrcp.f32 %v1756_v58  ;;  %v1759_v56 = vadd.f32 1.0, %v3553_v42  ;;  %v5298_v21 = vadd.f32 %v1078_v41, %v4692_v25  ;;  %v1561_v53 = vmul.f32 1.442695, %v5240_v48  ;;  %2647 = vmatmul.mubr.bf16.gmra.mxu0 %v2263_v26 }
 0x27d   :  { %v3557_v52 = vpop.eup %3556  ;;  %3582 = vrcp.f32 %v1758_v49  ;;  %v1761_v54 = vadd.f32 1.0, %v3555_v36  ;;  %v3091_v55 = vmul.f32 -1.702, %v5292_v17  ;;  %v5303_v16 = vadd.f32 %v877_v11, %v4686_v57  ;;  %2816 = vmatmul.mubr.bf16.gmra.mxu1 %v2265_v15 }
 0x27e   :  { %v3559_v1 = vpop.eup %3558  ;;  %3584 = vrcp.f32 %v1759_v56  ;;  %v1760_v2 = vadd.f32 1.0, %v3557_v52  ;;  %v1563_v39 = vmul.f32 1.442695, %v5254_v37  ;;  %v5307_v45 = vadd.f32 %v1080_v20, %v4688_v43 }
 0x27f   :  { %v3561_v61 = vpop.eup %3560  ;;  %3586 = vrcp.f32 %v1761_v54  ;;  %v1762_v30 = vadd.f32 1.0, %v3559_v1  ;;  %v5310_v41 = vadd.f32 %v879_v40, %v4690_v27  ;;  %v1567_v48 = vmul.f32 1.442695, %v3088_v33 }
 0x280   :  { %v3563_v13 = vpop.eup %3562  ;;  %3588 = vrcp.f32 %v1760_v2  ;;  %v1565_v42 = vmul.f32 1.442695, %v3087_v51  ;;  %v1569_v11 = vmul.f32 1.442695, %v3089_v14  ;;  %v1571_v29 = vmul.f32 1.442695, %v3090_v47 }
 0x281   :  { %v3565_v44 = vpop.eup %3564  ;;  %3590 = vrcp.f32 %v1762_v30  ;;  %v1575_v49 = vmul.f32 1.442695, %v3092_v22  ;;  %v3093_v37 = vmul.f32 -1.702, %v5298_v21  ;;  %v1573_v28 = vmul.f32 1.442695, %v3091_v55 }
 0x282   :  { %v3567_v58 = vpop.eup %3566  ;;  %3592 = vpow2.f32 %v5235_v3  ;;  %v3094_v8 = vmul.f32 -1.702, %v5303_v16  ;;  %v5318_v56 = vadd.f32 %v1082_v60, %v4692_v25  ;;  %v3096_v51 = vmul.f32 -1.702, %v5307_v45 }
 0x283   :  { %v3569_v9 = vpop.eup %3568  ;;  %3594 = vpow2.f32 %v5237_v0  ;;  %v3095_v0 = vmul.f32 -1.702, %v5310_v41  ;;  %v2156_v54 = vmul.f32 %v3565_v44, %v5048_v24  ;;  %v2155_v20 = vmul.f32 %v3561_v61, %v5030_v7 }
 0x284   :  { %v3571_v36 = vpop.eup %3570  ;;  %3596 = vpow2.f32 %v5251_v50  ;;  %v2159_v33 = vmul.f32 %v3569_v9, %v5084_v35  ;;  %v2158_v1 = vmul.f32 %v3567_v58, %v5062_v46  ;;  %v2157_v40 = vmul.f32 %v3563_v13, %v5037_v34 }
 0x285   :  { %v3573_v3 = vpop.eup %3572  ;;  %3598 = vpow2.f32 %v1561_v53  ;;  %v2161_v14 = vmul.f32 %v3571_v36, %v5098_v5  ;;  %v3097_v26 = vmul.f32 -1.702, %v5318_v56  ;;  %v1577_v5 = vmul.f32 1.442695, %v3093_v37  ;;  %v6096_v36 = vld [vmem:[#allocation3_spill] sm:$0xff] }
 0x286   :  { %v3575_v52 = vpop.eup %3574  ;;  %v2160_v50 = vmul.f32 %v3573_v3, %v5112_v18  ;;  %3600 = vpow2.f32 %v1563_v39  ;;  %v2267_v30 = vpack.c.bf16 %v2159_v33, %v2155_v20  ;;  %v1579_v7 = vmul.f32 1.442695, %v3094_v8 }
 0x287   :  { %v3577_v47 = vpop.eup %3576  ;;  %v2162_v35 = vmul.f32 %v3575_v52, %v5116_v23  ;;  %3602 = vpow2.f32 %v1567_v48  ;;  %v2269_v46 = vpack.c.bf16 %v2161_v14, %v2157_v40  ;;  %v1583_v23 = vmul.f32 1.442695, %v3096_v51  ;;  %v6095_v48 = vld [vmem:[#allocation2_spill] sm:$0xff] }
 0x288   :  { %v3579_v2 = vpop.eup %3578  ;;  %3604 = vpow2.f32 %v1565_v42  ;;  %v2268_v24 = vpack.c.bf16 %v2160_v50, %v2156_v54  ;;  %v1581_v13 = vmul.f32 1.442695, %v3095_v0  ;;  %v1585_v53 = vmul.f32 1.442695, %v3097_v26 }
 0x289   :  { %v3581_v15 = vpop.eup %3580  ;;  %3606 = vpow2.f32 %v1569_v11  ;;  %v2270_v18 = vpack.c.bf16 %v2162_v35, %v2158_v1  ;;  %v2163_v44 = vmul.f32 %v3577_v47, %v5133_v31  ;;  %v2165_v39 = vmul.f32 %v3579_v2, %v5141_v38 }
 0x28a   :  { %v3583_v22 = vpop.eup %3582  ;;  %3608 = vpow2.f32 %v1571_v29  ;;  %2654 = vmatprep.mubr.bf16.mxu0 %v2268_v24  ;;  %v2164_v42 = vmul.f32 %v3581_v15, %v6095_v48 }
 0x28b   :  { %v3585_v61 = vpop.eup %3584  ;;  %3610 = vpow2.f32 %v1575_v49  ;;  %2823 = vmatprep.mubr.bf16.mxu1 %v2270_v18  ;;  %2655 = vmatmul.mubr.bf16.gmra.mxu0 %v2267_v30 }
 0x28c   :  { %v3587_v34 = vpop.eup %3586  ;;  %3612 = vpow2.f32 %v1573_v28  ;;  %2824 = vmatmul.mubr.bf16.gmra.mxu1 %v2269_v46  ;;  %v2167_v60 = vmul.f32 %v3585_v61, %v5179_v63  ;;  %v2166_v28 = vmul.f32 %v3583_v22, %v6096_v36 }
 0x28d   :  { %v3589_v55 = vpop.eup %3588  ;;  %3614 = vpow2.f32 %v1577_v5  ;;  %v2169_v11 = vmul.f32 %v3587_v34, %v5185_v19 }
 0x28e   :  { %v3591_v58 = vpop.eup %3590  ;;  %v2168_v9 = vmul.f32 %v3589_v55, %v5188_v59  ;;  %3616 = vpow2.f32 %v1579_v7  ;;  %v883_v29 = vpop.f32.mrf.mxu0  ;;  %v2271_v54 = vpack.c.bf16 %v2167_v60, %v2163_v44 }
 0x28f   :  { %v1086_v49 = vpop.f32.mrf.mxu1  ;;  %v3593_v37 = vpop.eup %3592  ;;  %v2170_v31 = vmul.f32 %v3591_v58, %v5194_v6  ;;  %3618 = vpow2.f32 %v1583_v23  ;;  %v5340_v38 = vadd.f32 %v883_v29, %v4686_v57  ;;  %v2273_v50 = vpack.c.bf16 %v2169_v11, %v2165_v39 }
 0x290   :  { %v3595_v63 = vpop.eup %3594  ;;  %v1763_v8 = vadd.f32 1.0, %v3593_v37  ;;  %3620 = vpow2.f32 %v1581_v13  ;;  %v2272_v3 = vpack.c.bf16 %v2168_v9, %v2164_v42  ;;  %v5343_v19 = vadd.f32 %v1086_v49, %v4688_v43  ;;  %v885_v59 = vpop.f32.mrf.mxu0 }
 0x291   :  { %v1088_v33 = vpop.f32.mrf.mxu1  ;;  %v3597_v51 = vpop.eup %3596  ;;  %v1765_v0 = vadd.f32 1.0, %v3595_v63  ;;  %3622 = vpow2.f32 %v1585_v53  ;;  %v2274_v52 = vpack.c.bf16 %v2170_v31, %v2166_v28  ;;  %v5346_v47 = vadd.f32 %v885_v59, %v4690_v27 }
 0x292   :  { %v3599_v14 = vpop.eup %3598  ;;  %3624 = vrcp.f32 %v1763_v8  ;;  %v1764_v6 = vadd.f32 1.0, %v3597_v51  ;;  %2662 = vmatprep.mubr.bf16.mxu0 %v2272_v3  ;;  %v887_v20 = vpop.f32.mrf.mxu0  ;;  %v3098_v40 = vmul.f32 -1.702, %v5340_v38  ;;  %v3100_v15 = vmul.f32 -1.702, %v5343_v19 }
 0x293   :  { %v1090_v1 = vpop.f32.mrf.mxu1  ;;  %v3601_v35 = vpop.eup %3600  ;;  %3626 = vrcp.f32 %v1765_v0  ;;  %v1766_v2 = vadd.f32 1.0, %v3599_v14  ;;  %2831 = vmatprep.mubr.bf16.mxu1 %v2274_v52  ;;  %2663 = vmatmul.mubr.bf16.gmra.mxu0 %v2271_v54  ;;  %v3099_v61 = vmul.f32 -1.702, %v5346_v47  ;;  %v5352_v23 = vadd.f32 %v1088_v33, %v4692_v25 }
 0x294   :  { %v3603_v26 = vpop.eup %3602  ;;  %3628 = vrcp.f32 %v1764_v6  ;;  %v1767_v24 = vadd.f32 1.0, %v3601_v35  ;;  %2832 = vmatmul.mubr.bf16.gmra.mxu1 %v2273_v50  ;;  %v889_v5 = vpop.f32.mrf.mxu0  ;;  %v1587_v44 = vmul.f32 1.442695, %v3098_v40  ;;  %v5355_v39 = vadd.f32 %v887_v20, %v4686_v57 }
 0x295   :  { %v1092_v18 = vpop.f32.mrf.mxu1  ;;  %v3605_v30 = vpop.eup %3604  ;;  %3630 = vrcp.f32 %v1766_v2  ;;  %v1769_v22 = vadd.f32 1.0, %v3603_v26  ;;  %v1591_v48 = vmul.f32 1.442695, %v3100_v15  ;;  %v5358_v42 = vadd.f32 %v1090_v1, %v4688_v43 }
 0x296   :  { %v3607_v7 = vpop.eup %3606  ;;  %3632 = vrcp.f32 %v1767_v24  ;;  %v1768_v46 = vadd.f32 1.0, %v3605_v30  ;;  %v893_v34 = vpop.f32.mrf.mxu0  ;;  %v5361_v29 = vadd.f32 %v889_v5, %v4690_v27  ;;  %v5364_v49 = vadd.f32 %v1092_v18, %v4692_v25 }
 0x297   :  { %v1096_v13 = vpop.f32.mrf.mxu1  ;;  %v3609_v53 = vpop.eup %3608  ;;  %3634 = vrcp.f32 %v1769_v22  ;;  %v1770_v55 = vadd.f32 1.0, %v3607_v7  ;;  %v1589_v31 = vmul.f32 1.442695, %v3099_v61  ;;  %v3101_v63 = vmul.f32 -1.702, %v5352_v23 }
 0x298   :  { %v3611_v60 = vpop.eup %3610  ;;  %3636 = vrcp.f32 %v1768_v46  ;;  %v1771_v58 = vadd.f32 1.0, %v3609_v53  ;;  %v895_v37 = vpop.f32.mrf.mxu0  ;;  %v3102_v33 = vmul.f32 -1.702, %v5355_v39  ;;  %v5369_v51 = vadd.f32 %v893_v34, %v4686_v57 }
 0x299   :  { %v3613_v11 = vpop.eup %3612  ;;  %3638 = vrcp.f32 %v1770_v55  ;;  %v1773_v9 = vadd.f32 1.0, %v3611_v60  ;;  %v1098_v8 = vpop.f32.mrf.mxu1  ;;  %v3104_v54 = vmul.f32 -1.702, %v5358_v42  ;;  %v5373_v14 = vadd.f32 %v1096_v13, %v4688_v43 }
 0x29a   :  { %v3615_v36 = vpop.eup %3614  ;;  %3640 = vrcp.f32 %v1771_v58  ;;  %v1772_v28 = vadd.f32 1.0, %v3613_v11  ;;  %v3103_v20 = vmul.f32 -1.702, %v5361_v29  ;;  %v3105_v1 = vmul.f32 -1.702, %v5364_v49  ;;  %v897_v35 = vpop.f32.mrf.mxu0 }
 0x29b   :  { %v3617_v3 = vpop.eup %3616  ;;  %3642 = vrcp.f32 %v1773_v9  ;;  %v1774_v59 = vadd.f32 1.0, %v3615_v36  ;;  %v3106_v26 = vmul.f32 -1.702, %v5369_v51  ;;  %v5379_v24 = vadd.f32 %v895_v37, %v4690_v27  ;;  %v1100_v15 = vpop.f32.mrf.mxu1  ;;  %v6097_v9 = vld [vmem:[#allocation4_spill] sm:$0xff] }
 0x29c   :  { %v3619_v0 = vpop.eup %3618  ;;  %3644 = vrcp.f32 %v1772_v28  ;;  %v1775_v52 = vadd.f32 1.0, %v3617_v3  ;;  %v1593_v30 = vmul.f32 1.442695, %v3101_v63  ;;  %v3108_v22 = vmul.f32 -1.702, %v5373_v14  ;;  %v899_v58 = vpop.f32.mrf.mxu0 }
 0x29d   :  { %v3621_v6 = vpop.eup %3620  ;;  %3646 = vrcp.f32 %v1774_v59  ;;  %v1777_v50 = vadd.f32 1.0, %v3619_v0  ;;  %v1595_v46 = vmul.f32 1.442695, %v3102_v33  ;;  %v1599_v61 = vmul.f32 1.442695, %v3104_v54  ;;  %v1102_v63 = vpop.f32.mrf.mxu1  ;;  %v6098_v59 = vld [vmem:[#allocation5_spill] sm:$0xff] }
 0x29e   :  { %v3623_v2 = vpop.eup %3622  ;;  %3648 = vrcp.f32 %v1775_v52  ;;  %v1776_v40 = vadd.f32 1.0, %v3621_v6  ;;  %v5383_v34 = vadd.f32 %v1098_v8, %v4692_v25  ;;  %v1597_v53 = vmul.f32 1.442695, %v3103_v20  ;;  %v6099_v54 = vld [vmem:[#allocation6_spill] sm:$0xff] }
 0x29f   :  { %v3625_v5 = vpop.eup %3624  ;;  %3650 = vrcp.f32 %v1777_v50  ;;  %v1778_v18 = vadd.f32 1.0, %v3623_v2  ;;  %v1601_v55 = vmul.f32 1.442695, %v3105_v1  ;;  %v3107_v60 = vmul.f32 -1.702, %v5379_v24  ;;  %v6100_v1 = vld [vmem:[#allocation8_spill] sm:$0xff] }
 0x2a0   :  { %v3627_v7 = vpop.eup %3626  ;;  %3652 = vrcp.f32 %v1776_v40  ;;  %v2171_v37 = vmul.f32 %v3625_v5, %v6097_v9  ;;  %v1603_v36 = vmul.f32 1.442695, %v3106_v26  ;;  %v5388_v28 = vadd.f32 %v897_v35, %v4686_v57  ;;  %v5403_v40 = vpop.f32.mrf.mxu0 }
 0x2a1   :  { %v3629_v13 = vpop.eup %3628  ;;  %3654 = vrcp.f32 %v1778_v18  ;;  %v2173_v8 = vmul.f32 %v3627_v7, %v6098_v59  ;;  %v1607_v33 = vmul.f32 1.442695, %v3108_v22  ;;  %v5392_v0 = vadd.f32 %v1100_v15, %v4688_v43  ;;  %v5408_v18 = vpop.f32.mrf.mxu1  ;;  %v6101_v7 = vld [vmem:[#allocation7_spill] sm:$0xff] }
 0x2a2   :  { %v3631_v11 = vpop.eup %3630  ;;  %3656 = vpow2.f32 %v1587_v44  ;;  %v2172_v6 = vmul.f32 %v3629_v13, %v6099_v54  ;;  %v3109_v50 = vmul.f32 -1.702, %v5383_v34  ;;  %v5397_v44 = vadd.f32 %v899_v58, %v4690_v27 }
 0x2a3   :  { %v3633_v3 = vpop.eup %3632  ;;  %3658 = vpow2.f32 %v1591_v48  ;;  %v1605_v2 = vmul.f32 1.442695, %v3107_v60  ;;  %v5401_v48 = vadd.f32 %v1102_v63, %v4692_v25  ;;  %v3110_v5 = vmul.f32 -1.702, %v5388_v28  ;;  %v5417_v54 = vpop.f32.mrf.mxu1 }
 0x2a4   :  { %v3635_v52 = vpop.eup %3634  ;;  %3660 = vpow2.f32 %v1589_v31  ;;  %v2175_v35 = vmul.f32 %v3633_v3, %v6100_v1  ;;  %v2174_v13 = vmul.f32 %v3631_v11, %v6101_v7  ;;  %v3112_v60 = vmul.f32 -1.702, %v5392_v0 }
 0x2a5   :  { %v3637_v20 = vpop.eup %3636  ;;  %3662 = vpow2.f32 %v1593_v30  ;;  %v2177_v15 = vmul.f32 %v3635_v52, %v5247_v10  ;;  %v1609_v63 = vmul.f32 1.442695, %v3109_v50  ;;  %v3111_v10 = vmul.f32 -1.702, %v5397_v44  ;;  %v5415_v52 = vpop.f32.mrf.mxu0 }
 0x2a6   :  { %v3639_v26 = vpop.eup %3638  ;;  %v2176_v31 = vmul.f32 %v3637_v20, %v5261_v32  ;;  %3664 = vpow2.f32 %v1595_v46  ;;  %v2275_v3 = vpack.c.bf16 %v2175_v35, %v2171_v37  ;;  %v3113_v59 = vmul.f32 -1.702, %v5401_v48 }
 0x2a7   :  { %v3641_v22 = vpop.eup %3640  ;;  %v2178_v30 = vmul.f32 %v3639_v26, %v5274_v62  ;;  %3666 = vpow2.f32 %v1599_v61  ;;  %v2277_v62 = vpack.c.bf16 %v2177_v15, %v2173_v8  ;;  %v1611_v61 = vmul.f32 1.442695, %v3110_v5  ;;  %v5420_v35 = vpop.f32.mrf.mxu0 }
 0x2a8   :  { %v3643_v58 = vpop.eup %3642  ;;  %v2276_v9 = vpack.c.bf16 %v2176_v31, %v2172_v6  ;;  %3668 = vpow2.f32 %v1597_v53  ;;  %v1615_v53 = vmul.f32 1.442695, %v3112_v60  ;;  %v1617_v1 = vmul.f32 1.442695, %v3113_v59 }
 0x2a9   :  { %v3645_v32 = vpop.eup %3644  ;;  %v2278_v46 = vpack.c.bf16 %v2178_v30, %v2174_v13  ;;  %3670 = vpow2.f32 %v1601_v55  ;;  %v1613_v55 = vmul.f32 1.442695, %v3111_v10  ;;  %v2181_v13 = vmul.f32 %v3643_v58, %v5287_v12 }
 0x2aa   :  { %v3647_v11 = vpop.eup %3646  ;;  %2670 = vmatprep.mubr.bf16.mxu0 %v2276_v9  ;;  %3672 = vpow2.f32 %v1603_v36  ;;  %v2180_v8 = vmul.f32 %v3645_v32, %v5292_v17  ;;  %v5433_v58 = vadd.f32 %v5403_v40, %v4686_v57 }
 0x2ab   :  { %v3649_v6 = vpop.eup %3648  ;;  %2839 = vmatprep.mubr.bf16.mxu1 %v2278_v46  ;;  %2671 = vmatmul.mubr.bf16.gmra.mxu0 %v2275_v3  ;;  %3674 = vpow2.f32 %v1607_v33  ;;  %v5425_v33 = vpop.f32.mrf.mxu1  ;;  %v2182_v5 = vmul.f32 %v3647_v11, %v5298_v21  ;;  %v5437_v3 = vadd.f32 %v5408_v18, %v4688_v43 }
 0x2ac   :  { %v3651_v50 = vpop.eup %3650  ;;  %2840 = vmatmul.mubr.bf16.gmra.mxu1 %v2277_v62  ;;  %3676 = vpow2.f32 %v1605_v2  ;;  %v2183_v20 = vmul.f32 %v3649_v6, %v5303_v16  ;;  %v2179_v2 = vmul.f32 %v3641_v22, %v5278_v4 }
 0x2ad   :  { %v3653_v37 = vpop.eup %3652  ;;  %3678 = vpow2.f32 %v1609_v63  ;;  %v2185_v26 = vmul.f32 %v3651_v50, %v5307_v45  ;;  %v909_v63 = vpop.f32.mrf.mxu0  ;;  %6102 = vst [vmem:[#allocation9_spill] sm:$0xff] %v5437_v3 }
 0x2ae   :  { %v3655_v36 = vpop.eup %3654  ;;  %v2184_v15 = vmul.f32 %v3653_v37, %v5310_v41  ;;  %3680 = vpow2.f32 %v1611_v61  ;;  %v2279_v41 = vpack.c.bf16 %v2183_v20, %v2179_v2  ;;  %v1112_v22 = vpop.f32.mrf.mxu1  ;;  %v3114_v37 = vmul.f32 -1.702, %v5433_v58 }
 0x2af   :  { %v3657_v31 = vpop.eup %3656  ;;  %v2186_v16 = vmul.f32 %v3655_v36, %v5318_v56  ;;  %3682 = vpow2.f32 %v1615_v53  ;;  %v2281_v4 = vpack.c.bf16 %v2185_v26, %v2181_v13  ;;  %v913_v62 = vpop.f32.mrf.mxu0  ;;  %v5441_v53 = vadd.f32 %v5415_v52, %v4690_v27 }
 0x2b0   :  { %v3659_v7 = vpop.eup %3658  ;;  %v2280_v30 = vpack.c.bf16 %v2184_v15, %v2180_v8  ;;  %v1779_v17 = vadd.f32 1.0, %v3657_v31  ;;  %3684 = vpow2.f32 %v1613_v55  ;;  %v1116_v40 = vpop.f32.mrf.mxu1  ;;  %v5447_v26 = vadd.f32 %v5417_v54, %v4692_v25 }
 0x2b1   :  { %v3661_v45 = vpop.eup %3660  ;;  %v2282_v60 = vpack.c.bf16 %v2186_v16, %v2182_v5  ;;  %v1781_v9 = vadd.f32 1.0, %v3659_v7  ;;  %3686 = vpow2.f32 %v1617_v1  ;;  %v3116_v1 = vmul.f32 -1.702, %v5437_v3  ;;  %v915_v52 = vpop.f32.mrf.mxu0 }
 0x2b2   :  { %v3663_v10 = vpop.eup %3662  ;;  %2678 = vmatprep.mubr.bf16.mxu0 %v2280_v30  ;;  %3688 = vrcp.f32 %v1779_v17  ;;  %v1780_v21 = vadd.f32 1.0, %v3661_v45  ;;  %v3115_v2 = vmul.f32 -1.702, %v5441_v53  ;;  %v5452_v5 = vadd.f32 %v5420_v35, %v4686_v57  ;;  %v1118_v16 = vpop.f32.mrf.mxu1 }
 0x2b3   :  { %v3665_v56 = vpop.eup %3664  ;;  %2847 = vmatprep.mubr.bf16.mxu1 %v2282_v60  ;;  %2679 = vmatmul.mubr.bf16.gmra.mxu0 %v2279_v41  ;;  %3690 = vrcp.f32 %v1781_v9  ;;  %v1782_v12 = vadd.f32 1.0, %v3663_v10  ;;  %v1619_v30 = vmul.f32 1.442695, %v3114_v37  ;;  %v5456_v17 = vadd.f32 %v5425_v33, %v4688_v43 }
 0x2b4   :  { %v3667_v32 = vpop.eup %3666  ;;  %2848 = vmatmul.mubr.bf16.gmra.mxu1 %v2281_v4  ;;  %3692 = vrcp.f32 %v1780_v21  ;;  %v1783_v46 = vadd.f32 1.0, %v3665_v56  ;;  %v1623_v60 = vmul.f32 1.442695, %v3116_v1  ;;  %v5459_v41 = vadd.f32 %v909_v63, %v4690_v27  ;;  %v917_v21 = vpop.f32.mrf.mxu0 }
 0x2b5   :  { %v3669_v59 = vpop.eup %3668  ;;  %3694 = vrcp.f32 %v1782_v12  ;;  %v1785_v11 = vadd.f32 1.0, %v3667_v32  ;;  %v3117_v10 = vmul.f32 -1.702, %v5447_v26  ;;  %v5463_v4 = vadd.f32 %v1112_v22, %v4692_v25 }
 0x2b6   :  { %v3671_v61 = vpop.eup %3670  ;;  %3696 = vrcp.f32 %v1783_v46  ;;  %v1784_v6 = vadd.f32 1.0, %v3669_v59  ;;  %v3118_v12 = vmul.f32 -1.702, %v5452_v5  ;;  %v5467_v32 = vadd.f32 %v913_v62, %v4686_v57  ;;  %v1120_v46 = vpop.f32.mrf.mxu1 }
 0x2b7   :  { %v3673_v50 = vpop.eup %3672  ;;  %3698 = vrcp.f32 %v1785_v11  ;;  %v1786_v55 = vadd.f32 1.0, %v3671_v61  ;;  %v3120_v11 = vmul.f32 -1.702, %v5456_v17  ;;  %v5473_v61 = vadd.f32 %v1116_v40, %v4688_v43  ;;  %v919_v40 = vpop.f32.mrf.mxu0 }
 0x2b8   :  { %v3675_v20 = vpop.eup %3674  ;;  %3700 = vrcp.f32 %v1784_v6  ;;  %v1787_v18 = vadd.f32 1.0, %v3673_v50  ;;  %6103 = vst [vmem:[#allocation10_spill] sm:$0xff] %v5467_v32  ;;  %v1621_v6 = vmul.f32 1.442695, %v3115_v2  ;;  %v3119_v50 = vmul.f32 -1.702, %v5459_v41 }
 0x2b9   :  { %v3677_v36 = vpop.eup %3676  ;;  %3702 = vrcp.f32 %v1786_v55  ;;  %v1789_v8 = vadd.f32 1.0, %v3675_v20  ;;  %6104 = vst [vmem:[#allocation17_spill] sm:$0xff] %v5473_v61  ;;  %v5479_v55 = vadd.f32 %v915_v52, %v4690_v27  ;;  %v1625_v37 = vmul.f32 1.442695, %v3117_v10  ;;  %v1122_v52 = vpop.f32.mrf.mxu1 }
 0x2ba   :  { %v3679_v15 = vpop.eup %3678  ;;  %3704 = vrcp.f32 %v1787_v18  ;;  %v1788_v31 = vadd.f32 1.0, %v3677_v36  ;;  %v3121_v20 = vmul.f32 -1.702, %v5463_v4  ;;  %v5485_v18 = vadd.f32 %v1118_v16, %v4692_v25 }
 0x2bb   :  { %v3681_v7 = vpop.eup %3680  ;;  %3706 = vrcp.f32 %v1789_v8  ;;  %v1790_v13 = vadd.f32 1.0, %v3679_v15  ;;  %v1627_v36 = vmul.f32 1.442695, %v3118_v12  ;;  %v3122_v8 = vmul.f32 -1.702, %v5467_v32 }
 0x2bc   :  { %v3683_v54 = vpop.eup %3682  ;;  %3708 = vrcp.f32 %v1788_v31  ;;  %v1791_v45 = vadd.f32 1.0, %v3681_v7  ;;  %6105 = vst [vmem:[#allocation13_spill] sm:$0xff] %v5485_v18  ;;  %v5491_v15 = vadd.f32 %v917_v21, %v4686_v57  ;;  %v1631_v2 = vmul.f32 1.442695, %v3120_v11  ;;  %v923_v21 = vpop.f32.mrf.mxu0 }
 0x2bd   :  { %v3685_v9 = vpop.eup %3684  ;;  %3710 = vrcp.f32 %v1790_v13  ;;  %v1793_v35 = vadd.f32 1.0, %v3683_v54  ;;  %v3124_v7 = vmul.f32 -1.702, %v5473_v61  ;;  %v5497_v16 = vadd.f32 %v1120_v46, %v4688_v43  ;;  %v1126_v46 = vpop.f32.mrf.mxu1 }
 0x2be   :  { %v3687_v56 = vpop.eup %3686  ;;  %3712 = vrcp.f32 %v1791_v45  ;;  %v1792_v33 = vadd.f32 1.0, %v3685_v9  ;;  %6106 = vst [vmem:[#allocation14_spill] sm:$0xff] %v5491_v15  ;;  %v3123_v54 = vmul.f32 -1.702, %v5479_v55  ;;  %v5503_v45 = vadd.f32 %v919_v40, %v4690_v27 }
 0x2bf   :  { %v5469_v63 = vpop.eup %3688  ;;  %3714 = vrcp.f32 %v1793_v35  ;;  %v1794_v59 = vadd.f32 1.0, %v3687_v56  ;;  %6107 = vst [vmem:[#allocation15_spill] sm:$0xff] %v5497_v16  ;;  %v1633_v35 = vmul.f32 1.442695, %v3121_v20  ;;  %v5509_v10 = vadd.f32 %v1122_v52, %v4692_v25  ;;  %v925_v52 = vpop.f32.mrf.mxu0 }
 0x2c0   :  { %v5475_v22 = vpop.eup %3690  ;;  %3716 = vrcp.f32 %v1792_v33  ;;  %v1635_v33 = vmul.f32 1.442695, %v3122_v8  ;;  %v3126_v12 = vmul.f32 -1.702, %v5491_v15  ;;  %v1639_v11 = vmul.f32 1.442695, %v3124_v7  ;;  %v1128_v7 = vpop.f32.mrf.mxu1 }
 0x2c1   :  { %v5481_v62 = vpop.eup %3692  ;;  %3718 = vrcp.f32 %v1794_v59  ;;  %v3127_v20 = vmul.f32 -1.702, %v5503_v45  ;;  %v3129_v8 = vmul.f32 -1.702, %v5509_v10 }
 0x2c2   :  { %v5487_v1 = vpop.eup %3694  ;;  %3720 = vpow2.f32 %v1619_v30  ;;  %v1629_v30 = vmul.f32 1.442695, %v3119_v50 }
 0x2c3   :  { %v5493_v31 = vpop.eup %3696  ;;  %3722 = vpow2.f32 %v1623_v60  ;;  %v3125_v60 = vmul.f32 -1.702, %v5485_v18 }
 0x2c4   :  { %v5499_v13 = vpop.eup %3698  ;;  %3724 = vpow2.f32 %v1621_v6  ;;  %v3128_v6 = vmul.f32 -1.702, %v5497_v16 }
 0x2c5   :  { %v5505_v9 = vpop.eup %3700  ;;  %3726 = vpow2.f32 %v1625_v37  ;;  %v1637_v37 = vmul.f32 1.442695, %v3123_v54  ;;  %v1645_v54 = vmul.f32 1.442695, %v3127_v20  ;;  %v5547_v20 = vmul.f32 %v5475_v22, %v5343_v19 }
 0x2c6   :  { %v5511_v56 = vpop.eup %3702  ;;  %3728 = vpow2.f32 %v1627_v36  ;;  %v1641_v36 = vmul.f32 1.442695, %v3125_v60  ;;  %v1647_v16 = vmul.f32 1.442695, %v3128_v6  ;;  %v927_v60 = vpop.f32.mrf.mxu0  ;;  %v5543_v6 = vadd.f32 %v1126_v46, %v4688_v43 }
 0x2c7   :  { %v5514_v59 = vpop.eup %3704  ;;  %3730 = vpow2.f32 %v1631_v2  ;;  %v1643_v2 = vmul.f32 1.442695, %v3126_v12  ;;  %v5536_v12 = vpop.f32.mrf.mxu1  ;;  %v5562_v19 = vmul.f32 %v5493_v31, %v5355_v39  ;;  %v5575_v39 = vmul.f32 %v5505_v9, %v5361_v29 }
 0x2c8   :  { %v5517_v50 = vpop.eup %3706  ;;  %3732 = vpow2.f32 %v1629_v30  ;;  %6108 = vst [vmem:[#allocation16_spill] sm:$0xff] %v5543_v6  ;;  %v929_v46 = vpop.f32.mrf.mxu0 }
 0x2c9   :  { %v5520_v40 = vpop.eup %3708  ;;  %3734 = vpow2.f32 %v1633_v35  ;;  %v1649_v35 = vmul.f32 1.442695, %v3129_v8  ;;  %v1132_v22 = vpop.f32.mrf.mxu1 }
 0x2ca   :  { %v5523_v61 = vpop.eup %3710  ;;  %3736 = vpow2.f32 %v1635_v33  ;;  %v5534_v33 = vadd.f32 %v923_v21, %v4686_v57  ;;  %v5551_v21 = vmul.f32 %v5481_v62, %v5346_v47 }
 0x2cb   :  { %v5525_v32 = vpop.eup %3712  ;;  %3738 = vpow2.f32 %v1639_v11  ;;  %v5540_v11 = vmul.f32 %v5469_v63, %v5340_v38  ;;  %v5555_v38 = vmul.f32 %v5487_v1, %v5352_v23  ;;  %v3132_v1 = vmul.f32 -1.702, %v5543_v6  ;;  %v1136_v9 = vpop.f32.mrf.mxu1 }
 0x2cc   :  { %v5527_v30 = vpop.eup %3714  ;;  %3740 = vpow2.f32 %v1637_v37 }
 0x2cd   :  { %v5529_v15 = vpop.eup %3716  ;;  %3742 = vpow2.f32 %v1641_v36  ;;  %v5586_v6 = vmul.f32 1.442695, %v3132_v1 }
 0x2ce   :  { %v5531_v18 = vpop.eup %3718  ;;  %3744 = vpow2.f32 %v1643_v2 }
 0x2cf   :  { %v3721_v3 = vpop.eup %3720  ;;  %3746 = vpow2.f32 %v1647_v16  ;;  %v5558_v16 = vadd.f32 %v925_v52, %v4690_v27 }
 0x2d0   :  { %v3723_v37 = vpop.eup %3722  ;;  %v1795_v36 = vadd.f32 1.0, %v3721_v3  ;;  %3748 = vpow2.f32 %v1645_v54  ;;  %v3130_v3 = vmul.f32 -1.702, %v5534_v33  ;;  %v5567_v54 = vadd.f32 %v1128_v7, %v4692_v25 }
 0x2d1   :  { %v3725_v8 = vpop.eup %3724  ;;  %v1797_v63 = vadd.f32 1.0, %v3723_v37  ;;  %3750 = vpow2.f32 %v1649_v35  ;;  %v5571_v35 = vmul.f32 %v5499_v13, %v5358_v42  ;;  %v3131_v7 = vmul.f32 -1.702, %v5558_v16 }
 0x2d2   :  { %v3727_v2 = vpop.eup %3726  ;;  %3752 = vrcp.f32 %v1795_v36  ;;  %v1796_v47 = vadd.f32 1.0, %v3725_v8  ;;  %v2194_v36 = vmul.f32 %v5511_v56, %v5364_v49  ;;  %v5582_v42 = vmul.f32 %v5514_v59, %v5369_v51 }
 0x2d3   :  { %v3729_v62 = vpop.eup %3728  ;;  %3754 = vrcp.f32 %v1797_v63  ;;  %v1798_v23 = vadd.f32 1.0, %v3727_v2  ;;  %v933_v63 = vpop.f32.mrf.mxu0  ;;  %v5584_v29 = vmul.f32 1.442695, %v3130_v3  ;;  %v3133_v49 = vmul.f32 -1.702, %v5567_v54 }
 0x2d4   :  { %v3731_v52 = vpop.eup %3730  ;;  %3756 = vrcp.f32 %v1796_v47  ;;  %v1799_v31 = vadd.f32 1.0, %v3729_v62  ;;  %v5594_v59 = vadd.f32 %v927_v60, %v4686_v57  ;;  %v1138_v60 = vpop.f32.mrf.mxu1 }
 0x2d5   :  { %v3733_v37 = vpop.eup %3732  ;;  %3758 = vrcp.f32 %v1798_v23  ;;  %v1801_v8 = vadd.f32 1.0, %v3731_v52  ;;  %v5591_v23 = vmul.f32 %v5517_v50, %v5373_v14  ;;  %v5598_v52 = vmul.f32 %v5520_v40, %v5379_v24 }
 0x2d6   :  { %v3735_v2 = vpop.eup %3734  ;;  %3760 = vrcp.f32 %v1799_v31  ;;  %v1800_v13 = vadd.f32 1.0, %v3733_v37  ;;  %v1653_v31 = vmul.f32 1.442695, %v3131_v7  ;;  %v935_v37 = vpop.f32.mrf.mxu0  ;;  %v5606_v50 = vadd.f32 %v5536_v12, %v4688_v43 }
 0x2d7   :  { %v3737_v47 = vpop.eup %3736  ;;  %3762 = vrcp.f32 %v1801_v8  ;;  %v1802_v62 = vadd.f32 1.0, %v3735_v2  ;;  %v5602_v2 = vmul.f32 %v5523_v61, %v5383_v34  ;;  %v1657_v40 = vmul.f32 1.442695, %v3133_v49 }
 0x2d8   :  { %v3739_v56 = vpop.eup %3738  ;;  %3764 = vrcp.f32 %v1800_v13  ;;  %v1803_v51 = vadd.f32 1.0, %v3737_v47  ;;  %v5609_v47 = vadd.f32 %v929_v46, %v4690_v27  ;;  %v3134_v34 = vmul.f32 -1.702, %v5594_v59 }
 0x2d9   :  { %v3741_v3 = vpop.eup %3740  ;;  %3766 = vrcp.f32 %v1802_v62  ;;  %v1805_v1 = vadd.f32 1.0, %v3739_v56  ;;  %v5613_v61 = vadd.f32 %v1132_v22, %v4692_v25  ;;  %v2286_v49 = vpack.c.bf16 %v2194_v36, %v5555_v38 }
 0x2da   :  { %v3743_v8 = vpop.eup %3742  ;;  %3768 = vrcp.f32 %v1803_v51  ;;  %v1804_v14 = vadd.f32 1.0, %v3741_v3  ;;  %v937_v51 = vpop.f32.mrf.mxu0  ;;  %v2284_v3 = vpack.c.bf16 %v5575_v39, %v5551_v21  ;;  %v2283_v21 = vpack.c.bf16 %v5562_v19, %v5540_v11 }
 0x2db   :  { %v3745_v13 = vpop.eup %3744  ;;  %3770 = vrcp.f32 %v1805_v1  ;;  %v1806_v24 = vadd.f32 1.0, %v3743_v8  ;;  %v3136_v8 = vmul.f32 -1.702, %v5606_v50  ;;  %2855 = vmatprep.mubr.bf16.mxu1 %v2286_v49  ;;  %v3135_v39 = vmul.f32 -1.702, %v5609_v47 }
 0x2dc   :  { %v3747_v7 = vpop.eup %3746  ;;  %3772 = vrcp.f32 %v1804_v14  ;;  %v1807_v62 = vadd.f32 1.0, %v3745_v13  ;;  %v5620_v14 = vadd.f32 %v933_v63, %v4686_v57  ;;  %v1140_v13 = vpop.f32.mrf.mxu1  ;;  %2686 = vmatprep.mubr.bf16.mxu0 %v2284_v3  ;;  %v5633_v36 = vadd.f32 %v935_v37, %v4690_v27 }
 0x2dd   :  { %v3749_v56 = vpop.eup %3748  ;;  %3774 = vrcp.f32 %v1806_v24  ;;  %v1809_v12 = vadd.f32 1.0, %v3747_v7  ;;  %v5625_v7 = vadd.f32 %v1136_v9, %v4688_v43  ;;  %v2285_v63 = vpack.c.bf16 %v5571_v35, %v5547_v20  ;;  %v939_v19 = vpop.f32.mrf.mxu0  ;;  %2687 = vmatmul.mubr.bf16.gmra.mxu0 %v2283_v21 }
 0x2de   :  { %v3751_v1 = vpop.eup %3750  ;;  %3776 = vrcp.f32 %v1807_v62  ;;  %v1808_v46 = vadd.f32 1.0, %v3749_v56  ;;  %6109 = vst [vmem:[#allocation11_spill] sm:$0xff] %v5620_v14  ;;  %v5639_v9 = vmul.f32 %v5525_v32, %v5388_v28  ;;  %v3137_v56 = vmul.f32 -1.702, %v5613_v61  ;;  %v1142_v35 = vpop.f32.mrf.mxu1 }
 0x2df   :  { %v5622_v22 = vpop.eup %3752  ;;  %3778 = vrcp.f32 %v1809_v12  ;;  %v1810_v24 = vadd.f32 1.0, %v3751_v1  ;;  %6110 = vst [vmem:[#allocation12_spill] sm:$0xff] %v5625_v7  ;;  %v5643_v11 = vadd.f32 %v1138_v60, %v4692_v25  ;;  %v1659_v37 = vmul.f32 1.442695, %v3134_v34  ;;  %2856 = vmatmul.mubr.bf16.gmra.mxu1 %v2285_v63 }
 0x2e0   :  { %v5629_v38 = vpop.eup %3754  ;;  %3780 = vrcp.f32 %v1808_v46  ;;  %v3138_v3 = vmul.f32 -1.702, %v5620_v14  ;;  %v5648_v20 = vadd.f32 %v937_v51, %v4686_v57  ;;  %v1663_v32 = vmul.f32 1.442695, %v3136_v8 }
 0x2e1   :  { %v3757_v62 = vpop.eup %3756  ;;  %3782 = vrcp.f32 %v1810_v24  ;;  %6111 = vst [vmem:[#allocation2_spill] sm:$0xff] %v5643_v11  ;;  %v3140_v60 = vmul.f32 -1.702, %v5625_v7  ;;  %v5655_v49 = vadd.f32 %v1140_v13, %v4688_v43  ;;  %v3139_v34 = vmul.f32 -1.702, %v5633_v36 }
 0x2e2   :  { %v3759_v12 = vpop.eup %3758  ;;  %3784 = vpow2.f32 %v5584_v29  ;;  %v1661_v29 = vmul.f32 1.442695, %v3135_v39  ;;  %v5661_v51 = vadd.f32 %v939_v19, %v4690_v27  ;;  %v1665_v24 = vmul.f32 1.442695, %v3137_v56 }
 0x2e3   :  { %v5650_v28 = vpop.eup %3760  ;;  %3786 = vpow2.f32 %v5586_v6  ;;  %v3141_v6 = vmul.f32 -1.702, %v5643_v11  ;;  %v5665_v8 = vadd.f32 %v1142_v35, %v4692_v25  ;;  %v2201_v13 = vmul.f32 %v5527_v30, %v5392_v0 }
 0x2e4   :  { %v5657_v1 = vpop.eup %3762  ;;  %3788 = vpow2.f32 %v1653_v31  ;;  %v1667_v31 = vmul.f32 1.442695, %v3138_v3  ;;  %v3142_v39 = vmul.f32 -1.702, %v5648_v20  ;;  %v2200_v19 = vmul.f32 %v5529_v15, %v5397_v44 }
 0x2e5   :  { %v3765_v46 = vpop.eup %3764  ;;  %3790 = vpow2.f32 %v1657_v40  ;;  %v1671_v40 = vmul.f32 1.442695, %v3140_v60  ;;  %v3144_v56 = vmul.f32 -1.702, %v5655_v49  ;;  %v2202_v35 = vmul.f32 %v5531_v18, %v5401_v48 }
 0x2e6   :  { %v3767_v21 = vpop.eup %3766  ;;  %3792 = vpow2.f32 %v1659_v37  ;;  %v1669_v0 = vmul.f32 1.442695, %v3139_v34  ;;  %v3143_v30 = vmul.f32 -1.702, %v5661_v51  ;;  %v2208_v3 = vmul.f32 %v3765_v46, %v5459_v41  ;;  %v943_v34 = vpop.f32.mrf.mxu0 }
 0x2e7   :  { %v5670_v63 = vpop.eup %3768  ;;  %3794 = vpow2.f32 %v1663_v32  ;;  %v1673_v11 = vmul.f32 1.442695, %v3141_v6  ;;  %v3145_v44 = vmul.f32 -1.702, %v5665_v8  ;;  %v2287_v32 = vpack.c.bf16 %v5639_v9, %v5582_v42  ;;  %v1146_v42 = vpop.f32.mrf.mxu1 }
 0x2e8   :  { %v5675_v7 = vpop.eup %3770  ;;  %3796 = vpow2.f32 %v1661_v29  ;;  %v2210_v60 = vmul.f32 %v3767_v21, %v5463_v4  ;;  %v1675_v14 = vmul.f32 1.442695, %v3142_v39  ;;  %v2204_v18 = vmul.f32 %v3757_v62, %v5441_v53 }
 0x2e9   :  { %v3773_v37 = vpop.eup %3772  ;;  %3798 = vpow2.f32 %v1665_v24  ;;  %v1679_v29 = vmul.f32 1.442695, %v3144_v56  ;;  %v2288_v41 = vpack.c.bf16 %v2200_v19, %v5598_v52  ;;  %v2206_v24 = vmul.f32 %v3759_v12, %v5447_v26 }
 0x2ea   :  { %v3775_v15 = vpop.eup %3774  ;;  %3800 = vpow2.f32 %v1667_v31  ;;  %v1677_v6 = vmul.f32 1.442695, %v3143_v30  ;;  %v2290_v4 = vpack.c.bf16 %v2202_v35, %v5602_v2  ;;  %v2289_v21 = vpack.c.bf16 %v2201_v13, %v5591_v23 }
 0x2eb   :  { %v5685_v48 = vpop.eup %3776  ;;  %3802 = vpow2.f32 %v1671_v40  ;;  %v1681_v31 = vmul.f32 1.442695, %v3145_v44  ;;  %2694 = vmatprep.mubr.bf16.mxu0 %v2288_v41  ;;  %v2292_v53 = vpack.c.bf16 %v2208_v3, %v2204_v18  ;;  %v5695_v52 = vadd.f32 %v943_v34, %v4686_v57  ;;  %v945_v40 = vpop.f32.mrf.mxu0  ;;  %v6113_v3 = vld [vmem:[#allocation13_spill] sm:$0xff] }
 0x2ec   :  { %v5689_v46 = vpop.eup %3778  ;;  %3804 = vpow2.f32 %v1669_v0  ;;  %2863 = vmatprep.mubr.bf16.mxu1 %v2290_v4  ;;  %2695 = vmatmul.mubr.bf16.gmra.mxu0 %v2287_v32  ;;  %v2294_v26 = vpack.c.bf16 %v2210_v60, %v2206_v24  ;;  %v2203_v39 = vmul.f32 %v5622_v22, %v5433_v58  ;;  %v5701_v23 = vadd.f32 %v1146_v42, %v4688_v43  ;;  %v6112_v0 = vld [vmem:[#allocation9_spill] sm:$0xff] }
 0x2ed   :  { %v3781_v9 = vpop.eup %3780  ;;  %3806 = vpow2.f32 %v1673_v11  ;;  %2864 = vmatmul.mubr.bf16.gmra.mxu1 %v2289_v21  ;;  %2702 = vmatprep.mubr.bf16.mxu0 %v2292_v53  ;;  %v2209_v58 = vmul.f32 %v5657_v1, %v5456_v17  ;;  %v2205_v30 = vmul.f32 %v5629_v38, %v6112_v0  ;;  %v5713_v60 = vadd.f32 %v945_v40, %v4690_v27  ;;  %v947_v41 = vpop.f32.mrf.mxu0 }
 0x2ee   :  { %v3783_v62 = vpop.eup %3782  ;;  %3808 = vpow2.f32 %v1675_v14  ;;  %v2216_v2 = vmul.f32 %v3781_v9, %v5503_v45  ;;  %v2207_v14 = vmul.f32 %v5650_v28, %v5452_v5  ;;  %2871 = vmatprep.mubr.bf16.mxu1 %v2294_v26  ;;  %v2212_v45 = vmul.f32 %v3773_v37, %v5479_v55  ;;  %v1148_v28 = vpop.f32.mrf.mxu1 }
 0x2ef   :  { %v3785_v12 = vpop.eup %3784  ;;  %3810 = vpow2.f32 %v1679_v29  ;;  %v2218_v13 = vmul.f32 %v3783_v62, %v5509_v10  ;;  %v2214_v5 = vmul.f32 %v3775_v15, %v6113_v3  ;;  %v2293_v34 = vpack.c.bf16 %v2209_v58, %v2205_v30  ;;  %v6114_v62 = vld [vmem:[#allocation14_spill] sm:$0xff]  ;;  %v949_v40 = vpop.f32.mrf.mxu0  ;;  %v6117_v30 = vld [vmem:[#allocation17_spill] sm:$0xff] }
 0x2f0   :  { %v3787_v11 = vpop.eup %3786  ;;  %v1811_v19 = vadd.f32 1.0, %v3785_v12  ;;  %3812 = vpow2.f32 %v1677_v6  ;;  %v2296_v17 = vpack.c.bf16 %v2216_v2, %v2212_v45  ;;  %v2291_v55 = vpack.c.bf16 %v2207_v14, %v2203_v39  ;;  %v1150_v42 = vpop.f32.mrf.mxu1  ;;  %v6116_v58 = vld [vmem:[#allocation10_spill] sm:$0xff] }
 0x2f1   :  { %v3789_v56 = vpop.eup %3788  ;;  %v1813_v22 = vadd.f32 1.0, %v3787_v11  ;;  %3814 = vpow2.f32 %v1681_v31  ;;  %v2298_v18 = vpack.c.bf16 %v2218_v13, %v2214_v5  ;;  %v5716_v15 = vadd.f32 %v1148_v28, %v4692_v25  ;;  %v6115_v11 = vld [vmem:[#allocation15_spill] sm:$0xff] }
 0x2f2   :  { %v3791_v35 = vpop.eup %3790  ;;  %3816 = vrcp.f32 %v1811_v19  ;;  %v1812_v10 = vadd.f32 1.0, %v3789_v56  ;;  %v3146_v21 = vmul.f32 -1.702, %v5695_v52  ;;  %v3148_v31 = vmul.f32 -1.702, %v5701_v23 }
 0x2f3   :  { %v3793_v44 = vpop.eup %3792  ;;  %3818 = vrcp.f32 %v1813_v22  ;;  %v1814_v32 = vadd.f32 1.0, %v3791_v35  ;;  %v2215_v26 = vmul.f32 %v5685_v48, %v6114_v62  ;;  %v3147_v39 = vmul.f32 -1.702, %v5713_v60  ;;  %v1152_v35 = vpop.f32.mrf.mxu1 }
 0x2f4   :  { %v3795_v1 = vpop.eup %3794  ;;  %3820 = vrcp.f32 %v1812_v10  ;;  %v1815_v37 = vadd.f32 1.0, %v3793_v44  ;;  %2703 = vmatmul.mubr.bf16.gmra.mxu0 %v2291_v55  ;;  %v2217_v14 = vmul.f32 %v5689_v46, %v6115_v11  ;;  %v3149_v19 = vmul.f32 -1.702, %v5716_v15 }
 0x2f5   :  { %v3797_v29 = vpop.eup %3796  ;;  %3822 = vrcp.f32 %v1814_v32  ;;  %v1817_v38 = vadd.f32 1.0, %v3795_v1  ;;  %2872 = vmatmul.mubr.bf16.gmra.mxu1 %v2293_v34  ;;  %2710 = vmatprep.mubr.bf16.mxu0 %v2296_v17  ;;  %v2211_v45 = vmul.f32 %v5670_v63, %v6116_v58  ;;  %v5729_v22 = vadd.f32 %v947_v41, %v4686_v57 }
 0x2f6   :  { %v3799_v24 = vpop.eup %3798  ;;  %3824 = vrcp.f32 %v1815_v37  ;;  %v1816_v6 = vadd.f32 1.0, %v3797_v29  ;;  %2879 = vmatprep.mubr.bf16.mxu1 %v2298_v18  ;;  %v2213_v3 = vmul.f32 %v5675_v7, %v6117_v30  ;;  %v5734_v5 = vadd.f32 %v1150_v42, %v4688_v43  ;;  %v5745_v7 = vld [vmem:[%s6019_s6] ss:$0 sm:$0xff] }
 0x2f7   :  { %v3801_v4 = vpop.eup %3800  ;;  %3826 = vrcp.f32 %v1817_v38  ;;  %v1818_v9 = vadd.f32 1.0, %v3799_v24  ;;  %v2295_v28 = vpack.c.bf16 %v2215_v26, %v2211_v45  ;;  %v5737_v63 = vadd.f32 %v949_v40, %v4690_v27 }
 0x2f8   :  { %v3803_v53 = vpop.eup %3802  ;;  %3828 = vrcp.f32 %v1816_v6  ;;  %v1819_v12 = vadd.f32 1.0, %v3801_v4  ;;  %v2297_v57 = vpack.c.bf16 %v2217_v14, %v2213_v3  ;;  %v5740_v1 = vadd.f32 %v1152_v35, %v4692_v25 }
 0x2f9   :  { %v3805_v2 = vpop.eup %3804  ;;  %3830 = vrcp.f32 %v1818_v9  ;;  %v1821_v13 = vadd.f32 1.0, %v3803_v53  ;;  %v1683_v37 = vmul.f32 1.442695, %v3146_v21  ;;  %v3150_v18 = vmul.f32 -1.702, %v5729_v22 }
 0x2fa   :  { %v3807_v56 = vpop.eup %3806  ;;  %3832 = vrcp.f32 %v1819_v12  ;;  %v1820_v48 = vadd.f32 1.0, %v3805_v2  ;;  %v1687_v34 = vmul.f32 1.442695, %v3148_v31  ;;  %v3152_v38 = vmul.f32 -1.702, %v5734_v5 }
 0x2fb   :  { %v3809_v0 = vpop.eup %3808  ;;  %3834 = vrcp.f32 %v1821_v13  ;;  %v1822_v46 = vadd.f32 1.0, %v3807_v56  ;;  %v1685_v24 = vmul.f32 1.442695, %v3147_v39  ;;  %v3151_v6 = vmul.f32 -1.702, %v5737_v63  ;;  %v3882_v56 = vld [vmem:[%s6013_s0] sm:$0xff] }
 0x2fc   :  { %v3811_v10 = vpop.eup %3810  ;;  %3836 = vrcp.f32 %v1820_v48  ;;  %v1823_v44 = vadd.f32 1.0, %v3809_v0  ;;  %2711 = vmatmul.mubr.bf16.gmra.mxu0 %v2295_v28  ;;  %v1689_v21 = vmul.f32 1.442695, %v3149_v19  ;;  %v3153_v53 = vmul.f32 -1.702, %v5740_v1 }
 0x2fd   :  { %v3813_v32 = vpop.eup %3812  ;;  %3838 = vrcp.f32 %v1822_v46  ;;  %v1825_v17 = vadd.f32 1.0, %v3811_v10  ;;  %2880 = vmatmul.mubr.bf16.gmra.mxu1 %v2297_v57  ;;  %v1691_v31 = vmul.f32 1.442695, %v3150_v18  ;;  %v1695_v14 = vmul.f32 1.442695, %v3152_v38 }
 0x2fe   :  { %v3815_v43 = vpop.eup %3814  ;;  %3840 = vrcp.f32 %v1823_v44  ;;  %v1824_v55 = vadd.f32 1.0, %v3813_v32  ;;  %v2608_v25 = vpop.f32.mrf.mxu0  ;;  %v1693_v40 = vmul.f32 1.442695, %v3151_v6  ;;  %v1697_v30 = vmul.f32 1.442695, %v3153_v53 }
 0x2ff   :  { %v3817_v27 = vpop.eup %3816  ;;  %3842 = vrcp.f32 %v1825_v17  ;;  %v1826_v29 = vadd.f32 1.0, %v3815_v43  ;;  %v2609_v42 = vadd.f32 %v5745_v7, %v2608_v25 }
 0x300   :  { %v3819_v41 = vpop.eup %3818  ;;  %3844 = vrcp.f32 %v1824_v55  ;;  %v2610_v62 = vpop.f32.mrf.mxu0  ;;  %v6118_v55 = vld [vmem:[#allocation16_spill] sm:$0xff] }
 0x301   :  { %v2777_v4 = vpop.f32.mrf.mxu1  ;;  %v3821_v9 = vpop.eup %3820  ;;  %3846 = vrcp.f32 %v1826_v29  ;;  %v6120_v62 = vld [vmem:[#allocation2_spill] sm:$0xff] }
 0x302   :  { %v3823_v26 = vpop.eup %3822  ;;  %3848 = vpow2.f32 %v1683_v37  ;;  %v2778_v12 = vadd.f32 %v2777_v4, %v2609_v42  ;;  %v2611_v39 = vpop.f32.mrf.mxu0  ;;  %v2220_v35 = vmul.f32 %v3821_v9, %v5558_v16  ;;  %v2219_v16 = vmul.f32 %v3817_v27, %v5534_v33  ;;  %v3883_v37 = vld [vmem:[%s6013_s0 + $0x8] sm:$0xff] }
 0x303   :  { %v2779_v2 = vpop.f32.mrf.mxu1  ;;  %v3825_v11 = vpop.eup %3824  ;;  %3850 = vpow2.f32 %v1687_v34  ;;  %v2612_v58 = vadd.f32 %v5745_v7, %v2611_v39 }
 0x304   :  { %v3827_v13 = vpop.eup %3826  ;;  %3852 = vpow2.f32 %v1685_v24  ;;  %v2912_v19 = vadd.f32 %v3882_v56, %v2778_v12  ;;  %v2223_v0 = vmul.f32 %v3825_v11, %v5594_v59  ;;  %v2613_v3 = vpop.f32.mrf.mxu0  ;;  %v2222_v59 = vmul.f32 %v3823_v26, %v5567_v54 }
 0x305   :  { %v2780_v45 = vpop.f32.mrf.mxu1  ;;  %v3829_v48 = vpop.eup %3828  ;;  %3854 = vpow2.f32 %v1689_v21  ;;  %v2225_v10 = vmul.f32 %v3827_v13, %v5606_v50  ;;  %v2221_v50 = vmul.f32 %v3819_v41, %v6118_v55  ;;  %v6119_v21 = vld [vmem:[#allocation11_spill] sm:$0xff] }
 0x306   :  { %v3831_v46 = vpop.eup %3830  ;;  %v2224_v28 = vmul.f32 %v3829_v48, %v5609_v47  ;;  %3856 = vpow2.f32 %v1691_v31  ;;  %2946 = vst [vmem:[%s6020_s7] sm:$0xff] %v2912_v19  ;;  %v2781_v44 = vadd.f32 %v2780_v45, %v2612_v58  ;;  %v2299_v34 = vpack.c.bf16 %v2223_v0, %v2219_v16 }
 0x307   :  { %v2782_v32 = vpop.f32.mrf.mxu1  ;;  %v3833_v57 = vpop.eup %3832  ;;  %v2226_v17 = vmul.f32 %v3831_v46, %v5613_v61  ;;  %3858 = vpow2.f32 %v1695_v14  ;;  %v2301_v27 = vpack.c.bf16 %v2225_v10, %v2221_v50  ;;  %v6121_v14 = vld [vmem:[#allocation12_spill] sm:$0xff] }
 0x308   :  { %v3835_v43 = vpop.eup %3834  ;;  %3860 = vpow2.f32 %v1693_v40  ;;  %v2300_v47 = vpack.c.bf16 %v2224_v28, %v2220_v35  ;;  %v2913_v18 = vadd.f32 %v3883_v37, %v2781_v44  ;;  %v2227_v53 = vmul.f32 %v3833_v57, %v6119_v21  ;;  %v3884_v44 = vld [vmem:[%s6013_s0 + $0x10] sm:$0xff] }
 0x309   :  { %v3837_v29 = vpop.eup %3836  ;;  %3862 = vpow2.f32 %v1697_v30  ;;  %v2302_v38 = vpack.c.bf16 %v2226_v17, %v2222_v59  ;;  %v2229_v39 = vmul.f32 %v3835_v43, %v6121_v14 }
 0x30a   :  { %v3839_v33 = vpop.eup %3838  ;;  %2718 = vmatprep.mubr.bf16.mxu0 %v2300_v47  ;;  %2947 = vst [vmem:[%s6020_s7 + $0x8] sm:$0xff] %v2913_v18  ;;  %v2228_v6 = vmul.f32 %v3837_v29, %v5633_v36  ;;  %v3885_v18 = vld [vmem:[%s6013_s0 + $0x18] sm:$0xff] }
 0x30b   :  { %v3841_v54 = vpop.eup %3840  ;;  %2887 = vmatprep.mubr.bf16.mxu1 %v2302_v38  ;;  %2719 = vmatmul.mubr.bf16.gmra.mxu0 %v2299_v34  ;;  %v2230_v26 = vmul.f32 %v3839_v33, %v6120_v62 }
 0x30c   :  { %v3843_v61 = vpop.eup %3842  ;;  %2888 = vmatmul.mubr.bf16.gmra.mxu1 %v2301_v27  ;;  %v2231_v41 = vmul.f32 %v3841_v54, %v5648_v20 }
 0x30d   :  { %v3845_v25 = vpop.eup %3844  ;;  %v2233_v42 = vmul.f32 %v3843_v61, %v5655_v49 }
 0x30e   :  { %v3847_v24 = vpop.eup %3846  ;;  %v2232_v4 = vmul.f32 %v3845_v25, %v5661_v51  ;;  %v2616_v12 = vpop.f32.mrf.mxu0  ;;  %v2303_v49 = vpack.c.bf16 %v2231_v41, %v2227_v53 }
 0x30f   :  { %v3849_v9 = vpop.eup %3848  ;;  %v2234_v31 = vmul.f32 %v3847_v24, %v5665_v8  ;;  %v2785_v2 = vpop.f32.mrf.mxu1  ;;  %v2617_v36 = vadd.f32 %v5745_v7, %v2616_v12  ;;  %v2305_v48 = vpack.c.bf16 %v2233_v42, %v2229_v39 }
 0x310   :  { %v3851_v11 = vpop.eup %3850  ;;  %v1827_v20 = vadd.f32 1.0, %v3849_v9  ;;  %v2304_v13 = vpack.c.bf16 %v2232_v4, %v2228_v6  ;;  %v2618_v19 = vpop.f32.mrf.mxu0  ;;  %v3886_v9 = vld [vmem:[%s6013_s0 + $0x20] sm:$0xff] }
 0x311   :  { %v3853_v40 = vpop.eup %3852  ;;  %v1829_v56 = vadd.f32 1.0, %v3851_v11  ;;  %v2306_v51 = vpack.c.bf16 %v2234_v31, %v2230_v26  ;;  %v2787_v58 = vpop.f32.mrf.mxu1  ;;  %v2786_v8 = vadd.f32 %v2785_v2, %v2617_v36 }
 0x312   :  { %v3855_v45 = vpop.eup %3854  ;;  %3864 = vrcp.f32 %v1827_v20  ;;  %v1828_v35 = vadd.f32 1.0, %v3853_v40  ;;  %2726 = vmatprep.mubr.bf16.mxu0 %v2304_v13  ;;  %v2619_v3 = vpop.f32.mrf.mxu0  ;;  %v3887_v40 = vld [vmem:[%s6013_s0 + $0x28] sm:$0xff] }
 0x313   :  { %v3857_v0 = vpop.eup %3856  ;;  %3866 = vrcp.f32 %v1829_v56  ;;  %v1830_v30 = vadd.f32 1.0, %v3855_v45  ;;  %2895 = vmatprep.mubr.bf16.mxu1 %v2306_v51  ;;  %2727 = vmatmul.mubr.bf16.gmra.mxu0 %v2303_v49  ;;  %v2788_v46 = vpop.f32.mrf.mxu1  ;;  %v2914_v32 = vadd.f32 %v3884_v44, %v2786_v8  ;;  %v2620_v57 = vadd.f32 %v5745_v7, %v2619_v3  ;;  %v3889_v44 = vld [vmem:[%s6013_s0 + $0x38] sm:$0xff] }
 0x314   :  { %v3859_v10 = vpop.eup %3858  ;;  %3868 = vrcp.f32 %v1828_v35  ;;  %v1831_v28 = vadd.f32 1.0, %v3857_v0  ;;  %2896 = vmatmul.mubr.bf16.gmra.mxu1 %v2305_v48  ;;  %v2621_v17 = vpop.f32.mrf.mxu0  ;;  %v3888_v0 = vld [vmem:[%s6013_s0 + $0x30] sm:$0xff] }
 0x315   :  { %v3861_v16 = vpop.eup %3860  ;;  %3870 = vrcp.f32 %v1830_v30  ;;  %v1833_v59 = vadd.f32 1.0, %v3859_v10  ;;  %v2790_v43 = vpop.f32.mrf.mxu1  ;;  %2948 = vst [vmem:[%s6020_s7 + $0x10] sm:$0xff] %v2914_v32  ;;  %v2789_v47 = vadd.f32 %v2788_v46, %v2620_v57 }
 0x316   :  { %v3863_v55 = vpop.eup %3862  ;;  %3872 = vrcp.f32 %v1831_v28  ;;  %v1832_v50 = vadd.f32 1.0, %v3861_v16 }
 0x317   :  { %3874 = vrcp.f32 %v1833_v59  ;;  %v1834_v37 = vadd.f32 1.0, %v3863_v55  ;;  %v2915_v29 = vadd.f32 %v3885_v18, %v2789_v47 }
 0x318   :  { %3876 = vrcp.f32 %v1832_v50 }
 0x319   :  { %3878 = vrcp.f32 %v1834_v37  ;;  %2949 = vst [vmem:[%s6020_s7 + $0x18] sm:$0xff] %v2915_v29  ;;  %v3890_v37 = vld [vmem:[%s6013_s0 + $0x40] sm:$0xff] }
 0x31b   :  { %v2624_v34 = vpop.f32.mrf.mxu0  ;;  %v2793_v38 = vpop.f32.mrf.mxu1 }
 0x31c   :  { %v2625_v33 = vadd.f32 %v5745_v7, %v2624_v34 }
 0x31d   :  { %v2626_v54 = vpop.f32.mrf.mxu0  ;;  %v2795_v61 = vpop.f32.mrf.mxu1 }
 0x31e   :  { %v2794_v41 = vadd.f32 %v2793_v38, %v2625_v33  ;;  %v3891_v61 = vld [vmem:[%s6013_s0 + $0x48] sm:$0xff] }
 0x31f   :  { %v3865_v27 = vpop.eup %3864  ;;  %v2627_v6 = vpop.f32.mrf.mxu0 }
 0x320   :  { %v3867_v25 = vpop.eup %3866  ;;  %v2796_v42 = vpop.f32.mrf.mxu1  ;;  %v2916_v21 = vadd.f32 %v3886_v9, %v2794_v41  ;;  %v2628_v53 = vadd.f32 %v5745_v7, %v2627_v6  ;;  %v2235_v56 = vmul.f32 %v3865_v27, %v5695_v52 }
 0x321   :  { %v3869_v24 = vpop.eup %3868  ;;  %v2629_v26 = vpop.f32.mrf.mxu0 }
 0x322   :  { %v3871_v4 = vpop.eup %3870  ;;  %v2798_v31 = vpop.f32.mrf.mxu1  ;;  %2950 = vst [vmem:[%s6020_s7 + $0x20] sm:$0xff] %v2916_v21  ;;  %v2797_v2 = vadd.f32 %v2796_v42, %v2628_v53  ;;  %v2236_v20 = vmul.f32 %v3869_v24, %v5713_v60  ;;  %v3892_v21 = vld [vmem:[%s6013_s0 + $0x50] sm:$0xff] }
 0x323   :  { %v3873_v62 = vpop.eup %3872  ;;  %v2238_v51 = vmul.f32 %v3871_v4, %v5716_v15 }
 0x324   :  { %v3875_v12 = vpop.eup %3874  ;;  %v2239_v14 = vmul.f32 %v3873_v62, %v5729_v22  ;;  %v2917_v49 = vadd.f32 %v3887_v40, %v2797_v2  ;;  %v2237_v22 = vmul.f32 %v3867_v25, %v5701_v23  ;;  %v3893_v2 = vld [vmem:[%s6013_s0 + $0x58] sm:$0xff] }
 0x325   :  { %v3877_v11 = vpop.eup %3876  ;;  %v2241_v13 = vmul.f32 %v3875_v12, %v5734_v5 }
 0x326   :  { %v3879_v39 = vpop.eup %3878  ;;  %v2240_v36 = vmul.f32 %v3877_v11, %v5737_v63  ;;  %2951 = vst [vmem:[%s6020_s7 + $0x28] sm:$0xff] %v2917_v49  ;;  %v2307_v60 = vpack.c.bf16 %v2239_v14, %v2235_v56  ;;  %v3894_v56 = vld [vmem:[%s6013_s0 + $0x60] sm:$0xff] }
 0x327   :  { %v2242_v19 = vmul.f32 %v3879_v39, %v5740_v1  ;;  %v2309_v63 = vpack.c.bf16 %v2241_v13, %v2237_v22 }
 0x328   :  { %v2308_v58 = vpack.c.bf16 %v2240_v36, %v2236_v20 }
 0x329   :  { %v2310_v5 = vpack.c.bf16 %v2242_v19, %v2238_v51 }
 0x32a   :  { %2734 = vmatprep.mubr.bf16.mxu0 %v2308_v58  ;;  %v2632_v45 = vpop.f32.mrf.mxu0  ;;  %v2801_v48 = vpop.f32.mrf.mxu1 }
 0x32b   :  { %2903 = vmatprep.mubr.bf16.mxu1 %v2310_v5  ;;  %2735 = vmatmul.mubr.bf16.gmra.mxu0 %v2307_v60  ;;  %v2633_v52 = vadd.f32 %v5745_v7, %v2632_v45  ;;  %v3895_v45 = vld [vmem:[%s6013_s0 + $0x68] sm:$0xff] }
 0x32c   :  { %2904 = vmatmul.mubr.bf16.gmra.mxu1 %v2309_v63  ;;  %v2634_v15 = vpop.f32.mrf.mxu0  ;;  %v2803_v1 = vpop.f32.mrf.mxu1 }
 0x32d   :  { %v2802_v35 = vadd.f32 %v2801_v48, %v2633_v52 }
 0x32e   :  { %v2635_v23 = vpop.f32.mrf.mxu0  ;;  %v2804_v8 = vpop.f32.mrf.mxu1 }
 0x32f   :  { %v2918_v30 = vadd.f32 %v3888_v0, %v2802_v35  ;;  %v2636_v3 = vadd.f32 %v5745_v7, %v2635_v23  ;;  %v3896_v0 = vld [vmem:[%s6013_s0 + $0x70] sm:$0xff] }
 0x330   :  { %v2637_v46 = vpop.f32.mrf.mxu0  ;;  %v2806_v10 = vpop.f32.mrf.mxu1 }
 0x331   :  { %2952 = vst [vmem:[%s6020_s7 + $0x30] sm:$0xff] %v2918_v30  ;;  %v2805_v28 = vadd.f32 %v2804_v8, %v2636_v3 }
 0x333   :  { %v2919_v32 = vadd.f32 %v3889_v44, %v2805_v28 }
 0x334   :  { %v2640_v57 = vpop.f32.mrf.mxu0 }
 0x335   :  { %2953 = vst [vmem:[%s6020_s7 + $0x38] sm:$0xff] %v2919_v32  ;;  %v2809_v16 = vpop.f32.mrf.mxu1  ;;  %v2641_v59 = vadd.f32 %v5745_v7, %v2640_v57  ;;  %v3897_v32 = vld [vmem:[%s6013_s0 + $0x78] sm:$0xff] }
 0x336   :  { %v2642_v17 = vpop.f32.mrf.mxu0 }
 0x337   :  { %v2811_v43 = vpop.f32.mrf.mxu1  ;;  %v2810_v55 = vadd.f32 %v2809_v16, %v2641_v59 }
 0x338   :  { %v2643_v50 = vpop.f32.mrf.mxu0 }
 0x339   :  { %v2812_v47 = vpop.f32.mrf.mxu1  ;;  %v2920_v18 = vadd.f32 %v3890_v37, %v2810_v55  ;;  %v2644_v29 = vadd.f32 %v5745_v7, %v2643_v50  ;;  %v3898_v37 = vld [vmem:[%s6013_s0 + $0x80] sm:$0xff] }
 0x33a   :  { %v2645_v34 = vpop.f32.mrf.mxu0 }
 0x33b   :  { %v2814_v38 = vpop.f32.mrf.mxu1  ;;  %2954 = vst [vmem:[%s6020_s7 + $0x40] sm:$0xff] %v2920_v18  ;;  %v2813_v33 = vadd.f32 %v2812_v47, %v2644_v29 }
 0x33c   :  { %v2648_v27 = vpop.f32.mrf.mxu0 }
 0x33d   :  { %v2817_v54 = vpop.f32.mrf.mxu1  ;;  %v2921_v25 = vadd.f32 %v3891_v61, %v2813_v33  ;;  %v2649_v41 = vadd.f32 %v5745_v7, %v2648_v27  ;;  %v3899_v61 = vld [vmem:[%s6013_s0 + $0x88] sm:$0xff] }
 0x33e   :  { %v2650_v24 = vpop.f32.mrf.mxu0 }
 0x33f   :  { %v2819_v6 = vpop.f32.mrf.mxu1  ;;  %2955 = vst [vmem:[%s6020_s7 + $0x48] sm:$0xff] %v2921_v25  ;;  %v2818_v42 = vadd.f32 %v2817_v54, %v2649_v41 }
 0x340   :  { %v2651_v4 = vpop.f32.mrf.mxu0 }
 0x341   :  { %v2820_v9 = vpop.f32.mrf.mxu1  ;;  %v2922_v53 = vadd.f32 %v3892_v21, %v2818_v42  ;;  %v2652_v62 = vadd.f32 %v5745_v7, %v2651_v4  ;;  %v3900_v21 = vld [vmem:[%s6013_s0 + $0x90] sm:$0xff] }
 0x342   :  { %v2653_v26 = vpop.f32.mrf.mxu0 }
 0x343   :  { %v2822_v31 = vpop.f32.mrf.mxu1  ;;  %2956 = vst [vmem:[%s6020_s7 + $0x50] sm:$0xff] %v2922_v53  ;;  %v2821_v12 = vadd.f32 %v2820_v9, %v2652_v62 }
 0x345   :  { %v2923_v11 = vadd.f32 %v3893_v2, %v2821_v12 }
 0x347   :  { %2957 = vst [vmem:[%s6020_s7 + $0x58] sm:$0xff] %v2923_v11  ;;  %v3901_v11 = vld [vmem:[%s6013_s0 + $0x98] sm:$0xff] }
 0x34b   :  { %v2656_v14 = vpop.f32.mrf.mxu0 }
 0x34c   :  { %v2657_v39 = vadd.f32 %v5745_v7, %v2656_v14  ;;  %v2825_v20 = vpop.f32.mrf.mxu1 }
 0x34d   :  { %v2658_v13 = vpop.f32.mrf.mxu0 }
 0x34e   :  { %v2826_v36 = vadd.f32 %v2825_v20, %v2657_v39  ;;  %v2827_v40 = vpop.f32.mrf.mxu1 }
 0x34f   :  { %v2659_v49 = vpop.f32.mrf.mxu0 }
 0x350   :  { %v2924_v51 = vadd.f32 %v3894_v56, %v2826_v36  ;;  %v2660_v19 = vadd.f32 %v5745_v7, %v2659_v49  ;;  %v2828_v22 = vpop.f32.mrf.mxu1 }
 0x351   :  { %v2661_v58 = vpop.f32.mrf.mxu0 }
 0x352   :  { %2958 = vst [vmem:[%s6020_s7 + $0x60] sm:$0xff] %v2924_v51  ;;  %v2829_v60 = vadd.f32 %v2828_v22, %v2660_v19  ;;  %v2830_v5 = vpop.f32.mrf.mxu1  ;;  %v3902_v51 = vld [vmem:[%s6013_s0 + $0xa0] sm:$0xff] }
 0x353   :  { %v2664_v63 = vpop.f32.mrf.mxu0 }
 0x354   :  { %v2925_v48 = vadd.f32 %v3895_v45, %v2829_v60  ;;  %v2665_v52 = vadd.f32 %v5745_v7, %v2664_v63  ;;  %v2833_v15 = vpop.f32.mrf.mxu1  ;;  %v3903_v45 = vld [vmem:[%s6013_s0 + $0xa8] sm:$0xff] }
 0x355   :  { %v2666_v1 = vpop.f32.mrf.mxu0 }
 0x356   :  { %2959 = vst [vmem:[%s6020_s7 + $0x68] sm:$0xff] %v2925_v48  ;;  %v2834_v35 = vadd.f32 %v2833_v15, %v2665_v52  ;;  %v2835_v23 = vpop.f32.mrf.mxu1 }
 0x357   :  { %v2667_v8 = vpop.f32.mrf.mxu0 }
 0x358   :  { %v2926_v30 = vadd.f32 %v3896_v0, %v2834_v35  ;;  %v2668_v3 = vadd.f32 %v5745_v7, %v2667_v8  ;;  %v2836_v46 = vpop.f32.mrf.mxu1 }
 0x359   :  { %v2669_v10 = vpop.f32.mrf.mxu0 }
 0x35a   :  { %2960 = vst [vmem:[%s6020_s7 + $0x70] sm:$0xff] %v2926_v30  ;;  %v2837_v28 = vadd.f32 %v2836_v46, %v2668_v3  ;;  %v2838_v44 = vpop.f32.mrf.mxu1  ;;  %v3904_v30 = vld [vmem:[%s6013_s0 + $0xb0] sm:$0xff] }
 0x35c   :  { %v2927_v57 = vadd.f32 %v3897_v32, %v2837_v28 }
 0x35e   :  { %2961 = vst [vmem:[%s6020_s7 + $0x78] sm:$0xff] %v2927_v57 }
 0x36b   :  { %v2672_v16 = vpop.f32.mrf.mxu0 }
 0x36c   :  { %v2673_v59 = vadd.f32 %v5745_v7, %v2672_v16  ;;  %v2841_v17 = vpop.f32.mrf.mxu1  ;;  %v3905_v16 = vld [vmem:[%s6013_s0 + $0xb8] sm:$0xff] }
 0x36d   :  { %v2674_v43 = vpop.f32.mrf.mxu0 }
 0x36e   :  { %v2842_v55 = vadd.f32 %v2841_v17, %v2673_v59  ;;  %v2843_v50 = vpop.f32.mrf.mxu1 }
 0x36f   :  { %v2675_v47 = vpop.f32.mrf.mxu0 }
 0x370   :  { %v2928_v18 = vadd.f32 %v3898_v37, %v2842_v55  ;;  %v2676_v29 = vadd.f32 %v5745_v7, %v2675_v47  ;;  %v2844_v34 = vpop.f32.mrf.mxu1 }
 0x371   :  { %v2677_v38 = vpop.f32.mrf.mxu0 }
 0x372   :  { %2962 = vst [vmem:[%s6020_s7 + $0x80] sm:$0xff] %v2928_v18  ;;  %v2845_v33 = vadd.f32 %v2844_v34, %v2676_v29  ;;  %v2846_v27 = vpop.f32.mrf.mxu1  ;;  %v3906_v18 = vld [vmem:[%s6013_s0 + $0xc0] sm:$0xff] }
 0x373   :  { %v2680_v54 = vpop.f32.mrf.mxu0 }
 0x374   :  { %v2929_v25 = vadd.f32 %v3899_v61, %v2845_v33  ;;  %v2681_v41 = vadd.f32 %v5745_v7, %v2680_v54  ;;  %v2849_v24 = vpop.f32.mrf.mxu1 }
 0x375   :  { %v2682_v6 = vpop.f32.mrf.mxu0 }
 0x376   :  { %2963 = vst [vmem:[%s6020_s7 + $0x88] sm:$0xff] %v2929_v25  ;;  %v2850_v42 = vadd.f32 %v2849_v24, %v2681_v41  ;;  %v2851_v4 = vpop.f32.mrf.mxu1  ;;  %v3907_v25 = vld [vmem:[%s6013_s0 + $0xc8] sm:$0xff] }
 0x377   :  { %v2683_v9 = vpop.f32.mrf.mxu0 }
 0x378   :  { %v2930_v53 = vadd.f32 %v3900_v21, %v2850_v42  ;;  %v2684_v62 = vadd.f32 %v5745_v7, %v2683_v9  ;;  %v2852_v26 = vpop.f32.mrf.mxu1 }
 0x379   :  { %v2685_v31 = vpop.f32.mrf.mxu0 }
 0x37a   :  { %2964 = vst [vmem:[%s6020_s7 + $0x90] sm:$0xff] %v2930_v53  ;;  %v2853_v12 = vadd.f32 %v2852_v26, %v2684_v62  ;;  %v2854_v2 = vpop.f32.mrf.mxu1  ;;  %v3908_v53 = vld [vmem:[%s6013_s0 + $0xd0] sm:$0xff] }
 0x37c   :  { %v2931_v14 = vadd.f32 %v3901_v11, %v2853_v12 }
 0x37e   :  { %2965 = vst [vmem:[%s6020_s7 + $0x98] sm:$0xff] %v2931_v14  ;;  %v3909_v14 = vld [vmem:[%s6013_s0 + $0xd8] sm:$0xff] }
 0x39d   :  { %v2688_v39 = vpop.f32.mrf.mxu0 }
 0x39e   :  { %v2689_v20 = vadd.f32 %v5745_v7, %v2688_v39 }
 0x39f   :  { %v2857_v13 = vpop.f32.mrf.mxu1  ;;  %v2690_v36 = vpop.f32.mrf.mxu0 }
 0x3a0   :  { %v2858_v40 = vadd.f32 %v2857_v13, %v2689_v20 }
 0x3a1   :  { %v2859_v49 = vpop.f32.mrf.mxu1  ;;  %v2691_v56 = vpop.f32.mrf.mxu0 }
 0x3a2   :  { %v2932_v19 = vadd.f32 %v3902_v51, %v2858_v40  ;;  %v2692_v22 = vadd.f32 %v5745_v7, %v2691_v56 }
 0x3a3   :  { %v2860_v58 = vpop.f32.mrf.mxu1  ;;  %v2693_v60 = vpop.f32.mrf.mxu0 }
 0x3a4   :  { %2966 = vst [vmem:[%s6020_s7 + $0xa0] sm:$0xff] %v2932_v19  ;;  %v2861_v5 = vadd.f32 %v2860_v58, %v2692_v22  ;;  %v3910_v19 = vld [vmem:[%s6013_s0 + $0xe0] sm:$0xff] }
 0x3a5   :  { %v2862_v63 = vpop.f32.mrf.mxu1 }
 0x3a6   :  { %v2933_v48 = vadd.f32 %v3903_v45, %v2861_v5 }
 0x3a8   :  { %2967 = vst [vmem:[%s6020_s7 + $0xa8] sm:$0xff] %v2933_v48 }
 0x3ac   :  { %v2696_v52 = vpop.f32.mrf.mxu0 }
 0x3ad   :  { %v2697_v15 = vadd.f32 %v5745_v7, %v2696_v52  ;;  %v2865_v1 = vpop.f32.mrf.mxu1  ;;  %v3911_v52 = vld [vmem:[%s6013_s0 + $0xe8] sm:$0xff] }
 0x3ae   :  { %v2698_v35 = vpop.f32.mrf.mxu0 }
 0x3af   :  { %v2866_v23 = vadd.f32 %v2865_v1, %v2697_v15  ;;  %v2867_v8 = vpop.f32.mrf.mxu1 }
 0x3b0   :  { %v2699_v0 = vpop.f32.mrf.mxu0 }
 0x3b1   :  { %v2934_v3 = vadd.f32 %v3904_v30, %v2866_v23  ;;  %v2700_v46 = vadd.f32 %v5745_v7, %v2699_v0  ;;  %v2868_v10 = vpop.f32.mrf.mxu1 }
 0x3b2   :  { %v2701_v28 = vpop.f32.mrf.mxu0 }
 0x3b3   :  { %2968 = vst [vmem:[%s6020_s7 + $0xb0] sm:$0xff] %v2934_v3  ;;  %v2869_v44 = vadd.f32 %v2868_v10, %v2700_v46  ;;  %v2870_v32 = vpop.f32.mrf.mxu1  ;;  %v3912_v3 = vld [vmem:[%s6013_s0 + $0xf0] sm:$0xff] }
 0x3b4   :  { %v2704_v57 = vpop.f32.mrf.mxu0 }
 0x3b5   :  { %v2935_v59 = vadd.f32 %v3905_v16, %v2869_v44  ;;  %v2705_v17 = vadd.f32 %v5745_v7, %v2704_v57  ;;  %v2873_v43 = vpop.f32.mrf.mxu1  ;;  %v3913_v16 = vld [vmem:[%s6013_s0 + $0xf8] sm:$0xff] }
 0x3b6   :  { %v2706_v55 = vpop.f32.mrf.mxu0 }
 0x3b7   :  { %2969 = vst [vmem:[%s6020_s7 + $0xb8] sm:$0xff] %v2935_v59  ;;  %v2874_v50 = vadd.f32 %v2873_v43, %v2705_v17  ;;  %v2875_v47 = vpop.f32.mrf.mxu1 }
 0x3b8   :  { %v2707_v37 = vpop.f32.mrf.mxu0 }
 0x3b9   :  { %v2936_v29 = vadd.f32 %v3906_v18, %v2874_v50  ;;  %v2708_v34 = vadd.f32 %v5745_v7, %v2707_v37  ;;  %v2876_v38 = vpop.f32.mrf.mxu1 }
 0x3ba   :  { %v2709_v33 = vpop.f32.mrf.mxu0 }
 0x3bb   :  { %2970 = vst [vmem:[%s6020_s7 + $0xc0] sm:$0xff] %v2936_v29  ;;  %v2877_v27 = vadd.f32 %v2876_v38, %v2708_v34  ;;  %v2878_v54 = vpop.f32.mrf.mxu1  ;;  %v3914_v29 = vld [vmem:[%s6013_s0 + $0x100] sm:$0xff] }
 0x3bc   :  { %v2712_v61 = vpop.f32.mrf.mxu0 }
 0x3bd   :  { %v2937_v41 = vadd.f32 %v3907_v25, %v2877_v27  ;;  %v2713_v24 = vadd.f32 %v5745_v7, %v2712_v61  ;;  %v2881_v6 = vpop.f32.mrf.mxu1  ;;  %v3915_v25 = vld [vmem:[%s6013_s0 + $0x108] sm:$0xff] }
 0x3be   :  { %v2714_v42 = vpop.f32.mrf.mxu0 }
 0x3bf   :  { %2971 = vst [vmem:[%s6020_s7 + $0xc8] sm:$0xff] %v2937_v41  ;;  %v2882_v4 = vadd.f32 %v2881_v6, %v2713_v24  ;;  %v2883_v9 = vpop.f32.mrf.mxu1 }
 0x3c0   :  { %v2715_v21 = vpop.f32.mrf.mxu0 }
 0x3c1   :  { %v2938_v62 = vadd.f32 %v3908_v53, %v2882_v4  ;;  %v2716_v26 = vadd.f32 %v5745_v7, %v2715_v21  ;;  %v2884_v31 = vpop.f32.mrf.mxu1 }
 0x3c2   :  { %v2717_v12 = vpop.f32.mrf.mxu0 }
 0x3c3   :  { %2972 = vst [vmem:[%s6020_s7 + $0xd0] sm:$0xff] %v2938_v62  ;;  %v2885_v2 = vadd.f32 %v2884_v31, %v2716_v26  ;;  %v2886_v11 = vpop.f32.mrf.mxu1 }
 0x3c5   :  { %v2939_v39 = vadd.f32 %v3909_v14, %v2885_v2 }
 0x3c7   :  { %2973 = vst [vmem:[%s6020_s7 + $0xd8] sm:$0xff] %v2939_v39 }
 0x3cb   :  { %v2720_v20 = vpop.f32.mrf.mxu0 }
 0x3cc   :  { %v2721_v13 = vadd.f32 %v5745_v7, %v2720_v20  ;;  %v2889_v36 = vpop.f32.mrf.mxu1 }
 0x3cd   :  { %v2722_v40 = vpop.f32.mrf.mxu0 }
 0x3ce   :  { %v2890_v49 = vadd.f32 %v2889_v36, %v2721_v13  ;;  %v2891_v56 = vpop.f32.mrf.mxu1 }
 0x3cf   :  { %v2723_v51 = vpop.f32.mrf.mxu0 }
 0x3d0   :  { %v2940_v22 = vadd.f32 %v3910_v19, %v2890_v49  ;;  %v2724_v58 = vadd.f32 %v5745_v7, %v2723_v51  ;;  %v2892_v60 = vpop.f32.mrf.mxu1 }
 0x3d1   :  { %v2725_v5 = vpop.f32.mrf.mxu0 }
 0x3d2   :  { %2974 = vst [vmem:[%s6020_s7 + $0xe0] sm:$0xff] %v2940_v22  ;;  %v2893_v63 = vadd.f32 %v2892_v60, %v2724_v58  ;;  %v2894_v45 = vpop.f32.mrf.mxu1 }
 0x3d3   :  { %v2728_v48 = vpop.f32.mrf.mxu0 }
 0x3d4   :  { %v2941_v15 = vadd.f32 %v3911_v52, %v2893_v63  ;;  %v2729_v1 = vadd.f32 %v5745_v7, %v2728_v48  ;;  %v2897_v35 = vpop.f32.mrf.mxu1 }
 0x3d5   :  { %v2730_v23 = vpop.f32.mrf.mxu0 }
 0x3d6   :  { %2975 = vst [vmem:[%s6020_s7 + $0xe8] sm:$0xff] %v2941_v15  ;;  %v2898_v8 = vadd.f32 %v2897_v35, %v2729_v1  ;;  %v2899_v0 = vpop.f32.mrf.mxu1 }
 0x3d7   :  { %v2731_v30 = vpop.f32.mrf.mxu0 }
 0x3d8   :  { %v2942_v46 = vadd.f32 %v3912_v3, %v2898_v8  ;;  %v2732_v10 = vadd.f32 %v5745_v7, %v2731_v30  ;;  %v2900_v28 = vpop.f32.mrf.mxu1 }
 0x3d9   :  { %v2733_v44 = vpop.f32.mrf.mxu0 }
 0x3da   :  { %2976 = vst [vmem:[%s6020_s7 + $0xf0] sm:$0xff] %v2942_v46  ;;  %v2901_v32 = vadd.f32 %v2900_v28, %v2732_v10  ;;  %v2902_v57 = vpop.f32.mrf.mxu1 }
 0x3dc   :  { %v2943_v59 = vadd.f32 %v3913_v16, %v2901_v32 }
 0x3de   :  { %2977 = vst [vmem:[%s6020_s7 + $0xf8] sm:$0xff] %v2943_v59 }
 0x3eb   :  { %v2736_v17 = vpop.f32.mrf.mxu0 }
 0x3ec   :  { %v2737_v43 = vadd.f32 %v5745_v7, %v2736_v17  ;;  %v2905_v55 = vpop.f32.mrf.mxu1 }
 0x3ed   :  { %v2738_v50 = vpop.f32.mrf.mxu0 }
 0x3ee   :  { %v2906_v47 = vadd.f32 %v2905_v55, %v2737_v43  ;;  %v2907_v37 = vpop.f32.mrf.mxu1 }
 0x3ef   :  { %v2739_v18 = vpop.f32.mrf.mxu0 }
 0x3f0   :  { %v2944_v34 = vadd.f32 %v3914_v29, %v2906_v47  ;;  %v2740_v38 = vadd.f32 %v5745_v7, %v2739_v18  ;;  %v2908_v33 = vpop.f32.mrf.mxu1 }
 0x3f1   :  { %v2741_v27 = vpop.f32.mrf.mxu0 }
 0x3f2   :  { %2978 = vst [vmem:[%s6020_s7 + $0x100] sm:$0xff] %v2944_v34  ;;  %v2909_v54 = vadd.f32 %v2908_v33, %v2740_v38  ;;  %v2910_v61 = vpop.f32.mrf.mxu1 }
 0x3f4   :  { %v2945_v41 = vadd.f32 %v3915_v25, %v2909_v54 }
 0x3f6   :  { %2979 = vst [vmem:[%s6020_s7 + $0x108] sm:$0xff] %v2945_v41 }

</bundles_post_ra>
